<compile_context>
chip_gen: v6e
topology: v6e:2x2x1
jax: 0.10.0
libtpu: 0.0.40
codegen_flags: <defaults>
</compile_context>

<pallas_src>
import math
from functools import partial

import numpy as np
import jax
import jax.numpy as jnp
from jax import lax
from jax.experimental import pallas as pl
from jax.experimental.pallas import tpu as pltpu

_VMEM_LIMIT = 64 * 1024 * 1024   # <= physical VMEM on v5e/v6e/v7x


# ------------------------------ in-kernel math ------------------------------

def _ln(x, g, b, eps):
    """LayerNorm over the last dim (biased variance, matching torch)."""
    mu = jnp.mean(x, axis=-1, keepdims=True)
    xc = x - mu
    var = jnp.mean(xc * xc, axis=-1, keepdims=True)
    return xc * lax.rsqrt(var + eps) * g + b


# -------------------- depth-fused transformer block stack --------------------

_WKEYS = ("ln1_w", "ln1_b", "qkv_w", "qkv_b", "proj_w", "proj_b",
          "ln2_w", "ln2_b", "fc1_w", "fc1_b", "fc2_w", "fc2_b")
_MATMUL_KEYS = frozenset({"qkv_w", "proj_w", "fc1_w", "fc2_w"})


def _blocks_kernel(x_ref, pos_ref, ln1_w, ln1_b, qkv_w, qkv_b, proj_w, proj_b,
                   ln2_w, ln2_b, fc1_w, fc1_b, fc2_w, fc2_b, o_ref,
                   *, num_heads, scale, eps, add_pos):
    d_idx = pl.program_id(1)                     # depth (inner, "arbitrary")

    @pl.when(d_idx == 0)
    def _():
        base = x_ref[...]
        if add_pos:                               # fused decoder pos-embed add
            base = base + pos_ref[...]
        o_ref[...] = base

    # o_ref is resident across the depth axis (constant output block index);
    # it carries the activations between blocks entirely inside VMEM.
    x = o_ref[...]                                # (bt, T, D) f32
    Bt, T, D = x.shape
    dh = D // num_heads
    x2 = x.reshape(Bt * T, D)                     # fold batch into matmul M

    # ---- attention branch: LN1 -> fused QKV matmul (bt*T rows) ----
    y = _ln(x2, ln1_w[0], ln1_b[0], eps)
    qkv = jnp.dot(y.astype(jnp.bfloat16), qkv_w[0],
                  preferred_element_type=jnp.float32) + qkv_b[0]   # (bt*T, 3D)
    qkv = qkv.reshape(Bt, T, 3 * D)

    pw = proj_w[0]                                # (D, D) bf16
    attn_acc = jnp.zeros((Bt * T, D), jnp.float32)
    for h in range(num_heads):                    # small static unroll
        q = qkv[:, :, h * dh:(h + 1) * dh].astype(jnp.bfloat16)
        k = qkv[:, :, D + h * dh:D + (h + 1) * dh].astype(jnp.bfloat16)
        v = qkv[:, :, 2 * D + h * dh:2 * D + (h + 1) * dh].astype(jnp.bfloat16)
        # batched over samples: bf16 MXU inputs, f32 accumulation
        s = jnp.einsum("bqd,bkd->bqk", q, k,
                       preferred_element_type=jnp.float32) * scale
        s = s - jnp.max(s, axis=-1, keepdims=True)      # f32 softmax (VPU/EUP)
        p = jnp.exp(s)
        p = p * pl.reciprocal(jnp.sum(p, axis=-1, keepdims=True), approx=True)
        head = jnp.einsum("bqk,bkd->bqd", p.astype(jnp.bfloat16), v,
                          preferred_element_type=jnp.float32)      # (bt, T, dh)
        # per-head accumulation through the proj weight slab -> no lane concat
        attn_acc = attn_acc + jnp.dot(
            head.reshape(Bt * T, dh).astype(jnp.bfloat16),
            pw[h * dh:(h + 1) * dh, :],
            preferred_element_type=jnp.float32)

    x2 = x2 + attn_acc + proj_b[0]                # proj bias + residual, fused

    # ---- MLP branch: LN2 -> fc1 + GELU -> fc2 + residual, fused ----
    y2 = _ln(x2, ln2_w[0], ln2_b[0], eps)
    h1 = jnp.dot(y2.astype(jnp.bfloat16), fc1_w[0],
                 preferred_element_type=jnp.float32) + fc1_b[0]
    # TODO(synk): torch nn.GELU defaults to exact erf; tanh approx used here
    # for Mosaic-safe lowering (small numerical drift vs the reference).
    h1 = jax.nn.gelu(h1, approximate=True)
    x2 = x2 + jnp.dot(h1.astype(jnp.bfloat16), fc2_w[0],
                      preferred_element_type=jnp.float32) + fc2_b[0]

    o_ref[...] = x2.reshape(Bt, T, D)


def _pick_batch_tile(B, T, D, budget_bytes=4 << 20):
    """Largest divisor of B whose f32 activation tile fits a modest budget."""
    bt = max(1, min(B, budget_bytes // max(T * D * 4, 1)))
    while B % bt:
        bt -= 1
    return bt


def pallas_blocks(x, sp, num_heads, pos=None, eps=1e-5, bt=None):
    """Run the whole stack of pre-norm transformer blocks in ONE pallas_call.

    sp: stacked block params (leading depth axis), matmul weights in bf16.
    pos: optional (1, T, D) positional embedding added before the first block.
    """
    B, T, D = x.shape
    depth = sp["qkv_w"].shape[0]
    dh = D // num_heads
    if bt is None:
        bt = _pick_batch_tile(B, T, D)
    nb = B // bt

    add_pos = pos is not None
    if pos is None:
        pos = jnp.zeros((1, 1, D), jnp.float32)   # dummy, never read
    Tp = pos.shape[1]

    xspec = pl.BlockSpec((bt, T, D), lambda b, d: (b, 0, 0))
    pspec = pl.BlockSpec((1, Tp, D), lambda b, d: (0, 0, 0))

    def wspec(arr):
        shp = arr.shape
        return pl.BlockSpec((1,) + shp[1:],
                            lambda b, d: (d,) + (0,) * (len(shp) - 1))

    return pl.pallas_call(
        partial(_blocks_kernel, num_heads=num_heads, scale=dh ** -0.5,
                eps=eps, add_pos=add_pos),
        out_shape=jax.ShapeDtypeStruct((B, T, D), jnp.float32),
        grid=(nb, depth),
        in_specs=[xspec, pspec] + [wspec(sp[k]) for k in _WKEYS],
        out_specs=xspec,
        compiler_params=pltpu.CompilerParams(
            dimension_semantics=("parallel", "arbitrary"),
            vmem_limit_bytes=_VMEM_LIMIT),
    )(x, pos, *[sp[k] for k in _WKEYS])


# ----------------------- patch embed (+bias +pos-embed) ----------------------

def _patch_embed_kernel(x_ref, w_ref, b_ref, pos_ref, o_ref):
    o_ref[0] = (jnp.dot(x_ref[0].astype(jnp.bfloat16), w_ref[...],
                        preferred_element_type=jnp.float32)
                + b_ref[...] + pos_ref[...])


def pallas_patch_embed(xp, w_bf16, b_row, pos):
    """xp: (N, L, C*p*p), w bf16 (K, D), b (1, D), pos: (L, D)."""
    N, L, K = xp.shape
    D = w_bf16.shape[1]
    return pl.pallas_call(
        _patch_embed_kernel,
        out_shape=jax.ShapeDtypeStruct((N, L, D), jnp.float32),
        grid=(N,),
        in_specs=[pl.BlockSpec((1, L, K), lambda n: (n, 0, 0)),
                  pl.BlockSpec((K, D), lambda n: (0, 0)),
                  pl.BlockSpec((1, D), lambda n: (0, 0)),
                  pl.BlockSpec((L, D), lambda n: (0, 0))],
        out_specs=pl.BlockSpec((1, L, D), lambda n: (n, 0, 0)),
        compiler_params=pltpu.CompilerParams(
            dimension_semantics=("parallel",)),
    )(xp, w_bf16, b_row, pos)


# --------------------- fused LayerNorm -> Linear (dec embed) -----------------

def _ln_linear_kernel(x_ref, g_ref, b_ref, w_ref, bias_ref, o_ref, *, eps):
    y = _ln(x_ref[0], g_ref[...], b_ref[...], eps)
    o_ref[0] = jnp.dot(y.astype(jnp.bfloat16), w_ref[...],
                       preferred_element_type=jnp.float32) + bias_ref[...]


def pallas_ln_linear(x, g, b, w_bf16, bias, eps=1e-5):
    """g,b: (1, Din) f32; w bf16 (Din, Dout); bias (1, Dout) f32."""
    N, T, Din = x.shape
    Dout = w_bf16.shape[1]
    return pl.pallas_call(
        partial(_ln_linear_kernel, eps=eps),
        out_shape=jax.ShapeDtypeStruct((N, T, Dout), jnp.float32),
        grid=(N,),
        in_specs=[pl.BlockSpec((1, T, Din), lambda n: (n, 0, 0)),
                  pl.BlockSpec((1, Din), lambda n: (0, 0)),
                  pl.BlockSpec((1, Din), lambda n: (0, 0)),
                  pl.BlockSpec((Din, Dout), lambda n: (0, 0)),
                  pl.BlockSpec((1, Dout), lambda n: (0, 0))],
        out_specs=pl.BlockSpec((1, T, Dout), lambda n: (n, 0, 0)),
        compiler_params=pltpu.CompilerParams(
            dimension_semantics=("parallel",)),
    )(x, g, b, w_bf16, bias)


# --------------- fused decoder head: LN -> pred_img & pred_feat --------------

def _decoder_head_kernel(x_ref, g_ref, b_ref, wi_ref, bi_ref, wf_ref, bf_ref,
                         img_ref, feat_ref, *, eps):
    y = _ln(x_ref[0], g_ref[...], b_ref[...], eps)
    yb = y.astype(jnp.bfloat16)
    img_ref[0] = jnp.dot(yb, wi_ref[...],
                         preferred_element_type=jnp.float32) + bi_ref[...]
    feat_ref[0] = jnp.dot(yb, wf_ref[...],
                          preferred_element_type=jnp.float32) + bf_ref[...]


def pallas_decoder_head(x, g, b, wi, bi, wf, bf, eps=1e-5):
    N, T, D = x.shape
    Pi, Pf = wi.shape[1], wf.shape[1]
    return pl.pallas_call(
        partial(_decoder_head_kernel, eps=eps),
        out_shape=(jax.ShapeDtypeStruct((N, T, Pi), jnp.float32),
                   jax.ShapeDtypeStruct((N, T, Pf), jnp.float32)),
        grid=(N,),
        in_specs=[pl.BlockSpec((1, T, D), lambda n: (n, 0, 0)),
                  pl.BlockSpec((1, D), lambda n: (0, 0)),
                  pl.BlockSpec((1, D), lambda n: (0, 0)),
                  pl.BlockSpec((D, Pi), lambda n: (0, 0)),
                  pl.BlockSpec((1, Pi), lambda n: (0, 0)),
                  pl.BlockSpec((D, Pf), lambda n: (0, 0)),
                  pl.BlockSpec((1, Pf), lambda n: (0, 0))],
        out_specs=(pl.BlockSpec((1, T, Pi), lambda n: (n, 0, 0)),
                   pl.BlockSpec((1, T, Pf), lambda n: (n, 0, 0))),
        compiler_params=pltpu.CompilerParams(
            dimension_semantics=("parallel",)),
    )(x, g, b, wi, bi, wf, bf)


# ---------------- masked per-patch MSE, tiled over batch -> scalar -----------

def _masked_mse_kernel(pred_ref, tgt_ref, mask_ref, o_ref, num_ref, den_ref):
    n = pl.program_id(0)

    @pl.when(n == 0)
    def _():
        num_ref[...] = jnp.zeros_like(num_ref)
        den_ref[...] = jnp.zeros_like(den_ref)

    d = pred_ref[...] - tgt_ref[...]              # (1, L, P)
    per = jnp.mean(d * d, axis=-1)                # (1, L)
    m = mask_ref[0]                               # (1, L)
    num_ref[...] += jnp.sum(per * m, keepdims=True)
    den_ref[...] += jnp.sum(m, keepdims=True)

    @pl.when(n == pl.num_programs(0) - 1)
    def _():
        # TODO(synk): no guard for sum(mask)==0 (never happens at 0.75 ratio).
        o_ref[...] = num_ref[...] / den_ref[...]


def pallas_masked_mse(pred, tgt, mask):
    N, L, P = pred.shape
    out = pl.pallas_call(
        _masked_mse_kernel,
        out_shape=jax.ShapeDtypeStruct((1, 1), jnp.float32),
        grid=(N,),
        in_specs=[pl.BlockSpec((1, L, P), lambda n: (n, 0, 0)),
                  pl.BlockSpec((1, L, P), lambda n: (n, 0, 0)),
                  pl.BlockSpec((1, 1, L), lambda n: (n, 0, 0))],
        out_specs=pl.BlockSpec((1, 1), lambda n: (0, 0)),
        scratch_shapes=[pltpu.VMEM((1, 1), jnp.float32),
                        pltpu.VMEM((1, 1), jnp.float32)],
        compiler_params=pltpu.CompilerParams(
            dimension_semantics=("arbitrary",),
            vmem_limit_bytes=_VMEM_LIMIT),
    )(pred, tgt, mask.reshape(N, 1, L))
    return out[0, 0]


# ------------------------- deterministic parameters --------------------------

def _sincos_1d(embed_dim, pos):
    omega = np.arange(embed_dim // 2, dtype=np.float64) / (embed_dim / 2.0)
    omega = 1.0 / 10000 ** omega
    out = np.einsum("m,d->md", pos.reshape(-1), omega)
    return np.concatenate([np.sin(out), np.cos(out)], axis=1)


def get_2d_sincos_pos_embed(embed_dim, grid_size, n_prefix=2):
    gh = np.arange(grid_size, dtype=np.float64)
    gw = np.arange(grid_size, dtype=np.float64)
    grid = np.meshgrid(gw, gh)                      # w first (MAE convention)
    grid = np.stack(grid, axis=0).reshape(2, -1)
    emb_h = _sincos_1d(embed_dim // 2, grid[0])
    emb_w = _sincos_1d(embed_dim // 2, grid[1])
    pos = np.concatenate([emb_h, emb_w], axis=1)
    return np.concatenate([np.zeros((n_prefix, embed_dim)), pos], axis=0)


def xavier_uniform(key, fan_in, fan_out):
    bound = math.sqrt(6.0 / (fan_in + fan_out))
    return jax.random.uniform(key, (fan_in, fan_out), jnp.float32, -bound, bound)


def init_block(key, dim, hidden):
    ks = jax.random.split(key, 4)
    return dict(
        ln1_w=jnp.ones((dim,), jnp.float32), ln1_b=jnp.zeros((dim,), jnp.float32),
        qkv_w=xavier_uniform(ks[0], dim, 3 * dim), qkv_b=jnp.zeros((3 * dim,), jnp.float32),
        proj_w=xavier_uniform(ks[1], dim, dim), proj_b=jnp.zeros((dim,), jnp.float32),
        ln2_w=jnp.ones((dim,), jnp.float32), ln2_b=jnp.zeros((dim,), jnp.float32),
        fc1_w=xavier_uniform(ks[2], dim, hidden), fc1_b=jnp.zeros((hidden,), jnp.float32),
        fc2_w=xavier_uniform(ks[3], hidden, dim), fc2_b=jnp.zeros((dim,), jnp.float32),
    )


def init_params(key, cfg):
    p = cfg["patch_size"]; C = cfg["in_chans"]; D = cfg["embed_dim"]
    dd = cfg["decoder_embed_dim"]
    gh = cfg["img_size"] // p
    hidden = int(D * cfg["mlp_ratio"])
    dhidden = int(dd * cfg["mlp_ratio"])
    keys = iter(jax.random.split(key, 16 + cfg["depth"] + cfg["decoder_depth"]))

    params = {}
    params["patch_w"] = xavier_uniform(next(keys), C * p * p, D)     # conv as matmul
    params["patch_b"] = jnp.zeros((D,), jnp.float32)
    params["cls_token"] = 0.02 * jax.random.normal(next(keys), (1, 1, D), jnp.float32)
    params["dist_token"] = 0.02 * jax.random.normal(next(keys), (1, 1, D), jnp.float32)
    params["mask_token"] = 0.02 * jax.random.normal(next(keys), (1, 1, dd), jnp.float32)
    params["pos_embed"] = jnp.asarray(get_2d_sincos_pos_embed(D, gh)[None], jnp.float32)
    params["dec_pos_embed"] = jnp.asarray(get_2d_sincos_pos_embed(dd, gh)[None], jnp.float32)
    params["blocks"] = [init_block(next(keys), D, hidden) for _ in range(cfg["depth"])]
    params["norm_w"] = jnp.ones((D,), jnp.float32)
    params["norm_b"] = jnp.zeros((D,), jnp.float32)
    params["dec_embed_w"] = xavier_uniform(next(keys), D, dd)
    params["dec_embed_b"] = jnp.zeros((dd,), jnp.float32)
    params["dec_blocks"] = [init_block(next(keys), dd, dhidden)
                            for _ in range(cfg["decoder_depth"])]
    params["dec_norm_w"] = jnp.ones((dd,), jnp.float32)
    params["dec_norm_b"] = jnp.zeros((dd,), jnp.float32)
    params["dec_pred_w"] = xavier_uniform(next(keys), dd, p * p * C)
    params["dec_pred_b"] = jnp.zeros((p * p * C,), jnp.float32)
    params["dec_pred_feat_w"] = xavier_uniform(next(keys), dd, D)
    params["dec_pred_feat_b"] = jnp.zeros((D,), jnp.float32)
    return params


def _stack_blocks(blocks):
    """Stack per-block params along a leading depth axis; pre-cast matmul
    weights to bf16 ONCE (no per-call astype HBM traffic)."""
    out = {}
    for k in _WKEYS:
        w = jnp.stack([bp[k] for bp in blocks], axis=0)
        if k in _MATMUL_KEYS:
            out[k] = w.astype(jnp.bfloat16)          # (depth, Din, Dout) bf16
        else:
            out[k] = w[:, None, :]                   # (depth, 1, dim) f32
    return out


def prepare_params(params):
    """One-time param prep: depth-stacking, bf16 weight casts, bias reshapes."""
    return {
        "patch_w": params["patch_w"].astype(jnp.bfloat16),
        "patch_b": params["patch_b"].reshape(1, -1),
        "pos_embed": params["pos_embed"],
        "dec_pos_embed": params["dec_pos_embed"],
        "cls_token": params["cls_token"],
        "dist_token": params["dist_token"],
        "mask_token": params["mask_token"],
        "enc_blocks": _stack_blocks(params["blocks"]),
        "dec_blocks": _stack_blocks(params["dec_blocks"]),
        "norm_w": params["norm_w"].reshape(1, -1),
        "norm_b": params["norm_b"].reshape(1, -1),
        "dec_embed_w": params["dec_embed_w"].astype(jnp.bfloat16),
        "dec_embed_b": params["dec_embed_b"].reshape(1, -1),
        "dec_norm_w": params["dec_norm_w"].reshape(1, -1),
        "dec_norm_b": params["dec_norm_b"].reshape(1, -1),
        "dec_pred_w": params["dec_pred_w"].astype(jnp.bfloat16),
        "dec_pred_b": params["dec_pred_b"].reshape(1, -1),
        "dec_pred_feat_w": params["dec_pred_feat_w"].astype(jnp.bfloat16),
        "dec_pred_feat_b": params["dec_pred_feat_b"].reshape(1, -1),
    }


# ------------------------------ model forward --------------------------------

def forward_mae(imgs, prep, cfg, mask_ratio, ids_shuffle):
    p = cfg["patch_size"]; D = cfg["embed_dim"]; dd = cfg["decoder_embed_dim"]
    N, C, H, W = imgs.shape
    gh = H // p
    L = gh * gh

    # ---- encoder ----
    # patch embed: conv(k=p, s=p) == matmul over (C, p, p)-flattened patches,
    # fused with bias + positional-embedding add.
    xp = imgs.reshape(N, C, gh, p, gh, p).transpose(0, 2, 4, 1, 3, 5)
    xp = xp.reshape(N, L, C * p * p)
    x = pallas_patch_embed(xp, prep["patch_w"], prep["patch_b"],
                           prep["pos_embed"][0, 2:, :])               # (N, L, D)

    # random masking (argsort / gathers kept in JAX glue)
    len_keep = int(L * (1 - mask_ratio))
    ids_restore = jnp.argsort(ids_shuffle, axis=1)
    ids_keep = ids_shuffle[:, :len_keep]
    x_masked = jnp.take_along_axis(x, ids_keep[:, :, None], axis=1)
    mask = jnp.ones((N, L), jnp.float32).at[:, :len_keep].set(0.0)
    mask = jnp.take_along_axis(mask, ids_restore, axis=1)

    cls_tok = jnp.broadcast_to(prep["cls_token"] + prep["pos_embed"][:, :1, :],
                               (N, 1, D))
    # NOTE: matches the reference bug — dist token is NOT given its pos-embed.
    dist_tok = jnp.broadcast_to(prep["dist_token"], (N, 1, D))
    x = jnp.concatenate([cls_tok, dist_tok, x_masked], axis=1)        # (N, 2+keep, D)

    # all encoder blocks in ONE pallas_call (activations VMEM-resident)
    x = pallas_blocks(x, prep["enc_blocks"], cfg["num_heads"])

    # ---- decoder ----
    # fused: encoder final LayerNorm + decoder_embed linear
    y = pallas_ln_linear(x, prep["norm_w"], prep["norm_b"],
                         prep["dec_embed_w"], prep["dec_embed_b"])
    T_enc = y.shape[1]

    mask_tokens = jnp.broadcast_to(prep["mask_token"], (N, L + 2 - T_enc, dd))
    y_ = jnp.concatenate([y[:, 2:, :], mask_tokens], axis=1)
    y_ = jnp.take_along_axis(y_, ids_restore[:, :, None], axis=1)
    y = jnp.concatenate([y[:, :2, :], y_], axis=1)                    # (N, L+2, dd)

    # decoder_pos_embed add fused into the first decoder block; all decoder
    # blocks in ONE pallas_call
    y = pallas_blocks(y, prep["dec_blocks"], cfg["decoder_num_heads"],
                      pos=prep["dec_pos_embed"])

    # fused: decoder final LayerNorm + both prediction heads
    pred_img, pred_feat = pallas_decoder_head(
        y, prep["dec_norm_w"], prep["dec_norm_b"],
        prep["dec_pred_w"], prep["dec_pred_b"],
        prep["dec_pred_feat_w"], prep["dec_pred_feat_b"])
    pred_img = pred_img[:, 2:, :]
    pred_feat = pred_feat[:, 2:, :]

    # ---- loss ---- (norm_pix_loss=False), tiled batched reduction in-kernel
    tgt = imgs.reshape(N, C, gh, p, gh, p)
    tgt = jnp.einsum("nchpwq->nhwpqc", tgt).reshape(N, L, p * p * C)
    loss = pallas_masked_mse(pred_img, tgt, mask)
    return loss, pred_feat, mask, ids_shuffle


# ----------------------------------- main ------------------------------------

if __name__ == "__main__":
    cfg = dict(img_size=16, patch_size=4, in_chans=3, embed_dim=32, depth=2,
               num_heads=2, decoder_embed_dim=16, decoder_depth=1,
               decoder_num_heads=2, mlp_ratio=4.0)

    key = jax.random.PRNGKey(0)
    kp, kimg, kmask = jax.random.split(key, 3)
    params = init_params(kp, cfg)
    prep = prepare_params(params)                 # one-time stack + bf16 cast

    N = 2
    imgs = jax.random.normal(
        kimg, (N, cfg["in_chans"], cfg["img_size"], cfg["img_size"]), jnp.float32)
    L = (cfg["img_size"] // cfg["patch_size"]) ** 2
    noise = jax.random.uniform(kmask, (N, L))
    ids_shuffle = jnp.argsort(noise, axis=1)      # reference draws torch.rand+argsort

    fwd = jax.jit(lambda im, pr, ids: forward_mae(im, pr, cfg, 0.75, ids))
    loss, pred_feat, mask, ids_out = fwd(imgs, prep, ids_shuffle)
    jax.block_until_ready((loss, pred_feat, mask, ids_out))

    assert pred_feat.shape == (N, L, cfg["embed_dim"])
    assert mask.shape == (N, L)
    assert loss.shape == ()
    print("KERNEL_OK")
</pallas_src>

<mosaic_0001>
module attributes {stable_mosaic.version = 11 : i64} {
  func.func @_patch_embed_kernel(%arg0: i32, %arg1: memref<1x16x48xf32, #tpu.memory_space<vmem>>, %arg2: memref<48x32xbf16, #tpu.memory_space<vmem>>, %arg3: memref<1x32xf32, #tpu.memory_space<vmem>>, %arg4: memref<16x32xf32, #tpu.memory_space<vmem>>, %arg5: memref<1x16x32xf32, #tpu.memory_space<vmem>>) attributes {dimension_semantics = [#tpu.dimension_semantics<parallel>], iteration_bounds = array<i64: 2>, scalar_prefetch = 0 : i64, scratch_operands = 0 : i64, tpu.core_type = #tpu.core_type<tc>, window_params = [{transform_indices = @transform_0, window_bounds = array<i64: 1, 16, 48>}, {pipeline_mode = #tpu.pipeline_mode<synchronous>, transform_indices = @transform_1, window_bounds = array<i64: 48, 32>}, {pipeline_mode = #tpu.pipeline_mode<synchronous>, transform_indices = @transform_2, window_bounds = array<i64: 1, 32>}, {pipeline_mode = #tpu.pipeline_mode<synchronous>, transform_indices = @transform_3, window_bounds = array<i64: 16, 32>}, {transform_indices = @transform_4, window_bounds = array<i64: 1, 16, 32>}]} {
    %c0 = arith.constant 0 : index
    %c0_0 = arith.constant 0 : index
    %c0_1 = arith.constant 0 : index
    %0 = vector.load %arg1[%c0, %c0_0, %c0_1] : memref<1x16x48xf32, #tpu.memory_space<vmem>>, vector<1x16x48xf32>
    %1 = vector.shape_cast %0 : vector<1x16x48xf32> to vector<16x48xf32>
    %2 = arith.truncf %1 : vector<16x48xf32> to vector<16x48xbf16>
    %c0_2 = arith.constant 0 : index
    %c0_3 = arith.constant 0 : index
    %3 = vector.load %arg2[%c0_2, %c0_3] : memref<48x32xbf16, #tpu.memory_space<vmem>>, vector<48x32xbf16>
    %cst = arith.constant dense<0.000000e+00> : vector<16x32xf32>
    %4 = tpu.matmul %2, %3, %cst {dimension_numbers = #tpu.dot_dimension_numbers<[1], [0], [0], [1], [0, 0, 1, 1], [], []>} : vector<16x48xbf16>, vector<48x32xbf16>, vector<16x32xf32> -> vector<16x32xf32>
    %c0_4 = arith.constant 0 : index
    %c0_5 = arith.constant 0 : index
    %5 = vector.load %arg3[%c0_4, %c0_5] : memref<1x32xf32, #tpu.memory_space<vmem>>, vector<1x32xf32>
    %6 = vector.broadcast %5 : vector<1x32xf32> to vector<16x32xf32>
    %7 = arith.addf %4, %6 : vector<16x32xf32>
    %c0_6 = arith.constant 0 : index
    %c0_7 = arith.constant 0 : index
    %8 = vector.load %arg4[%c0_6, %c0_7] : memref<16x32xf32, #tpu.memory_space<vmem>>, vector<16x32xf32>
    %9 = arith.addf %7, %8 : vector<16x32xf32>
    %c0_8 = arith.constant 0 : index
    %c0_9 = arith.constant 0 : index
    %c0_10 = arith.constant 0 : index
    %10 = vector.load %arg5[%c0_8, %c0_9, %c0_10] : memref<1x16x32xf32, #tpu.memory_space<vmem>>, vector<1x16x32xf32>
    %11 = vector.shape_cast %10 : vector<1x16x32xf32> to vector<16x32xf32>
    %12 = vector.shape_cast %9 : vector<16x32xf32> to vector<1x16x32xf32>
    tpu.vector_store %arg5[%c0_8, %c0_9, %c0_10], %12 {strides = array<i32>} : memref<1x16x32xf32, #tpu.memory_space<vmem>>, vector<1x16x32xf32>,
    return
  }
  func.func @transform_0(%arg0: i32) -> (i32, i32, i32) {
    %c0_i32 = arith.constant 0 : i32
    %c0_i32_0 = arith.constant 0 : i32
    %c0_i32_1 = arith.constant 0 : i32
    return %arg0, %c0_i32, %c0_i32_0 : i32, i32, i32
  }
  func.func @transform_1(%arg0: i32) -> (i32, i32) {
    %c0_i32 = arith.constant 0 : i32
    %c0_i32_0 = arith.constant 0 : i32
    %c0_i32_1 = arith.constant 0 : i32
    return %c0_i32, %c0_i32_0 : i32, i32
  }
  func.func @transform_2(%arg0: i32) -> (i32, i32) {
    %c0_i32 = arith.constant 0 : i32
    %c0_i32_0 = arith.constant 0 : i32
    %c0_i32_1 = arith.constant 0 : i32
    return %c0_i32, %c0_i32_0 : i32, i32
  }
  func.func @transform_3(%arg0: i32) -> (i32, i32) {
    %c0_i32 = arith.constant 0 : i32
    %c0_i32_0 = arith.constant 0 : i32
    %c0_i32_1 = arith.constant 0 : i32
    return %c0_i32, %c0_i32_0 : i32, i32
  }
  func.func @transform_4(%arg0: i32) -> (i32, i32, i32) {
    %c0_i32 = arith.constant 0 : i32
    %c0_i32_0 = arith.constant 0 : i32
    %c0_i32_1 = arith.constant 0 : i32
    return %arg0, %c0_i32, %c0_i32_0 : i32, i32, i32
  }
}

module attributes {stable_mosaic.version = 11 : i64} {
  func.func @_blocks_kernel(%arg0: i32, %arg1: i32, %arg2: memref<2x6x32xf32, #tpu.memory_space<vmem>>, %arg3: memref<1x1x32xf32, #tpu.memory_space<vmem>>, %arg4: memref<1x1x32xf32, #tpu.memory_space<vmem>>, %arg5: memref<1x1x32xf32, #tpu.memory_space<vmem>>, %arg6: memref<1x32x96xbf16, #tpu.memory_space<vmem>>, %arg7: memref<1x1x96xf32, #tpu.memory_space<vmem>>, %arg8: memref<1x32x32xbf16, #tpu.memory_space<vmem>>, %arg9: memref<1x1x32xf32, #tpu.memory_space<vmem>>, %arg10: memref<1x1x32xf32, #tpu.memory_space<vmem>>, %arg11: memref<1x1x32xf32, #tpu.memory_space<vmem>>, %arg12: memref<1x32x128xbf16, #tpu.memory_space<vmem>>, %arg13: memref<1x1x128xf32, #tpu.memory_space<vmem>>, %arg14: memref<1x128x32xbf16, #tpu.memory_space<vmem>>, %arg15: memref<1x1x32xf32, #tpu.memory_space<vmem>>, %arg16: memref<2x6x32xf32, #tpu.memory_space<vmem>>) attributes {dimension_semantics = [#tpu.dimension_semantics<parallel>, #tpu.dimension_semantics<arbitrary>], iteration_bounds = array<i64: 1, 2>, scalar_prefetch = 0 : i64, scratch_operands = 0 : i64, tpu.core_type = #tpu.core_type<tc>, window_params = [{transform_indices = @transform_0, window_bounds = array<i64: 2, 6, 32>}, {pipeline_mode = #tpu.pipeline_mode<synchronous>, transform_indices = @transform_1, window_bounds = array<i64: 1, 1, 32>}, {transform_indices = @transform_2, window_bounds = array<i64: 1, 1, 32>}, {transform_indices = @transform_3, window_bounds = array<i64: 1, 1, 32>}, {transform_indices = @transform_4, window_bounds = array<i64: 1, 32, 96>}, {transform_indices = @transform_5, window_bounds = array<i64: 1, 1, 96>}, {transform_indices = @transform_6, window_bounds = array<i64: 1, 32, 32>}, {transform_indices = @transform_7, window_bounds = array<i64: 1, 1, 32>}, {transform_indices = @transform_8, window_bounds = array<i64: 1, 1, 32>}, {transform_indices = @transform_9, window_bounds = array<i64: 1, 1, 32>}, {transform_indices = @transform_10, window_bounds = array<i64: 1, 32, 128>}, {transform_indices = @transform_11, window_bounds = array<i64: 1, 1, 128>}, {transform_indices = @transform_12, window_bounds = array<i64: 1, 128, 32>}, {transform_indices = @transform_13, window_bounds = array<i64: 1, 1, 32>}, {transform_indices = @transform_14, window_bounds = array<i64: 2, 6, 32>}]} {
    %c0_i32 = arith.constant 0 : i32
    %0 = arith.cmpi eq, %arg1, %c0_i32 : i32
    %1 = arith.extui %0 : i1 to i32
    %c0_i32_0 = arith.constant 0 : i32
    %2 = arith.cmpi ne, %1, %c0_i32_0 : i32
    scf.if %2 {
      %c0_71 = arith.constant 0 : index
      %c0_72 = arith.constant 0 : index
      %c0_73 = arith.constant 0 : index
      %154 = vector.load %arg2[%c0_71, %c0_72, %c0_73] : memref<2x6x32xf32, #tpu.memory_space<vmem>>, vector<2x6x32xf32>
      %c0_74 = arith.constant 0 : index
      %c0_75 = arith.constant 0 : index
      %c0_76 = arith.constant 0 : index
      %155 = vector.load %arg16[%c0_74, %c0_75, %c0_76] : memref<2x6x32xf32, #tpu.memory_space<vmem>>, vector<2x6x32xf32>
      tpu.vector_store %arg16[%c0_74, %c0_75, %c0_76], %154 {strides = array<i32>} : memref<2x6x32xf32, #tpu.memory_space<vmem>>, vector<2x6x32xf32>,
    } else {
    }
    %c0 = arith.constant 0 : index
    %c0_1 = arith.constant 0 : index
    %c0_2 = arith.constant 0 : index
    %3 = vector.load %arg16[%c0, %c0_1, %c0_2] : memref<2x6x32xf32, #tpu.memory_space<vmem>>, vector<2x6x32xf32>
    %4 = vector.shape_cast %3 : vector<2x6x32xf32> to vector<12x32xf32>
    %c0_3 = arith.constant 0 : index
    %c0_4 = arith.constant 0 : index
    %c0_5 = arith.constant 0 : index
    %5 = vector.load %arg4[%c0_3, %c0_4, %c0_5] : memref<1x1x32xf32, #tpu.memory_space<vmem>>, vector<1x1x32xf32>
    %6 = vector.shape_cast %5 : vector<1x1x32xf32> to vector<1x32xf32>
    %c0_6 = arith.constant 0 : index
    %c0_7 = arith.constant 0 : index
    %c0_8 = arith.constant 0 : index
    %7 = vector.load %arg5[%c0_6, %c0_7, %c0_8] : memref<1x1x32xf32, #tpu.memory_space<vmem>>, vector<1x1x32xf32>
    %8 = vector.shape_cast %7 : vector<1x1x32xf32> to vector<1x32xf32>
    %cst = arith.constant dense<0.000000e+00> : vector<12xf32>
    %9 = vector.multi_reduction <add>, %4, %cst [1] : vector<12x32xf32> to vector<12xf32>
    %10 = vector.shape_cast %9 : vector<12xf32> to vector<12x1xf32>
    %cst_9 = arith.constant 3.200000e+01 : f32
    %11 = vector.broadcast %cst_9 : f32 to vector<12x1xf32>
    %12 = arith.divf %10, %11 : vector<12x1xf32>
    %13 = vector.broadcast %12 : vector<12x1xf32> to vector<12x32xf32>
    %14 = arith.subf %4, %13 : vector<12x32xf32>
    %15 = arith.mulf %14, %14 : vector<12x32xf32>
    %cst_10 = arith.constant dense<0.000000e+00> : vector<12xf32>
    %16 = vector.multi_reduction <add>, %15, %cst_10 [1] : vector<12x32xf32> to vector<12xf32>
    %17 = vector.shape_cast %16 : vector<12xf32> to vector<12x1xf32>
    %cst_11 = arith.constant 3.200000e+01 : f32
    %18 = vector.broadcast %cst_11 : f32 to vector<12x1xf32>
    %19 = arith.divf %17, %18 : vector<12x1xf32>
    %cst_12 = arith.constant 9.99999974E-6 : f32
    %20 = vector.broadcast %cst_12 : f32 to vector<12x1xf32>
    %21 = arith.addf %19, %20 : vector<12x1xf32>
    %22 = math.rsqrt %21 : vector<12x1xf32>
    %23 = vector.broadcast %22 : vector<12x1xf32> to vector<12x32xf32>
    %24 = arith.mulf %14, %23 : vector<12x32xf32>
    %25 = vector.broadcast %6 : vector<1x32xf32> to vector<12x32xf32>
    %26 = arith.mulf %24, %25 : vector<12x32xf32>
    %27 = vector.broadcast %8 : vector<1x32xf32> to vector<12x32xf32>
    %28 = arith.addf %26, %27 : vector<12x32xf32>
    %29 = arith.truncf %28 : vector<12x32xf32> to vector<12x32xbf16>
    %c0_13 = arith.constant 0 : index
    %c0_14 = arith.constant 0 : index
    %c0_15 = arith.constant 0 : index
    %30 = vector.load %arg6[%c0_13, %c0_14, %c0_15] : memref<1x32x96xbf16, #tpu.memory_space<vmem>>, vector<1x32x96xbf16>
    %31 = vector.shape_cast %30 : vector<1x32x96xbf16> to vector<32x96xbf16>
    %cst_16 = arith.constant dense<0.000000e+00> : vector<12x96xf32>
    %32 = tpu.matmul %29, %31, %cst_16 {dimension_numbers = #tpu.dot_dimension_numbers<[1], [0], [0], [1], [0, 0, 1, 1], [], []>} : vector<12x32xbf16>, vector<32x96xbf16>, vector<12x96xf32> -> vector<12x96xf32>
    %c0_17 = arith.constant 0 : index
    %c0_18 = arith.constant 0 : index
    %c0_19 = arith.constant 0 : index
    %33 = vector.load %arg7[%c0_17, %c0_18, %c0_19] : memref<1x1x96xf32, #tpu.memory_space<vmem>>, vector<1x1x96xf32>
    %34 = vector.shape_cast %33 : vector<1x1x96xf32> to vector<1x96xf32>
    %35 = vector.broadcast %34 : vector<1x96xf32> to vector<12x96xf32>
    %36 = arith.addf %32, %35 : vector<12x96xf32>
    %37 = vector.shape_cast %36 : vector<12x96xf32> to vector<2x6x96xf32>
    %c0_20 = arith.constant 0 : index
    %c0_21 = arith.constant 0 : index
    %c0_22 = arith.constant 0 : index
    %38 = vector.load %arg8[%c0_20, %c0_21, %c0_22] : memref<1x32x32xbf16, #tpu.memory_space<vmem>>, vector<1x32x32xbf16>
    %39 = vector.shape_cast %38 : vector<1x32x32xbf16> to vector<32x32xbf16>
    %cst_23 = arith.constant 0.000000e+00 : f32
    %40 = vector.broadcast %cst_23 : f32 to vector<12x32xf32>
    %41 = vector.extract_strided_slice %37 {offsets = [0, 0, 0], sizes = [2, 6, 16], strides = [1, 1, 1]} : vector<2x6x96xf32> to vector<2x6x16xf32>
    %42 = arith.truncf %41 : vector<2x6x16xf32> to vector<2x6x16xbf16>
    %43 = vector.extract_strided_slice %37 {offsets = [0, 0, 32], sizes = [2, 6, 16], strides = [1, 1, 1]} : vector<2x6x96xf32> to vector<2x6x16xf32>
    %44 = arith.truncf %43 : vector<2x6x16xf32> to vector<2x6x16xbf16>
    %45 = vector.extract_strided_slice %37 {offsets = [0, 0, 64], sizes = [2, 6, 16], strides = [1, 1, 1]} : vector<2x6x96xf32> to vector<2x6x16xf32>
    %46 = arith.truncf %45 : vector<2x6x16xf32> to vector<2x6x16xbf16>
    "tpu.trace_start"() <{level = 10 : i32, message = "bqd,bkd->bqk"}> : () -> ()
    %cst_24 = arith.constant dense<0.000000e+00> : vector<2x6x6xf32>
    %47 = tpu.matmul %42, %44, %cst_24 {dimension_numbers = #tpu.dot_dimension_numbers<[2], [2], [1], [1], [0, 0, 0, 1, 1, 1], [0], [0]>} : vector<2x6x16xbf16>, vector<2x6x16xbf16>, vector<2x6x6xf32> -> vector<2x6x6xf32>
    "tpu.trace_stop"() : () -> ()
    %cst_25 = arith.constant 2.500000e-01 : f32
    %48 = vector.broadcast %cst_25 : f32 to vector<2x6x6xf32>
    %49 = arith.mulf %47, %48 : vector<2x6x6xf32>
    %cst_26 = arith.constant dense<0xFF800000> : vector<2x6xf32>
    %50 = vector.multi_reduction <maximumf>, %49, %cst_26 [2] : vector<2x6x6xf32> to vector<2x6xf32>
    %51 = vector.shape_cast %50 : vector<2x6xf32> to vector<2x6x1xf32>
    %52 = vector.broadcast %51 : vector<2x6x1xf32> to vector<2x6x6xf32>
    %53 = arith.subf %49, %52 : vector<2x6x6xf32>
    %54 = math.exp %53 : vector<2x6x6xf32>
    %cst_27 = arith.constant dense<0.000000e+00> : vector<2x6xf32>
    %55 = vector.multi_reduction <add>, %54, %cst_27 [2] : vector<2x6x6xf32> to vector<2x6xf32>
    %56 = vector.shape_cast %55 : vector<2x6xf32> to vector<2x6x1xf32>
    %57 = tpu.reciprocal %56 {approx = true} : vector<2x6x1xf32> -> vector<2x6x1xf32>
    %58 = vector.broadcast %57 : vector<2x6x1xf32> to vector<2x6x6xf32>
    %59 = arith.mulf %54, %58 : vector<2x6x6xf32>
    %60 = arith.truncf %59 : vector<2x6x6xf32> to vector<2x6x6xbf16>
    "tpu.trace_start"() <{level = 10 : i32, message = "bqk,bkd->bqd"}> : () -> ()
    %cst_28 = arith.constant dense<0.000000e+00> : vector<2x6x16xf32>
    %61 = tpu.matmul %60, %46, %cst_28 {dimension_numbers = #tpu.dot_dimension_numbers<[2], [1], [1], [2], [0, 0, 0, 1, 1, 2], [0], [0]>} : vector<2x6x6xbf16>, vector<2x6x16xbf16>, vector<2x6x16xf32> -> vector<2x6x16xf32>
    "tpu.trace_stop"() : () -> ()
    %62 = vector.shape_cast %61 : vector<2x6x16xf32> to vector<12x16xf32>
    %63 = arith.truncf %62 : vector<12x16xf32> to vector<12x16xbf16>
    %64 = vector.extract_strided_slice %39 {offsets = [0, 0], sizes = [16, 32], strides = [1, 1]} : vector<32x32xbf16> to vector<16x32xbf16>
    %cst_29 = arith.constant dense<0.000000e+00> : vector<12x32xf32>
    %65 = tpu.matmul %63, %64, %cst_29 {dimension_numbers = #tpu.dot_dimension_numbers<[1], [0], [0], [1], [0, 0, 1, 1], [], []>} : vector<12x16xbf16>, vector<16x32xbf16>, vector<12x32xf32> -> vector<12x32xf32>
    %66 = arith.addf %40, %65 : vector<12x32xf32>
    %67 = vector.extract_strided_slice %37 {offsets = [0, 0, 16], sizes = [2, 6, 16], strides = [1, 1, 1]} : vector<2x6x96xf32> to vector<2x6x16xf32>
    %68 = arith.truncf %67 : vector<2x6x16xf32> to vector<2x6x16xbf16>
    %69 = vector.extract_strided_slice %37 {offsets = [0, 0, 48], sizes = [2, 6, 16], strides = [1, 1, 1]} : vector<2x6x96xf32> to vector<2x6x16xf32>
    %70 = arith.truncf %69 : vector<2x6x16xf32> to vector<2x6x16xbf16>
    %71 = vector.extract_strided_slice %37 {offsets = [0, 0, 80], sizes = [2, 6, 16], strides = [1, 1, 1]} : vector<2x6x96xf32> to vector<2x6x16xf32>
    %72 = arith.truncf %71 : vector<2x6x16xf32> to vector<2x6x16xbf16>
    "tpu.trace_start"() <{level = 10 : i32, message = "bqd,bkd->bqk"}> : () -> ()
    %cst_30 = arith.constant dense<0.000000e+00> : vector<2x6x6xf32>
    %73 = tpu.matmul %68, %70, %cst_30 {dimension_numbers = #tpu.dot_dimension_numbers<[2], [2], [1], [1], [0, 0, 0, 1, 1, 1], [0], [0]>} : vector<2x6x16xbf16>, vector<2x6x16xbf16>, vector<2x6x6xf32> -> vector<2x6x6xf32>
    "tpu.trace_stop"() : () -> ()
    %cst_31 = arith.constant 2.500000e-01 : f32
    %74 = vector.broadcast %cst_31 : f32 to vector<2x6x6xf32>
    %75 = arith.mulf %73, %74 : vector<2x6x6xf32>
    %cst_32 = arith.constant dense<0xFF800000> : vector<2x6xf32>
    %76 = vector.multi_reduction <maximumf>, %75, %cst_32 [2] : vector<2x6x6xf32> to vector<2x6xf32>
    %77 = vector.shape_cast %76 : vector<2x6xf32> to vector<2x6x1xf32>
    %78 = vector.broadcast %77 : vector<2x6x1xf32> to vector<2x6x6xf32>
    %79 = arith.subf %75, %78 : vector<2x6x6xf32>
    %80 = math.exp %79 : vector<2x6x6xf32>
    %cst_33 = arith.constant dense<0.000000e+00> : vector<2x6xf32>
    %81 = vector.multi_reduction <add>, %80, %cst_33 [2] : vector<2x6x6xf32> to vector<2x6xf32>
    %82 = vector.shape_cast %81 : vector<2x6xf32> to vector<2x6x1xf32>
    %83 = tpu.reciprocal %82 {approx = true} : vector<2x6x1xf32> -> vector<2x6x1xf32>
    %84 = vector.broadcast %83 : vector<2x6x1xf32> to vector<2x6x6xf32>
    %85 = arith.mulf %80, %84 : vector<2x6x6xf32>
    %86 = arith.truncf %85 : vector<2x6x6xf32> to vector<2x6x6xbf16>
    "tpu.trace_start"() <{level = 10 : i32, message = "bqk,bkd->bqd"}> : () -> ()
    %cst_34 = arith.constant dense<0.000000e+00> : vector<2x6x16xf32>
    %87 = tpu.matmul %86, %72, %cst_34 {dimension_numbers = #tpu.dot_dimension_numbers<[2], [1], [1], [2], [0, 0, 0, 1, 1, 2], [0], [0]>} : vector<2x6x6xbf16>, vector<2x6x16xbf16>, vector<2x6x16xf32> -> vector<2x6x16xf32>
    "tpu.trace_stop"() : () -> ()
    %88 = vector.shape_cast %87 : vector<2x6x16xf32> to vector<12x16xf32>
    %89 = arith.truncf %88 : vector<12x16xf32> to vector<12x16xbf16>
    %90 = vector.extract_strided_slice %39 {offsets = [16, 0], sizes = [16, 32], strides = [1, 1]} : vector<32x32xbf16> to vector<16x32xbf16>
    %cst_35 = arith.constant dense<0.000000e+00> : vector<12x32xf32>
    %91 = tpu.matmul %89, %90, %cst_35 {dimension_numbers = #tpu.dot_dimension_numbers<[1], [0], [0], [1], [0, 0, 1, 1], [], []>} : vector<12x16xbf16>, vector<16x32xbf16>, vector<12x32xf32> -> vector<12x32xf32>
    %92 = arith.addf %66, %91 : vector<12x32xf32>
    %93 = arith.addf %4, %92 : vector<12x32xf32>
    %c0_36 = arith.constant 0 : index
    %c0_37 = arith.constant 0 : index
    %c0_38 = arith.constant 0 : index
    %94 = vector.load %arg9[%c0_36, %c0_37, %c0_38] : memref<1x1x32xf32, #tpu.memory_space<vmem>>, vector<1x1x32xf32>
    %95 = vector.shape_cast %94 : vector<1x1x32xf32> to vector<1x32xf32>
    %96 = vector.broadcast %95 : vector<1x32xf32> to vector<12x32xf32>
    %97 = arith.addf %93, %96 : vector<12x32xf32>
    %c0_39 = arith.constant 0 : index
    %c0_40 = arith.constant 0 : index
    %c0_41 = arith.constant 0 : index
    %98 = vector.load %arg10[%c0_39, %c0_40, %c0_41] : memref<1x1x32xf32, #tpu.memory_space<vmem>>, vector<1x1x32xf32>
    %99 = vector.shape_cast %98 : vector<1x1x32xf32> to vector<1x32xf32>
    %c0_42 = arith.constant 0 : index
    %c0_43 = arith.constant 0 : index
    %c0_44 = arith.constant 0 : index
    %100 = vector.load %arg11[%c0_42, %c0_43, %c0_44] : memref<1x1x32xf32, #tpu.memory_space<vmem>>, vector<1x1x32xf32>
    %101 = vector.shape_cast %100 : vector<1x1x32xf32> to vector<1x32xf32>
    %cst_45 = arith.constant dense<0.000000e+00> : vector<12xf32>
    %102 = vector.multi_reduction <add>, %97, %cst_45 [1] : vector<12x32xf32> to vector<12xf32>
    %103 = vector.shape_cast %102 : vector<12xf32> to vector<12x1xf32>
    %cst_46 = arith.constant 3.200000e+01 : f32
    %104 = vector.broadcast %cst_46 : f32 to vector<12x1xf32>
    %105 = arith.divf %103, %104 : vector<12x1xf32>
    %106 = vector.broadcast %105 : vector<12x1xf32> to vector<12x32xf32>
    %107 = arith.subf %97, %106 : vector<12x32xf32>
    %108 = arith.mulf %107, %107 : vector<12x32xf32>
    %cst_47 = arith.constant dense<0.000000e+00> : vector<12xf32>
    %109 = vector.multi_reduction <add>, %108, %cst_47 [1] : vector<12x32xf32> to vector<12xf32>
    %110 = vector.shape_cast %109 : vector<12xf32> to vector<12x1xf32>
    %cst_48 = arith.constant 3.200000e+01 : f32
    %111 = vector.broadcast %cst_48 : f32 to vector<12x1xf32>
    %112 = arith.divf %110, %111 : vector<12x1xf32>
    %cst_49 = arith.constant 9.99999974E-6 : f32
    %113 = vector.broadcast %cst_49 : f32 to vector<12x1xf32>
    %114 = arith.addf %112, %113 : vector<12x1xf32>
    %115 = math.rsqrt %114 : vector<12x1xf32>
    %116 = vector.broadcast %115 : vector<12x1xf32> to vector<12x32xf32>
    %117 = arith.mulf %107, %116 : vector<12x32xf32>
    %118 = vector.broadcast %99 : vector<1x32xf32> to vector<12x32xf32>
    %119 = arith.mulf %117, %118 : vector<12x32xf32>
    %120 = vector.broadcast %101 : vector<1x32xf32> to vector<12x32xf32>
    %121 = arith.addf %119, %120 : vector<12x32xf32>
    %122 = arith.truncf %121 : vector<12x32xf32> to vector<12x32xbf16>
    %c0_50 = arith.constant 0 : index
    %c0_51 = arith.constant 0 : index
    %c0_52 = arith.constant 0 : index
    %123 = vector.load %arg12[%c0_50, %c0_51, %c0_52] : memref<1x32x128xbf16, #tpu.memory_space<vmem>>, vector<1x32x128xbf16>
    %124 = vector.shape_cast %123 : vector<1x32x128xbf16> to vector<32x128xbf16>
    %cst_53 = arith.constant dense<0.000000e+00> : vector<12x128xf32>
    %125 = tpu.matmul %122, %124, %cst_53 {dimension_numbers = #tpu.dot_dimension_numbers<[1], [0], [0], [1], [0, 0, 1, 1], [], []>} : vector<12x32xbf16>, vector<32x128xbf16>, vector<12x128xf32> -> vector<12x128xf32>
    %c0_54 = arith.constant 0 : index
    %c0_55 = arith.constant 0 : index
    %c0_56 = arith.constant 0 : index
    %126 = vector.load %arg13[%c0_54, %c0_55, %c0_56] : memref<1x1x128xf32, #tpu.memory_space<vmem>>, vector<1x1x128xf32>
    %127 = vector.shape_cast %126 : vector<1x1x128xf32> to vector<1x128xf32>
    %128 = vector.broadcast %127 : vector<1x128xf32> to vector<12x128xf32>
    %129 = arith.addf %125, %128 : vector<12x128xf32>
    %130 = arith.mulf %129, %129 : vector<12x128xf32>
    %131 = arith.mulf %129, %130 : vector<12x128xf32>
    %cst_57 = arith.constant 4.471500e-02 : f32
    %132 = vector.broadcast %cst_57 : f32 to vector<12x128xf32>
    %133 = arith.mulf %132, %131 : vector<12x128xf32>
    %134 = arith.addf %129, %133 : vector<12x128xf32>
    %cst_58 = arith.constant 0.797884583 : f32
    %135 = vector.broadcast %cst_58 : f32 to vector<12x128xf32>
    %136 = arith.mulf %135, %134 : vector<12x128xf32>
    %137 = math.tanh %136 : vector<12x128xf32>
    %cst_59 = arith.constant 1.000000e+00 : f32
    %138 = vector.broadcast %cst_59 : f32 to vector<12x128xf32>
    %139 = arith.addf %138, %137 : vector<12x128xf32>
    %cst_60 = arith.constant 5.000000e-01 : f32
    %140 = vector.broadcast %cst_60 : f32 to vector<12x128xf32>
    %141 = arith.mulf %140, %139 : vector<12x128xf32>
    %142 = arith.mulf %129, %141 : vector<12x128xf32>
    %143 = arith.truncf %142 : vector<12x128xf32> to vector<12x128xbf16>
    %c0_61 = arith.constant 0 : index
    %c0_62 = arith.constant 0 : index
    %c0_63 = arith.constant 0 : index
    %144 = vector.load %arg14[%c0_61, %c0_62, %c0_63] : memref<1x128x32xbf16, #tpu.memory_space<vmem>>, vector<1x128x32xbf16>
    %145 = vector.shape_cast %144 : vector<1x128x32xbf16> to vector<128x32xbf16>
    %cst_64 = arith.constant dense<0.000000e+00> : vector<12x32xf32>
    %146 = tpu.matmul %143, %145, %cst_64 {dimension_numbers = #tpu.dot_dimension_numbers<[1], [0], [0], [1], [0, 0, 1, 1], [], []>} : vector<12x128xbf16>, vector<128x32xbf16>, vector<12x32xf32> -> vector<12x32xf32>
    %147 = arith.addf %97, %146 : vector<12x32xf32>
    %c0_65 = arith.constant 0 : index
    %c0_66 = arith.constant 0 : index
    %c0_67 = arith.constant 0 : index
    %148 = vector.load %arg15[%c0_65, %c0_66, %c0_67] : memref<1x1x32xf32, #tpu.memory_space<vmem>>, vector<1x1x32xf32>
    %149 = vector.shape_cast %148 : vector<1x1x32xf32> to vector<1x32xf32>
    %150 = vector.broadcast %149 : vector<1x32xf32> to vector<12x32xf32>
    %151 = arith.addf %147, %150 : vector<12x32xf32>
    %152 = vector.shape_cast %151 : vector<12x32xf32> to vector<2x6x32xf32>
    %c0_68 = arith.constant 0 : index
    %c0_69 = arith.constant 0 : index
    %c0_70 = arith.constant 0 : index
    %153 = vector.load %arg16[%c0_68, %c0_69, %c0_70] : memref<2x6x32xf32, #tpu.memory_space<vmem>>, vector<2x6x32xf32>
    tpu.vector_store %arg16[%c0_68, %c0_69, %c0_70], %152 {strides = array<i32>} : memref<2x6x32xf32, #tpu.memory_space<vmem>>, vector<2x6x32xf32>,
    return
  }
  func.func @transform_0(%arg0: i32, %arg1: i32) -> (i32, i32, i32) {
    %c0_i32 = arith.constant 0 : i32
    %c0_i32_0 = arith.constant 0 : i32
    %c0_i32_1 = arith.constant 0 : i32
    return %arg0, %c0_i32, %c0_i32_0 : i32, i32, i32
  }
  func.func @transform_1(%arg0: i32, %arg1: i32) -> (i32, i32, i32) {
    %c0_i32 = arith.constant 0 : i32
    %c0_i32_0 = arith.constant 0 : i32
    %c0_i32_1 = arith.constant 0 : i32
    %c0_i32_2 = arith.constant 0 : i32
    return %c0_i32, %c0_i32_0, %c0_i32_1 : i32, i32, i32
  }
  func.func @transform_2(%arg0: i32, %arg1: i32) -> (i32, i32, i32) {
    %c0_i32 = arith.constant 0 : i32
    %c0_i32_0 = arith.constant 0 : i32
    %c0_i32_1 = arith.constant 0 : i32
    return %arg1, %c0_i32, %c0_i32_0 : i32, i32, i32
  }
  func.func @transform_3(%arg0: i32, %arg1: i32) -> (i32, i32, i32) {
    %c0_i32 = arith.constant 0 : i32
    %c0_i32_0 = arith.constant 0 : i32
    %c0_i32_1 = arith.constant 0 : i32
    return %arg1, %c0_i32, %c0_i32_0 : i32, i32, i32
  }
  func.func @transform_4(%arg0: i32, %arg1: i32) -> (i32, i32, i32) {
    %c0_i32 = arith.constant 0 : i32
    %c0_i32_0 = arith.constant 0 : i32
    %c0_i32_1 = arith.constant 0 : i32
    return %arg1, %c0_i32, %c0_i32_0 : i32, i32, i32
  }
  func.func @transform_5(%arg0: i32, %arg1: i32) -> (i32, i32, i32) {
    %c0_i32 = arith.constant 0 : i32
    %c0_i32_0 = arith.constant 0 : i32
    %c0_i32_1 = arith.constant 0 : i32
    return %arg1, %c0_i32, %c0_i32_0 : i32, i32, i32
  }
  func.func @transform_6(%arg0: i32, %arg1: i32) -> (i32, i32, i32) {
    %c0_i32 = arith.constant 0 : i32
    %c0_i32_0 = arith.constant 0 : i32
    %c0_i32_1 = arith.constant 0 : i32
    return %arg1, %c0_i32, %c0_i32_0 : i32, i32, i32
  }
  func.func @transform_7(%arg0: i32, %arg1: i32) -> (i32, i32, i32) {
    %c0_i32 = arith.constant 0 : i32
    %c0_i32_0 = arith.constant 0 : i32
    %c0_i32_1 = arith.constant 0 : i32
    return %arg1, %c0_i32, %c0_i32_0 : i32, i32, i32
  }
  func.func @transform_8(%arg0: i32, %arg1: i32) -> (i32, i32, i32) {
    %c0_i32 = arith.constant 0 : i32
    %c0_i32_0 = arith.constant 0 : i32
    %c0_i32_1 = arith.constant 0 : i32
    return %arg1, %c0_i32, %c0_i32_0 : i32, i32, i32
  }
  func.func @transform_9(%arg0: i32, %arg1: i32) -> (i32, i32, i32) {
    %c0_i32 = arith.constant 0 : i32
    %c0_i32_0 = arith.constant 0 : i32
    %c0_i32_1 = arith.constant 0 : i32
    return %arg1, %c0_i32, %c0_i32_0 : i32, i32, i32
  }
  func.func @transform_10(%arg0: i32, %arg1: i32) -> (i32, i32, i32) {
    %c0_i32 = arith.constant 0 : i32
    %c0_i32_0 = arith.constant 0 : i32
    %c0_i32_1 = arith.constant 0 : i32
    return %arg1, %c0_i32, %c0_i32_0 : i32, i32, i32
  }
  func.func @transform_11(%arg0: i32, %arg1: i32) -> (i32, i32, i32) {
    %c0_i32 = arith.constant 0 : i32
    %c0_i32_0 = arith.constant 0 : i32
    %c0_i32_1 = arith.constant 0 : i32
    return %arg1, %c0_i32, %c0_i32_0 : i32, i32, i32
  }
  func.func @transform_12(%arg0: i32, %arg1: i32) -> (i32, i32, i32) {
    %c0_i32 = arith.constant 0 : i32
    %c0_i32_0 = arith.constant 0 : i32
    %c0_i32_1 = arith.constant 0 : i32
    return %arg1, %c0_i32, %c0_i32_0 : i32, i32, i32
  }
  func.func @transform_13(%arg0: i32, %arg1: i32) -> (i32, i32, i32) {
    %c0_i32 = arith.constant 0 : i32
    %c0_i32_0 = arith.constant 0 : i32
    %c0_i32_1 = arith.constant 0 : i32
    return %arg1, %c0_i32, %c0_i32_0 : i32, i32, i32
  }
  func.func @transform_14(%arg0: i32, %arg1: i32) -> (i32, i32, i32) {
    %c0_i32 = arith.constant 0 : i32
    %c0_i32_0 = arith.constant 0 : i32
    %c0_i32_1 = arith.constant 0 : i32
    return %arg0, %c0_i32, %c0_i32_0 : i32, i32, i32
  }
}

module attributes {stable_mosaic.version = 11 : i64} {
  func.func @_ln_linear_kernel(%arg0: i32, %arg1: memref<1x6x32xf32, #tpu.memory_space<vmem>>, %arg2: memref<1x32xf32, #tpu.memory_space<vmem>>, %arg3: memref<1x32xf32, #tpu.memory_space<vmem>>, %arg4: memref<32x16xbf16, #tpu.memory_space<vmem>>, %arg5: memref<1x16xf32, #tpu.memory_space<vmem>>, %arg6: memref<1x6x16xf32, #tpu.memory_space<vmem>>) attributes {dimension_semantics = [#tpu.dimension_semantics<parallel>], iteration_bounds = array<i64: 2>, scalar_prefetch = 0 : i64, scratch_operands = 0 : i64, tpu.core_type = #tpu.core_type<tc>, window_params = [{transform_indices = @transform_0, window_bounds = array<i64: 1, 6, 32>}, {pipeline_mode = #tpu.pipeline_mode<synchronous>, transform_indices = @transform_1, window_bounds = array<i64: 1, 32>}, {pipeline_mode = #tpu.pipeline_mode<synchronous>, transform_indices = @transform_2, window_bounds = array<i64: 1, 32>}, {pipeline_mode = #tpu.pipeline_mode<synchronous>, transform_indices = @transform_3, window_bounds = array<i64: 32, 16>}, {pipeline_mode = #tpu.pipeline_mode<synchronous>, transform_indices = @transform_4, window_bounds = array<i64: 1, 16>}, {transform_indices = @transform_5, window_bounds = array<i64: 1, 6, 16>}]} {
    %c0 = arith.constant 0 : index
    %c0_0 = arith.constant 0 : index
    %c0_1 = arith.constant 0 : index
    %0 = vector.load %arg1[%c0, %c0_0, %c0_1] : memref<1x6x32xf32, #tpu.memory_space<vmem>>, vector<1x6x32xf32>
    %1 = vector.shape_cast %0 : vector<1x6x32xf32> to vector<6x32xf32>
    %c0_2 = arith.constant 0 : index
    %c0_3 = arith.constant 0 : index
    %2 = vector.load %arg2[%c0_2, %c0_3] : memref<1x32xf32, #tpu.memory_space<vmem>>, vector<1x32xf32>
    %c0_4 = arith.constant 0 : index
    %c0_5 = arith.constant 0 : index
    %3 = vector.load %arg3[%c0_4, %c0_5] : memref<1x32xf32, #tpu.memory_space<vmem>>, vector<1x32xf32>
    %cst = arith.constant dense<0.000000e+00> : vector<6xf32>
    %4 = vector.multi_reduction <add>, %1, %cst [1] : vector<6x32xf32> to vector<6xf32>
    %5 = vector.shape_cast %4 : vector<6xf32> to vector<6x1xf32>
    %cst_6 = arith.constant 3.200000e+01 : f32
    %6 = vector.broadcast %cst_6 : f32 to vector<6x1xf32>
    %7 = arith.divf %5, %6 : vector<6x1xf32>
    %8 = vector.broadcast %7 : vector<6x1xf32> to vector<6x32xf32>
    %9 = arith.subf %1, %8 : vector<6x32xf32>
    %10 = arith.mulf %9, %9 : vector<6x32xf32>
    %cst_7 = arith.constant dense<0.000000e+00> : vector<6xf32>
    %11 = vector.multi_reduction <add>, %10, %cst_7 [1] : vector<6x32xf32> to vector<6xf32>
    %12 = vector.shape_cast %11 : vector<6xf32> to vector<6x1xf32>
    %cst_8 = arith.constant 3.200000e+01 : f32
    %13 = vector.broadcast %cst_8 : f32 to vector<6x1xf32>
    %14 = arith.divf %12, %13 : vector<6x1xf32>
    %cst_9 = arith.constant 9.99999974E-6 : f32
    %15 = vector.broadcast %cst_9 : f32 to vector<6x1xf32>
    %16 = arith.addf %14, %15 : vector<6x1xf32>
    %17 = math.rsqrt %16 : vector<6x1xf32>
    %18 = vector.broadcast %17 : vector<6x1xf32> to vector<6x32xf32>
    %19 = arith.mulf %9, %18 : vector<6x32xf32>
    %20 = vector.broadcast %2 : vector<1x32xf32> to vector<6x32xf32>
    %21 = arith.mulf %19, %20 : vector<6x32xf32>
    %22 = vector.broadcast %3 : vector<1x32xf32> to vector<6x32xf32>
    %23 = arith.addf %21, %22 : vector<6x32xf32>
    %24 = arith.truncf %23 : vector<6x32xf32> to vector<6x32xbf16>
    %c0_10 = arith.constant 0 : index
    %c0_11 = arith.constant 0 : index
    %25 = vector.load %arg4[%c0_10, %c0_11] : memref<32x16xbf16, #tpu.memory_space<vmem>>, vector<32x16xbf16>
    %cst_12 = arith.constant dense<0.000000e+00> : vector<6x16xf32>
    %26 = tpu.matmul %24, %25, %cst_12 {dimension_numbers = #tpu.dot_dimension_numbers<[1], [0], [0], [1], [0, 0, 1, 1], [], []>} : vector<6x32xbf16>, vector<32x16xbf16>, vector<6x16xf32> -> vector<6x16xf32>
    %c0_13 = arith.constant 0 : index
    %c0_14 = arith.constant 0 : index
    %27 = vector.load %arg5[%c0_13, %c0_14] : memref<1x16xf32, #tpu.memory_space<vmem>>, vector<1x16xf32>
    %28 = vector.broadcast %27 : vector<1x16xf32> to vector<6x16xf32>
    %29 = arith.addf %26, %28 : vector<6x16xf32>
    %c0_15 = arith.constant 0 : index
    %c0_16 = arith.constant 0 : index
    %c0_17 = arith.constant 0 : index
    %30 = vector.load %arg6[%c0_15, %c0_16, %c0_17] : memref<1x6x16xf32, #tpu.memory_space<vmem>>, vector<1x6x16xf32>
    %31 = vector.shape_cast %30 : vector<1x6x16xf32> to vector<6x16xf32>
    %32 = vector.shape_cast %29 : vector<6x16xf32> to vector<1x6x16xf32>
    tpu.vector_store %arg6[%c0_15, %c0_16, %c0_17], %32 {strides = array<i32>} : memref<1x6x16xf32, #tpu.memory_space<vmem>>, vector<1x6x16xf32>,
    return
  }
  func.func @transform_0(%arg0: i32) -> (i32, i32, i32) {
    %c0_i32 = arith.constant 0 : i32
    %c0_i32_0 = arith.constant 0 : i32
    %c0_i32_1 = arith.constant 0 : i32
    return %arg0, %c0_i32, %c0_i32_0 : i32, i32, i32
  }
  func.func @transform_1(%arg0: i32) -> (i32, i32) {
    %c0_i32 = arith.constant 0 : i32
    %c0_i32_0 = arith.constant 0 : i32
    %c0_i32_1 = arith.constant 0 : i32
    return %c0_i32, %c0_i32_0 : i32, i32
  }
  func.func @transform_2(%arg0: i32) -> (i32, i32) {
    %c0_i32 = arith.constant 0 : i32
    %c0_i32_0 = arith.constant 0 : i32
    %c0_i32_1 = arith.constant 0 : i32
    return %c0_i32, %c0_i32_0 : i32, i32
  }
  func.func @transform_3(%arg0: i32) -> (i32, i32) {
    %c0_i32 = arith.constant 0 : i32
    %c0_i32_0 = arith.constant 0 : i32
    %c0_i32_1 = arith.constant 0 : i32
    return %c0_i32, %c0_i32_0 : i32, i32
  }
  func.func @transform_4(%arg0: i32) -> (i32, i32) {
    %c0_i32 = arith.constant 0 : i32
    %c0_i32_0 = arith.constant 0 : i32
    %c0_i32_1 = arith.constant 0 : i32
    return %c0_i32, %c0_i32_0 : i32, i32
  }
  func.func @transform_5(%arg0: i32) -> (i32, i32, i32) {
    %c0_i32 = arith.constant 0 : i32
    %c0_i32_0 = arith.constant 0 : i32
    %c0_i32_1 = arith.constant 0 : i32
    return %arg0, %c0_i32, %c0_i32_0 : i32, i32, i32
  }
}

module attributes {stable_mosaic.version = 11 : i64} {
  func.func @_decoder_head_kernel(%arg0: i32, %arg1: memref<1x18x16xf32, #tpu.memory_space<vmem>>, %arg2: memref<1x16xf32, #tpu.memory_space<vmem>>, %arg3: memref<1x16xf32, #tpu.memory_space<vmem>>, %arg4: memref<16x48xbf16, #tpu.memory_space<vmem>>, %arg5: memref<1x48xf32, #tpu.memory_space<vmem>>, %arg6: memref<16x32xbf16, #tpu.memory_space<vmem>>, %arg7: memref<1x32xf32, #tpu.memory_space<vmem>>, %arg8: memref<1x18x48xf32, #tpu.memory_space<vmem>>, %arg9: memref<1x18x32xf32, #tpu.memory_space<vmem>>) attributes {dimension_semantics = [#tpu.dimension_semantics<parallel>], iteration_bounds = array<i64: 2>, scalar_prefetch = 0 : i64, scratch_operands = 0 : i64, tpu.core_type = #tpu.core_type<tc>, window_params = [{transform_indices = @transform_0, window_bounds = array<i64: 1, 18, 16>}, {pipeline_mode = #tpu.pipeline_mode<synchronous>, transform_indices = @transform_1, window_bounds = array<i64: 1, 16>}, {pipeline_mode = #tpu.pipeline_mode<synchronous>, transform_indices = @transform_2, window_bounds = array<i64: 1, 16>}, {pipeline_mode = #tpu.pipeline_mode<synchronous>, transform_indices = @transform_3, window_bounds = array<i64: 16, 48>}, {pipeline_mode = #tpu.pipeline_mode<synchronous>, transform_indices = @transform_4, window_bounds = array<i64: 1, 48>}, {pipeline_mode = #tpu.pipeline_mode<synchronous>, transform_indices = @transform_5, window_bounds = array<i64: 16, 32>}, {pipeline_mode = #tpu.pipeline_mode<synchronous>, transform_indices = @transform_6, window_bounds = array<i64: 1, 32>}, {transform_indices = @transform_7, window_bounds = array<i64: 1, 18, 48>}, {transform_indices = @transform_8, window_bounds = array<i64: 1, 18, 32>}]} {
    %c0 = arith.constant 0 : index
    %c0_0 = arith.constant 0 : index
    %c0_1 = arith.constant 0 : index
    %0 = vector.load %arg1[%c0, %c0_0, %c0_1] : memref<1x18x16xf32, #tpu.memory_space<vmem>>, vector<1x18x16xf32>
    %1 = vector.shape_cast %0 : vector<1x18x16xf32> to vector<18x16xf32>
    %c0_2 = arith.constant 0 : index
    %c0_3 = arith.constant 0 : index
    %2 = vector.load %arg2[%c0_2, %c0_3] : memref<1x16xf32, #tpu.memory_space<vmem>>, vector<1x16xf32>
    %c0_4 = arith.constant 0 : index
    %c0_5 = arith.constant 0 : index
    %3 = vector.load %arg3[%c0_4, %c0_5] : memref<1x16xf32, #tpu.memory_space<vmem>>, vector<1x16xf32>
    %cst = arith.constant dense<0.000000e+00> : vector<18xf32>
    %4 = vector.multi_reduction <add>, %1, %cst [1] : vector<18x16xf32> to vector<18xf32>
    %5 = vector.shape_cast %4 : vector<18xf32> to vector<18x1xf32>
    %cst_6 = arith.constant 1.600000e+01 : f32
    %6 = vector.broadcast %cst_6 : f32 to vector<18x1xf32>
    %7 = arith.divf %5, %6 : vector<18x1xf32>
    %8 = vector.broadcast %7 : vector<18x1xf32> to vector<18x16xf32>
    %9 = arith.subf %1, %8 : vector<18x16xf32>
    %10 = arith.mulf %9, %9 : vector<18x16xf32>
    %cst_7 = arith.constant dense<0.000000e+00> : vector<18xf32>
    %11 = vector.multi_reduction <add>, %10, %cst_7 [1] : vector<18x16xf32> to vector<18xf32>
    %12 = vector.shape_cast %11 : vector<18xf32> to vector<18x1xf32>
    %cst_8 = arith.constant 1.600000e+01 : f32
    %13 = vector.broadcast %cst_8 : f32 to vector<18x1xf32>
    %14 = arith.divf %12, %13 : vector<18x1xf32>
    %cst_9 = arith.constant 9.99999974E-6 : f32
    %15 = vector.broadcast %cst_9 : f32 to vector<18x1xf32>
    %16 = arith.addf %14, %15 : vector<18x1xf32>
    %17 = math.rsqrt %16 : vector<18x1xf32>
    %18 = vector.broadcast %17 : vector<18x1xf32> to vector<18x16xf32>
    %19 = arith.mulf %9, %18 : vector<18x16xf32>
    %20 = vector.broadcast %2 : vector<1x16xf32> to vector<18x16xf32>
    %21 = arith.mulf %19, %20 : vector<18x16xf32>
    %22 = vector.broadcast %3 : vector<1x16xf32> to vector<18x16xf32>
    %23 = arith.addf %21, %22 : vector<18x16xf32>
    %24 = arith.truncf %23 : vector<18x16xf32> to vector<18x16xbf16>
    %c0_10 = arith.constant 0 : index
    %c0_11 = arith.constant 0 : index
    %25 = vector.load %arg4[%c0_10, %c0_11] : memref<16x48xbf16, #tpu.memory_space<vmem>>, vector<16x48xbf16>
    %cst_12 = arith.constant dense<0.000000e+00> : vector<18x48xf32>
    %26 = tpu.matmul %24, %25, %cst_12 {dimension_numbers = #tpu.dot_dimension_numbers<[1], [0], [0], [1], [0, 0, 1, 1], [], []>} : vector<18x16xbf16>, vector<16x48xbf16>, vector<18x48xf32> -> vector<18x48xf32>
    %c0_13 = arith.constant 0 : index
    %c0_14 = arith.constant 0 : index
    %27 = vector.load %arg5[%c0_13, %c0_14] : memref<1x48xf32, #tpu.memory_space<vmem>>, vector<1x48xf32>
    %28 = vector.broadcast %27 : vector<1x48xf32> to vector<18x48xf32>
    %29 = arith.addf %26, %28 : vector<18x48xf32>
    %c0_15 = arith.constant 0 : index
    %c0_16 = arith.constant 0 : index
    %c0_17 = arith.constant 0 : index
    %30 = vector.load %arg8[%c0_15, %c0_16, %c0_17] : memref<1x18x48xf32, #tpu.memory_space<vmem>>, vector<1x18x48xf32>
    %31 = vector.shape_cast %30 : vector<1x18x48xf32> to vector<18x48xf32>
    %32 = vector.shape_cast %29 : vector<18x48xf32> to vector<1x18x48xf32>
    tpu.vector_store %arg8[%c0_15, %c0_16, %c0_17], %32 {strides = array<i32>} : memref<1x18x48xf32, #tpu.memory_space<vmem>>, vector<1x18x48xf32>,
    %c0_18 = arith.constant 0 : index
    %c0_19 = arith.constant 0 : index
    %33 = vector.load %arg6[%c0_18, %c0_19] : memref<16x32xbf16, #tpu.memory_space<vmem>>, vector<16x32xbf16>
    %cst_20 = arith.constant dense<0.000000e+00> : vector<18x32xf32>
    %34 = tpu.matmul %24, %33, %cst_20 {dimension_numbers = #tpu.dot_dimension_numbers<[1], [0], [0], [1], [0, 0, 1, 1], [], []>} : vector<18x16xbf16>, vector<16x32xbf16>, vector<18x32xf32> -> vector<18x32xf32>
    %c0_21 = arith.constant 0 : index
    %c0_22 = arith.constant 0 : index
    %35 = vector.load %arg7[%c0_21, %c0_22] : memref<1x32xf32, #tpu.memory_space<vmem>>, vector<1x32xf32>
    %36 = vector.broadcast %35 : vector<1x32xf32> to vector<18x32xf32>
    %37 = arith.addf %34, %36 : vector<18x32xf32>
    %c0_23 = arith.constant 0 : index
    %c0_24 = arith.constant 0 : index
    %c0_25 = arith.constant 0 : index
    %38 = vector.load %arg9[%c0_23, %c0_24, %c0_25] : memref<1x18x32xf32, #tpu.memory_space<vmem>>, vector<1x18x32xf32>
    %39 = vector.shape_cast %38 : vector<1x18x32xf32> to vector<18x32xf32>
    %40 = vector.shape_cast %37 : vector<18x32xf32> to vector<1x18x32xf32>
    tpu.vector_store %arg9[%c0_23, %c0_24, %c0_25], %40 {strides = array<i32>} : memref<1x18x32xf32, #tpu.memory_space<vmem>>, vector<1x18x32xf32>,
    return
  }
  func.func @transform_0(%arg0: i32) -> (i32, i32, i32) {
    %c0_i32 = arith.constant 0 : i32
    %c0_i32_0 = arith.constant 0 : i32
    %c0_i32_1 = arith.constant 0 : i32
    return %arg0, %c0_i32, %c0_i32_0 : i32, i32, i32
  }
  func.func @transform_1(%arg0: i32) -> (i32, i32) {
    %c0_i32 = arith.constant 0 : i32
    %c0_i32_0 = arith.constant 0 : i32
    %c0_i32_1 = arith.constant 0 : i32
    return %c0_i32, %c0_i32_0 : i32, i32
  }
  func.func @transform_2(%arg0: i32) -> (i32, i32) {
    %c0_i32 = arith.constant 0 : i32
    %c0_i32_0 = arith.constant 0 : i32
    %c0_i32_1 = arith.constant 0 : i32
    return %c0_i32, %c0_i32_0 : i32, i32
  }
  func.func @transform_3(%arg0: i32) -> (i32, i32) {
    %c0_i32 = arith.constant 0 : i32
    %c0_i32_0 = arith.constant 0 : i32
    %c0_i32_1 = arith.constant 0 : i32
    return %c0_i32, %c0_i32_0 : i32, i32
  }
  func.func @transform_4(%arg0: i32) -> (i32, i32) {
    %c0_i32 = arith.constant 0 : i32
    %c0_i32_0 = arith.constant 0 : i32
    %c0_i32_1 = arith.constant 0 : i32
    return %c0_i32, %c0_i32_0 : i32, i32
  }
  func.func @transform_5(%arg0: i32) -> (i32, i32) {
    %c0_i32 = arith.constant 0 : i32
    %c0_i32_0 = arith.constant 0 : i32
    %c0_i32_1 = arith.constant 0 : i32
    return %c0_i32, %c0_i32_0 : i32, i32
  }
  func.func @transform_6(%arg0: i32) -> (i32, i32) {
    %c0_i32 = arith.constant 0 : i32
    %c0_i32_0 = arith.constant 0 : i32
    %c0_i32_1 = arith.constant 0 : i32
    return %c0_i32, %c0_i32_0 : i32, i32
  }
  func.func @transform_7(%arg0: i32) -> (i32, i32, i32) {
    %c0_i32 = arith.constant 0 : i32
    %c0_i32_0 = arith.constant 0 : i32
    %c0_i32_1 = arith.constant 0 : i32
    return %arg0, %c0_i32, %c0_i32_0 : i32, i32, i32
  }
  func.func @transform_8(%arg0: i32) -> (i32, i32, i32) {
    %c0_i32 = arith.constant 0 : i32
    %c0_i32_0 = arith.constant 0 : i32
    %c0_i32_1 = arith.constant 0 : i32
    return %arg0, %c0_i32, %c0_i32_0 : i32, i32, i32
  }
}

module attributes {stable_mosaic.version = 11 : i64} {
  func.func @_blocks_kernel(%arg0: i32, %arg1: i32, %arg2: memref<2x18x16xf32, #tpu.memory_space<vmem>>, %arg3: memref<1x18x16xf32, #tpu.memory_space<vmem>>, %arg4: memref<1x1x16xf32, #tpu.memory_space<vmem>>, %arg5: memref<1x1x16xf32, #tpu.memory_space<vmem>>, %arg6: memref<1x16x48xbf16, #tpu.memory_space<vmem>>, %arg7: memref<1x1x48xf32, #tpu.memory_space<vmem>>, %arg8: memref<1x16x16xbf16, #tpu.memory_space<vmem>>, %arg9: memref<1x1x16xf32, #tpu.memory_space<vmem>>, %arg10: memref<1x1x16xf32, #tpu.memory_space<vmem>>, %arg11: memref<1x1x16xf32, #tpu.memory_space<vmem>>, %arg12: memref<1x16x64xbf16, #tpu.memory_space<vmem>>, %arg13: memref<1x1x64xf32, #tpu.memory_space<vmem>>, %arg14: memref<1x64x16xbf16, #tpu.memory_space<vmem>>, %arg15: memref<1x1x16xf32, #tpu.memory_space<vmem>>, %arg16: memref<2x18x16xf32, #tpu.memory_space<vmem>>) attributes {dimension_semantics = [#tpu.dimension_semantics<parallel>, #tpu.dimension_semantics<arbitrary>], iteration_bounds = array<i64: 1, 1>, scalar_prefetch = 0 : i64, scratch_operands = 0 : i64, tpu.core_type = #tpu.core_type<tc>, window_params = [{transform_indices = @transform_0, window_bounds = array<i64: 2, 18, 16>}, {pipeline_mode = #tpu.pipeline_mode<synchronous>, transform_indices = @transform_1, window_bounds = array<i64: 1, 18, 16>}, {transform_indices = @transform_2, window_bounds = array<i64: 1, 1, 16>}, {transform_indices = @transform_3, window_bounds = array<i64: 1, 1, 16>}, {transform_indices = @transform_4, window_bounds = array<i64: 1, 16, 48>}, {transform_indices = @transform_5, window_bounds = array<i64: 1, 1, 48>}, {transform_indices = @transform_6, window_bounds = array<i64: 1, 16, 16>}, {transform_indices = @transform_7, window_bounds = array<i64: 1, 1, 16>}, {transform_indices = @transform_8, window_bounds = array<i64: 1, 1, 16>}, {transform_indices = @transform_9, window_bounds = array<i64: 1, 1, 16>}, {transform_indices = @transform_10, window_bounds = array<i64: 1, 16, 64>}, {transform_indices = @transform_11, window_bounds = array<i64: 1, 1, 64>}, {transform_indices = @transform_12, window_bounds = array<i64: 1, 64, 16>}, {transform_indices = @transform_13, window_bounds = array<i64: 1, 1, 16>}, {transform_indices = @transform_14, window_bounds = array<i64: 2, 18, 16>}]} {
    %c0_i32 = arith.constant 0 : i32
    %0 = arith.cmpi eq, %arg1, %c0_i32 : i32
    %1 = arith.extui %0 : i1 to i32
    %c0_i32_0 = arith.constant 0 : i32
    %2 = arith.cmpi ne, %1, %c0_i32_0 : i32
    scf.if %2 {
      %c0_71 = arith.constant 0 : index
      %c0_72 = arith.constant 0 : index
      %c0_73 = arith.constant 0 : index
      %154 = vector.load %arg2[%c0_71, %c0_72, %c0_73] : memref<2x18x16xf32, #tpu.memory_space<vmem>>, vector<2x18x16xf32>
      %c0_74 = arith.constant 0 : index
      %c0_75 = arith.constant 0 : index
      %c0_76 = arith.constant 0 : index
      %155 = vector.load %arg3[%c0_74, %c0_75, %c0_76] : memref<1x18x16xf32, #tpu.memory_space<vmem>>, vector<1x18x16xf32>
      %156 = vector.broadcast %155 : vector<1x18x16xf32> to vector<2x18x16xf32>
      %157 = arith.addf %154, %156 : vector<2x18x16xf32>
      %c0_77 = arith.constant 0 : index
      %c0_78 = arith.constant 0 : index
      %c0_79 = arith.constant 0 : index
      %158 = vector.load %arg16[%c0_77, %c0_78, %c0_79] : memref<2x18x16xf32, #tpu.memory_space<vmem>>, vector<2x18x16xf32>
      tpu.vector_store %arg16[%c0_77, %c0_78, %c0_79], %157 {strides = array<i32>} : memref<2x18x16xf32, #tpu.memory_space<vmem>>, vector<2x18x16xf32>,
    } else {
    }
    %c0 = arith.constant 0 : index
    %c0_1 = arith.constant 0 : index
    %c0_2 = arith.constant 0 : index
    %3 = vector.load %arg16[%c0, %c0_1, %c0_2] : memref<2x18x16xf32, #tpu.memory_space<vmem>>, vector<2x18x16xf32>
    %4 = vector.shape_cast %3 : vector<2x18x16xf32> to vector<36x16xf32>
    %c0_3 = arith.constant 0 : index
    %c0_4 = arith.constant 0 : index
    %c0_5 = arith.constant 0 : index
    %5 = vector.load %arg4[%c0_3, %c0_4, %c0_5] : memref<1x1x16xf32, #tpu.memory_space<vmem>>, vector<1x1x16xf32>
    %6 = vector.shape_cast %5 : vector<1x1x16xf32> to vector<1x16xf32>
    %c0_6 = arith.constant 0 : index
    %c0_7 = arith.constant 0 : index
    %c0_8 = arith.constant 0 : index
    %7 = vector.load %arg5[%c0_6, %c0_7, %c0_8] : memref<1x1x16xf32, #tpu.memory_space<vmem>>, vector<1x1x16xf32>
    %8 = vector.shape_cast %7 : vector<1x1x16xf32> to vector<1x16xf32>
    %cst = arith.constant dense<0.000000e+00> : vector<36xf32>
    %9 = vector.multi_reduction <add>, %4, %cst [1] : vector<36x16xf32> to vector<36xf32>
    %10 = vector.shape_cast %9 : vector<36xf32> to vector<36x1xf32>
    %cst_9 = arith.constant 1.600000e+01 : f32
    %11 = vector.broadcast %cst_9 : f32 to vector<36x1xf32>
    %12 = arith.divf %10, %11 : vector<36x1xf32>
    %13 = vector.broadcast %12 : vector<36x1xf32> to vector<36x16xf32>
    %14 = arith.subf %4, %13 : vector<36x16xf32>
    %15 = arith.mulf %14, %14 : vector<36x16xf32>
    %cst_10 = arith.constant dense<0.000000e+00> : vector<36xf32>
    %16 = vector.multi_reduction <add>, %15, %cst_10 [1] : vector<36x16xf32> to vector<36xf32>
    %17 = vector.shape_cast %16 : vector<36xf32> to vector<36x1xf32>
    %cst_11 = arith.constant 1.600000e+01 : f32
    %18 = vector.broadcast %cst_11 : f32 to vector<36x1xf32>
    %19 = arith.divf %17, %18 : vector<36x1xf32>
    %cst_12 = arith.constant 9.99999974E-6 : f32
    %20 = vector.broadcast %cst_12 : f32 to vector<36x1xf32>
    %21 = arith.addf %19, %20 : vector<36x1xf32>
    %22 = math.rsqrt %21 : vector<36x1xf32>
    %23 = vector.broadcast %22 : vector<36x1xf32> to vector<36x16xf32>
    %24 = arith.mulf %14, %23 : vector<36x16xf32>
    %25 = vector.broadcast %6 : vector<1x16xf32> to vector<36x16xf32>
    %26 = arith.mulf %24, %25 : vector<36x16xf32>
    %27 = vector.broadcast %8 : vector<1x16xf32> to vector<36x16xf32>
    %28 = arith.addf %26, %27 : vector<36x16xf32>
    %29 = arith.truncf %28 : vector<36x16xf32> to vector<36x16xbf16>
    %c0_13 = arith.constant 0 : index
    %c0_14 = arith.constant 0 : index
    %c0_15 = arith.constant 0 : index
    %30 = vector.load %arg6[%c0_13, %c0_14, %c0_15] : memref<1x16x48xbf16, #tpu.memory_space<vmem>>, vector<1x16x48xbf16>
    %31 = vector.shape_cast %30 : vector<1x16x48xbf16> to vector<16x48xbf16>
    %cst_16 = arith.constant dense<0.000000e+00> : vector<36x48xf32>
    %32 = tpu.matmul %29, %31, %cst_16 {dimension_numbers = #tpu.dot_dimension_numbers<[1], [0], [0], [1], [0, 0, 1, 1], [], []>} : vector<36x16xbf16>, vector<16x48xbf16>, vector<36x48xf32> -> vector<36x48xf32>
    %c0_17 = arith.constant 0 : index
    %c0_18 = arith.constant 0 : index
    %c0_19 = arith.constant 0 : index
    %33 = vector.load %arg7[%c0_17, %c0_18, %c0_19] : memref<1x1x48xf32, #tpu.memory_space<vmem>>, vector<1x1x48xf32>
    %34 = vector.shape_cast %33 : vector<1x1x48xf32> to vector<1x48xf32>
    %35 = vector.broadcast %34 : vector<1x48xf32> to vector<36x48xf32>
    %36 = arith.addf %32, %35 : vector<36x48xf32>
    %37 = vector.shape_cast %36 : vector<36x48xf32> to vector<2x18x48xf32>
    %c0_20 = arith.constant 0 : index
    %c0_21 = arith.constant 0 : index
    %c0_22 = arith.constant 0 : index
    %38 = vector.load %arg8[%c0_20, %c0_21, %c0_22] : memref<1x16x16xbf16, #tpu.memory_space<vmem>>, vector<1x16x16xbf16>
    %39 = vector.shape_cast %38 : vector<1x16x16xbf16> to vector<16x16xbf16>
    %cst_23 = arith.constant 0.000000e+00 : f32
    %40 = vector.broadcast %cst_23 : f32 to vector<36x16xf32>
    %41 = vector.extract_strided_slice %37 {offsets = [0, 0, 0], sizes = [2, 18, 8], strides = [1, 1, 1]} : vector<2x18x48xf32> to vector<2x18x8xf32>
    %42 = arith.truncf %41 : vector<2x18x8xf32> to vector<2x18x8xbf16>
    %43 = vector.extract_strided_slice %37 {offsets = [0, 0, 16], sizes = [2, 18, 8], strides = [1, 1, 1]} : vector<2x18x48xf32> to vector<2x18x8xf32>
    %44 = arith.truncf %43 : vector<2x18x8xf32> to vector<2x18x8xbf16>
    %45 = vector.extract_strided_slice %37 {offsets = [0, 0, 32], sizes = [2, 18, 8], strides = [1, 1, 1]} : vector<2x18x48xf32> to vector<2x18x8xf32>
    %46 = arith.truncf %45 : vector<2x18x8xf32> to vector<2x18x8xbf16>
    "tpu.trace_start"() <{level = 10 : i32, message = "bqd,bkd->bqk"}> : () -> ()
    %cst_24 = arith.constant dense<0.000000e+00> : vector<2x18x18xf32>
    %47 = tpu.matmul %42, %44, %cst_24 {dimension_numbers = #tpu.dot_dimension_numbers<[2], [2], [1], [1], [0, 0, 0, 1, 1, 1], [0], [0]>} : vector<2x18x8xbf16>, vector<2x18x8xbf16>, vector<2x18x18xf32> -> vector<2x18x18xf32>
    "tpu.trace_stop"() : () -> ()
    %cst_25 = arith.constant 0.353553385 : f32
    %48 = vector.broadcast %cst_25 : f32 to vector<2x18x18xf32>
    %49 = arith.mulf %47, %48 : vector<2x18x18xf32>
    %cst_26 = arith.constant dense<0xFF800000> : vector<2x18xf32>
    %50 = vector.multi_reduction <maximumf>, %49, %cst_26 [2] : vector<2x18x18xf32> to vector<2x18xf32>
    %51 = vector.shape_cast %50 : vector<2x18xf32> to vector<2x18x1xf32>
    %52 = vector.broadcast %51 : vector<2x18x1xf32> to vector<2x18x18xf32>
    %53 = arith.subf %49, %52 : vector<2x18x18xf32>
    %54 = math.exp %53 : vector<2x18x18xf32>
    %cst_27 = arith.constant dense<0.000000e+00> : vector<2x18xf32>
    %55 = vector.multi_reduction <add>, %54, %cst_27 [2] : vector<2x18x18xf32> to vector<2x18xf32>
    %56 = vector.shape_cast %55 : vector<2x18xf32> to vector<2x18x1xf32>
    %57 = tpu.reciprocal %56 {approx = true} : vector<2x18x1xf32> -> vector<2x18x1xf32>
    %58 = vector.broadcast %57 : vector<2x18x1xf32> to vector<2x18x18xf32>
    %59 = arith.mulf %54, %58 : vector<2x18x18xf32>
    %60 = arith.truncf %59 : vector<2x18x18xf32> to vector<2x18x18xbf16>
    "tpu.trace_start"() <{level = 10 : i32, message = "bqk,bkd->bqd"}> : () -> ()
    %cst_28 = arith.constant dense<0.000000e+00> : vector<2x18x8xf32>
    %61 = tpu.matmul %60, %46, %cst_28 {dimension_numbers = #tpu.dot_dimension_numbers<[2], [1], [1], [2], [0, 0, 0, 1, 1, 2], [0], [0]>} : vector<2x18x18xbf16>, vector<2x18x8xbf16>, vector<2x18x8xf32> -> vector<2x18x8xf32>
    "tpu.trace_stop"() : () -> ()
    %62 = vector.shape_cast %61 : vector<2x18x8xf32> to vector<36x8xf32>
    %63 = arith.truncf %62 : vector<36x8xf32> to vector<36x8xbf16>
    %64 = vector.extract_strided_slice %39 {offsets = [0, 0], sizes = [8, 16], strides = [1, 1]} : vector<16x16xbf16> to vector<8x16xbf16>
    %cst_29 = arith.constant dense<0.000000e+00> : vector<36x16xf32>
    %65 = tpu.matmul %63, %64, %cst_29 {dimension_numbers = #tpu.dot_dimension_numbers<[1], [0], [0], [1], [0, 0, 1, 1], [], []>} : vector<36x8xbf16>, vector<8x16xbf16>, vector<36x16xf32> -> vector<36x16xf32>
    %66 = arith.addf %40, %65 : vector<36x16xf32>
    %67 = vector.extract_strided_slice %37 {offsets = [0, 0, 8], sizes = [2, 18, 8], strides = [1, 1, 1]} : vector<2x18x48xf32> to vector<2x18x8xf32>
    %68 = arith.truncf %67 : vector<2x18x8xf32> to vector<2x18x8xbf16>
    %69 = vector.extract_strided_slice %37 {offsets = [0, 0, 24], sizes = [2, 18, 8], strides = [1, 1, 1]} : vector<2x18x48xf32> to vector<2x18x8xf32>
    %70 = arith.truncf %69 : vector<2x18x8xf32> to vector<2x18x8xbf16>
    %71 = vector.extract_strided_slice %37 {offsets = [0, 0, 40], sizes = [2, 18, 8], strides = [1, 1, 1]} : vector<2x18x48xf32> to vector<2x18x8xf32>
    %72 = arith.truncf %71 : vector<2x18x8xf32> to vector<2x18x8xbf16>
    "tpu.trace_start"() <{level = 10 : i32, message = "bqd,bkd->bqk"}> : () -> ()
    %cst_30 = arith.constant dense<0.000000e+00> : vector<2x18x18xf32>
    %73 = tpu.matmul %68, %70, %cst_30 {dimension_numbers = #tpu.dot_dimension_numbers<[2], [2], [1], [1], [0, 0, 0, 1, 1, 1], [0], [0]>} : vector<2x18x8xbf16>, vector<2x18x8xbf16>, vector<2x18x18xf32> -> vector<2x18x18xf32>
    "tpu.trace_stop"() : () -> ()
    %cst_31 = arith.constant 0.353553385 : f32
    %74 = vector.broadcast %cst_31 : f32 to vector<2x18x18xf32>
    %75 = arith.mulf %73, %74 : vector<2x18x18xf32>
    %cst_32 = arith.constant dense<0xFF800000> : vector<2x18xf32>
    %76 = vector.multi_reduction <maximumf>, %75, %cst_32 [2] : vector<2x18x18xf32> to vector<2x18xf32>
    %77 = vector.shape_cast %76 : vector<2x18xf32> to vector<2x18x1xf32>
    %78 = vector.broadcast %77 : vector<2x18x1xf32> to vector<2x18x18xf32>
    %79 = arith.subf %75, %78 : vector<2x18x18xf32>
    %80 = math.exp %79 : vector<2x18x18xf32>
    %cst_33 = arith.constant dense<0.000000e+00> : vector<2x18xf32>
    %81 = vector.multi_reduction <add>, %80, %cst_33 [2] : vector<2x18x18xf32> to vector<2x18xf32>
    %82 = vector.shape_cast %81 : vector<2x18xf32> to vector<2x18x1xf32>
    %83 = tpu.reciprocal %82 {approx = true} : vector<2x18x1xf32> -> vector<2x18x1xf32>
    %84 = vector.broadcast %83 : vector<2x18x1xf32> to vector<2x18x18xf32>
    %85 = arith.mulf %80, %84 : vector<2x18x18xf32>
    %86 = arith.truncf %85 : vector<2x18x18xf32> to vector<2x18x18xbf16>
    "tpu.trace_start"() <{level = 10 : i32, message = "bqk,bkd->bqd"}> : () -> ()
    %cst_34 = arith.constant dense<0.000000e+00> : vector<2x18x8xf32>
    %87 = tpu.matmul %86, %72, %cst_34 {dimension_numbers = #tpu.dot_dimension_numbers<[2], [1], [1], [2], [0, 0, 0, 1, 1, 2], [0], [0]>} : vector<2x18x18xbf16>, vector<2x18x8xbf16>, vector<2x18x8xf32> -> vector<2x18x8xf32>
    "tpu.trace_stop"() : () -> ()
    %88 = vector.shape_cast %87 : vector<2x18x8xf32> to vector<36x8xf32>
    %89 = arith.truncf %88 : vector<36x8xf32> to vector<36x8xbf16>
    %90 = vector.extract_strided_slice %39 {offsets = [8, 0], sizes = [8, 16], strides = [1, 1]} : vector<16x16xbf16> to vector<8x16xbf16>
    %cst_35 = arith.constant dense<0.000000e+00> : vector<36x16xf32>
    %91 = tpu.matmul %89, %90, %cst_35 {dimension_numbers = #tpu.dot_dimension_numbers<[1], [0], [0], [1], [0, 0, 1, 1], [], []>} : vector<36x8xbf16>, vector<8x16xbf16>, vector<36x16xf32> -> vector<36x16xf32>
    %92 = arith.addf %66, %91 : vector<36x16xf32>
    %93 = arith.addf %4, %92 : vector<36x16xf32>
    %c0_36 = arith.constant 0 : index
    %c0_37 = arith.constant 0 : index
    %c0_38 = arith.constant 0 : index
    %94 = vector.load %arg9[%c0_36, %c0_37, %c0_38] : memref<1x1x16xf32, #tpu.memory_space<vmem>>, vector<1x1x16xf32>
    %95 = vector.shape_cast %94 : vector<1x1x16xf32> to vector<1x16xf32>
    %96 = vector.broadcast %95 : vector<1x16xf32> to vector<36x16xf32>
    %97 = arith.addf %93, %96 : vector<36x16xf32>
    %c0_39 = arith.constant 0 : index
    %c0_40 = arith.constant 0 : index
    %c0_41 = arith.constant 0 : index
    %98 = vector.load %arg10[%c0_39, %c0_40, %c0_41] : memref<1x1x16xf32, #tpu.memory_space<vmem>>, vector<1x1x16xf32>
    %99 = vector.shape_cast %98 : vector<1x1x16xf32> to vector<1x16xf32>
    %c0_42 = arith.constant 0 : index
    %c0_43 = arith.constant 0 : index
    %c0_44 = arith.constant 0 : index
    %100 = vector.load %arg11[%c0_42, %c0_43, %c0_44] : memref<1x1x16xf32, #tpu.memory_space<vmem>>, vector<1x1x16xf32>
    %101 = vector.shape_cast %100 : vector<1x1x16xf32> to vector<1x16xf32>
    %cst_45 = arith.constant dense<0.000000e+00> : vector<36xf32>
    %102 = vector.multi_reduction <add>, %97, %cst_45 [1] : vector<36x16xf32> to vector<36xf32>
    %103 = vector.shape_cast %102 : vector<36xf32> to vector<36x1xf32>
    %cst_46 = arith.constant 1.600000e+01 : f32
    %104 = vector.broadcast %cst_46 : f32 to vector<36x1xf32>
    %105 = arith.divf %103, %104 : vector<36x1xf32>
    %106 = vector.broadcast %105 : vector<36x1xf32> to vector<36x16xf32>
    %107 = arith.subf %97, %106 : vector<36x16xf32>
    %108 = arith.mulf %107, %107 : vector<36x16xf32>
    %cst_47 = arith.constant dense<0.000000e+00> : vector<36xf32>
    %109 = vector.multi_reduction <add>, %108, %cst_47 [1] : vector<36x16xf32> to vector<36xf32>
    %110 = vector.shape_cast %109 : vector<36xf32> to vector<36x1xf32>
    %cst_48 = arith.constant 1.600000e+01 : f32
    %111 = vector.broadcast %cst_48 : f32 to vector<36x1xf32>
    %112 = arith.divf %110, %111 : vector<36x1xf32>
    %cst_49 = arith.constant 9.99999974E-6 : f32
    %113 = vector.broadcast %cst_49 : f32 to vector<36x1xf32>
    %114 = arith.addf %112, %113 : vector<36x1xf32>
    %115 = math.rsqrt %114 : vector<36x1xf32>
    %116 = vector.broadcast %115 : vector<36x1xf32> to vector<36x16xf32>
    %117 = arith.mulf %107, %116 : vector<36x16xf32>
    %118 = vector.broadcast %99 : vector<1x16xf32> to vector<36x16xf32>
    %119 = arith.mulf %117, %118 : vector<36x16xf32>
    %120 = vector.broadcast %101 : vector<1x16xf32> to vector<36x16xf32>
    %121 = arith.addf %119, %120 : vector<36x16xf32>
    %122 = arith.truncf %121 : vector<36x16xf32> to vector<36x16xbf16>
    %c0_50 = arith.constant 0 : index
    %c0_51 = arith.constant 0 : index
    %c0_52 = arith.constant 0 : index
    %123 = vector.load %arg12[%c0_50, %c0_51, %c0_52] : memref<1x16x64xbf16, #tpu.memory_space<vmem>>, vector<1x16x64xbf16>
    %124 = vector.shape_cast %123 : vector<1x16x64xbf16> to vector<16x64xbf16>
    %cst_53 = arith.constant dense<0.000000e+00> : vector<36x64xf32>
    %125 = tpu.matmul %122, %124, %cst_53 {dimension_numbers = #tpu.dot_dimension_numbers<[1], [0], [0], [1], [0, 0, 1, 1], [], []>} : vector<36x16xbf16>, vector<16x64xbf16>, vector<36x64xf32> -> vector<36x64xf32>
    %c0_54 = arith.constant 0 : index
    %c0_55 = arith.constant 0 : index
    %c0_56 = arith.constant 0 : index
    %126 = vector.load %arg13[%c0_54, %c0_55, %c0_56] : memref<1x1x64xf32, #tpu.memory_space<vmem>>, vector<1x1x64xf32>
    %127 = vector.shape_cast %126 : vector<1x1x64xf32> to vector<1x64xf32>
    %128 = vector.broadcast %127 : vector<1x64xf32> to vector<36x64xf32>
    %129 = arith.addf %125, %128 : vector<36x64xf32>
    %130 = arith.mulf %129, %129 : vector<36x64xf32>
    %131 = arith.mulf %129, %130 : vector<36x64xf32>
    %cst_57 = arith.constant 4.471500e-02 : f32
    %132 = vector.broadcast %cst_57 : f32 to vector<36x64xf32>
    %133 = arith.mulf %132, %131 : vector<36x64xf32>
    %134 = arith.addf %129, %133 : vector<36x64xf32>
    %cst_58 = arith.constant 0.797884583 : f32
    %135 = vector.broadcast %cst_58 : f32 to vector<36x64xf32>
    %136 = arith.mulf %135, %134 : vector<36x64xf32>
    %137 = math.tanh %136 : vector<36x64xf32>
    %cst_59 = arith.constant 1.000000e+00 : f32
    %138 = vector.broadcast %cst_59 : f32 to vector<36x64xf32>
    %139 = arith.addf %138, %137 : vector<36x64xf32>
    %cst_60 = arith.constant 5.000000e-01 : f32
    %140 = vector.broadcast %cst_60 : f32 to vector<36x64xf32>
    %141 = arith.mulf %140, %139 : vector<36x64xf32>
    %142 = arith.mulf %129, %141 : vector<36x64xf32>
    %143 = arith.truncf %142 : vector<36x64xf32> to vector<36x64xbf16>
    %c0_61 = arith.constant 0 : index
    %c0_62 = arith.constant 0 : index
    %c0_63 = arith.constant 0 : index
    %144 = vector.load %arg14[%c0_61, %c0_62, %c0_63] : memref<1x64x16xbf16, #tpu.memory_space<vmem>>, vector<1x64x16xbf16>
    %145 = vector.shape_cast %144 : vector<1x64x16xbf16> to vector<64x16xbf16>
    %cst_64 = arith.constant dense<0.000000e+00> : vector<36x16xf32>
    %146 = tpu.matmul %143, %145, %cst_64 {dimension_numbers = #tpu.dot_dimension_numbers<[1], [0], [0], [1], [0, 0, 1, 1], [], []>} : vector<36x64xbf16>, vector<64x16xbf16>, vector<36x16xf32> -> vector<36x16xf32>
    %147 = arith.addf %97, %146 : vector<36x16xf32>
    %c0_65 = arith.constant 0 : index
    %c0_66 = arith.constant 0 : index
    %c0_67 = arith.constant 0 : index
    %148 = vector.load %arg15[%c0_65, %c0_66, %c0_67] : memref<1x1x16xf32, #tpu.memory_space<vmem>>, vector<1x1x16xf32>
    %149 = vector.shape_cast %148 : vector<1x1x16xf32> to vector<1x16xf32>
    %150 = vector.broadcast %149 : vector<1x16xf32> to vector<36x16xf32>
    %151 = arith.addf %147, %150 : vector<36x16xf32>
    %152 = vector.shape_cast %151 : vector<36x16xf32> to vector<2x18x16xf32>
    %c0_68 = arith.constant 0 : index
    %c0_69 = arith.constant 0 : index
    %c0_70 = arith.constant 0 : index
    %153 = vector.load %arg16[%c0_68, %c0_69, %c0_70] : memref<2x18x16xf32, #tpu.memory_space<vmem>>, vector<2x18x16xf32>
    tpu.vector_store %arg16[%c0_68, %c0_69, %c0_70], %152 {strides = array<i32>} : memref<2x18x16xf32, #tpu.memory_space<vmem>>, vector<2x18x16xf32>,
    return
  }
  func.func @transform_0(%arg0: i32, %arg1: i32) -> (i32, i32, i32) {
    %c0_i32 = arith.constant 0 : i32
    %c0_i32_0 = arith.constant 0 : i32
    %c0_i32_1 = arith.constant 0 : i32
    return %arg0, %c0_i32, %c0_i32_0 : i32, i32, i32
  }
  func.func @transform_1(%arg0: i32, %arg1: i32) -> (i32, i32, i32) {
    %c0_i32 = arith.constant 0 : i32
    %c0_i32_0 = arith.constant 0 : i32
    %c0_i32_1 = arith.constant 0 : i32
    %c0_i32_2 = arith.constant 0 : i32
    return %c0_i32, %c0_i32_0, %c0_i32_1 : i32, i32, i32
  }
  func.func @transform_2(%arg0: i32, %arg1: i32) -> (i32, i32, i32) {
    %c0_i32 = arith.constant 0 : i32
    %c0_i32_0 = arith.constant 0 : i32
    %c0_i32_1 = arith.constant 0 : i32
    return %arg1, %c0_i32, %c0_i32_0 : i32, i32, i32
  }
  func.func @transform_3(%arg0: i32, %arg1: i32) -> (i32, i32, i32) {
    %c0_i32 = arith.constant 0 : i32
    %c0_i32_0 = arith.constant 0 : i32
    %c0_i32_1 = arith.constant 0 : i32
    return %arg1, %c0_i32, %c0_i32_0 : i32, i32, i32
  }
  func.func @transform_4(%arg0: i32, %arg1: i32) -> (i32, i32, i32) {
    %c0_i32 = arith.constant 0 : i32
    %c0_i32_0 = arith.constant 0 : i32
    %c0_i32_1 = arith.constant 0 : i32
    return %arg1, %c0_i32, %c0_i32_0 : i32, i32, i32
  }
  func.func @transform_5(%arg0: i32, %arg1: i32) -> (i32, i32, i32) {
    %c0_i32 = arith.constant 0 : i32
    %c0_i32_0 = arith.constant 0 : i32
    %c0_i32_1 = arith.constant 0 : i32
    return %arg1, %c0_i32, %c0_i32_0 : i32, i32, i32
  }
  func.func @transform_6(%arg0: i32, %arg1: i32) -> (i32, i32, i32) {
    %c0_i32 = arith.constant 0 : i32
    %c0_i32_0 = arith.constant 0 : i32
    %c0_i32_1 = arith.constant 0 : i32
    return %arg1, %c0_i32, %c0_i32_0 : i32, i32, i32
  }
  func.func @transform_7(%arg0: i32, %arg1: i32) -> (i32, i32, i32) {
    %c0_i32 = arith.constant 0 : i32
    %c0_i32_0 = arith.constant 0 : i32
    %c0_i32_1 = arith.constant 0 : i32
    return %arg1, %c0_i32, %c0_i32_0 : i32, i32, i32
  }
  func.func @transform_8(%arg0: i32, %arg1: i32) -> (i32, i32, i32) {
    %c0_i32 = arith.constant 0 : i32
    %c0_i32_0 = arith.constant 0 : i32
    %c0_i32_1 = arith.constant 0 : i32
    return %arg1, %c0_i32, %c0_i32_0 : i32, i32, i32
  }
  func.func @transform_9(%arg0: i32, %arg1: i32) -> (i32, i32, i32) {
    %c0_i32 = arith.constant 0 : i32
    %c0_i32_0 = arith.constant 0 : i32
    %c0_i32_1 = arith.constant 0 : i32
    return %arg1, %c0_i32, %c0_i32_0 : i32, i32, i32
  }
  func.func @transform_10(%arg0: i32, %arg1: i32) -> (i32, i32, i32) {
    %c0_i32 = arith.constant 0 : i32
    %c0_i32_0 = arith.constant 0 : i32
    %c0_i32_1 = arith.constant 0 : i32
    return %arg1, %c0_i32, %c0_i32_0 : i32, i32, i32
  }
  func.func @transform_11(%arg0: i32, %arg1: i32) -> (i32, i32, i32) {
    %c0_i32 = arith.constant 0 : i32
    %c0_i32_0 = arith.constant 0 : i32
    %c0_i32_1 = arith.constant 0 : i32
    return %arg1, %c0_i32, %c0_i32_0 : i32, i32, i32
  }
  func.func @transform_12(%arg0: i32, %arg1: i32) -> (i32, i32, i32) {
    %c0_i32 = arith.constant 0 : i32
    %c0_i32_0 = arith.constant 0 : i32
    %c0_i32_1 = arith.constant 0 : i32
    return %arg1, %c0_i32, %c0_i32_0 : i32, i32, i32
  }
  func.func @transform_13(%arg0: i32, %arg1: i32) -> (i32, i32, i32) {
    %c0_i32 = arith.constant 0 : i32
    %c0_i32_0 = arith.constant 0 : i32
    %c0_i32_1 = arith.constant 0 : i32
    return %arg1, %c0_i32, %c0_i32_0 : i32, i32, i32
  }
  func.func @transform_14(%arg0: i32, %arg1: i32) -> (i32, i32, i32) {
    %c0_i32 = arith.constant 0 : i32
    %c0_i32_0 = arith.constant 0 : i32
    %c0_i32_1 = arith.constant 0 : i32
    return %arg0, %c0_i32, %c0_i32_0 : i32, i32, i32
  }
}

module attributes {stable_mosaic.version = 11 : i64} {
  func.func @_masked_mse_kernel(%arg0: i32, %arg1: memref<1x16x48xf32, #tpu.memory_space<vmem>>, %arg2: memref<1x16x48xf32, #tpu.memory_space<vmem>>, %arg3: memref<1x1x16xf32, #tpu.memory_space<vmem>>, %arg4: memref<1x1xf32, #tpu.memory_space<vmem>>, %arg5: memref<1x1xf32, #tpu.memory_space<vmem>>, %arg6: memref<1x1xf32, #tpu.memory_space<vmem>>) attributes {dimension_semantics = [#tpu.dimension_semantics<arbitrary>], iteration_bounds = array<i64: 2>, scalar_prefetch = 0 : i64, scratch_operands = 2 : i64, tpu.core_type = #tpu.core_type<tc>, window_params = [{transform_indices = @transform_0, window_bounds = array<i64: 1, 16, 48>}, {transform_indices = @transform_1, window_bounds = array<i64: 1, 16, 48>}, {transform_indices = @transform_2, window_bounds = array<i64: 1, 1, 16>}, {pipeline_mode = #tpu.pipeline_mode<synchronous>, transform_indices = @transform_3, window_bounds = array<i64: 1, 1>}]} {
    %c0_i32 = arith.constant 0 : i32
    %0 = arith.cmpi eq, %arg0, %c0_i32 : i32
    %1 = arith.extui %0 : i1 to i32
    %c0_i32_0 = arith.constant 0 : i32
    %2 = arith.cmpi ne, %1, %c0_i32_0 : i32
    scf.if %2 {
      %cst_21 = arith.constant 0.000000e+00 : f32
      %32 = vector.broadcast %cst_21 : f32 to vector<1x1xf32>
      %c0_22 = arith.constant 0 : index
      %c0_23 = arith.constant 0 : index
      %33 = vector.load %arg5[%c0_22, %c0_23] : memref<1x1xf32, #tpu.memory_space<vmem>>, vector<1x1xf32>
      tpu.vector_store %arg5[%c0_22, %c0_23], %32 {strides = array<i32>} : memref<1x1xf32, #tpu.memory_space<vmem>>, vector<1x1xf32>,
      %cst_24 = arith.constant 0.000000e+00 : f32
      %34 = vector.broadcast %cst_24 : f32 to vector<1x1xf32>
      %c0_25 = arith.constant 0 : index
      %c0_26 = arith.constant 0 : index
      %35 = vector.load %arg6[%c0_25, %c0_26] : memref<1x1xf32, #tpu.memory_space<vmem>>, vector<1x1xf32>
      tpu.vector_store %arg6[%c0_25, %c0_26], %34 {strides = array<i32>} : memref<1x1xf32, #tpu.memory_space<vmem>>, vector<1x1xf32>,
    } else {
    }
    %c0 = arith.constant 0 : index
    %c0_1 = arith.constant 0 : index
    %c0_2 = arith.constant 0 : index
    %3 = vector.load %arg1[%c0, %c0_1, %c0_2] : memref<1x16x48xf32, #tpu.memory_space<vmem>>, vector<1x16x48xf32>
    %c0_3 = arith.constant 0 : index
    %c0_4 = arith.constant 0 : index
    %c0_5 = arith.constant 0 : index
    %4 = vector.load %arg2[%c0_3, %c0_4, %c0_5] : memref<1x16x48xf32, #tpu.memory_space<vmem>>, vector<1x16x48xf32>
    %5 = arith.subf %3, %4 : vector<1x16x48xf32>
    %6 = arith.mulf %5, %5 : vector<1x16x48xf32>
    %cst = arith.constant dense<0.000000e+00> : vector<1x16xf32>
    %7 = vector.multi_reduction <add>, %6, %cst [2] : vector<1x16x48xf32> to vector<1x16xf32>
    %cst_6 = arith.constant 4.800000e+01 : f32
    %8 = vector.broadcast %cst_6 : f32 to vector<1x16xf32>
    %9 = arith.divf %7, %8 : vector<1x16xf32>
    %c0_7 = arith.constant 0 : index
    %c0_8 = arith.constant 0 : index
    %c0_9 = arith.constant 0 : index
    %10 = vector.load %arg3[%c0_7, %c0_8, %c0_9] : memref<1x1x16xf32, #tpu.memory_space<vmem>>, vector<1x1x16xf32>
    %11 = vector.shape_cast %10 : vector<1x1x16xf32> to vector<1x16xf32>
    %c0_10 = arith.constant 0 : index
    %c0_11 = arith.constant 0 : index
    %12 = vector.load %arg5[%c0_10, %c0_11] : memref<1x1xf32, #tpu.memory_space<vmem>>, vector<1x1xf32>
    %13 = arith.mulf %9, %11 : vector<1x16xf32>
    %14 = vector.shape_cast %13 : vector<1x16xf32> to vector<1x1x16xf32>
    %cst_12 = arith.constant dense<0.000000e+00> : vector<1xf32>
    %15 = vector.multi_reduction <add>, %14, %cst_12 [1, 2] : vector<1x1x16xf32> to vector<1xf32>
    %16 = vector.shape_cast %15 : vector<1xf32> to vector<1x1x1xf32>
    %17 = vector.extract %16[0, 0, 0] : f32 from vector<1x1x1xf32>
    %18 = vector.broadcast %17 : f32 to vector<1x1xf32>
    %19 = arith.addf %12, %18 : vector<1x1xf32>
    %c0_13 = arith.constant 0 : index
    %c0_14 = arith.constant 0 : index
    %20 = vector.load %arg5[%c0_13, %c0_14] : memref<1x1xf32, #tpu.memory_space<vmem>>, vector<1x1xf32>
    tpu.vector_store %arg5[%c0_13, %c0_14], %19 {strides = array<i32>} : memref<1x1xf32, #tpu.memory_space<vmem>>, vector<1x1xf32>,
    %c0_15 = arith.constant 0 : index
    %c0_16 = arith.constant 0 : index
    %21 = vector.load %arg6[%c0_15, %c0_16] : memref<1x1xf32, #tpu.memory_space<vmem>>, vector<1x1xf32>
    %22 = vector.shape_cast %11 : vector<1x16xf32> to vector<1x1x16xf32>
    %cst_17 = arith.constant dense<0.000000e+00> : vector<1xf32>
    %23 = vector.multi_reduction <add>, %22, %cst_17 [1, 2] : vector<1x1x16xf32> to vector<1xf32>
    %24 = vector.shape_cast %23 : vector<1xf32> to vector<1x1x1xf32>
    %25 = vector.extract %24[0, 0, 0] : f32 from vector<1x1x1xf32>
    %26 = vector.broadcast %25 : f32 to vector<1x1xf32>
    %27 = arith.addf %21, %26 : vector<1x1xf32>
    %c0_18 = arith.constant 0 : index
    %c0_19 = arith.constant 0 : index
    %28 = vector.load %arg6[%c0_18, %c0_19] : memref<1x1xf32, #tpu.memory_space<vmem>>, vector<1x1xf32>
    tpu.vector_store %arg6[%c0_18, %c0_19], %27 {strides = array<i32>} : memref<1x1xf32, #tpu.memory_space<vmem>>, vector<1x1xf32>,
    %c1_i32 = arith.constant 1 : i32
    %29 = arith.cmpi eq, %arg0, %c1_i32 : i32
    %30 = arith.extui %29 : i1 to i32
    %c0_i32_20 = arith.constant 0 : i32
    %31 = arith.cmpi ne, %30, %c0_i32_20 : i32
    scf.if %31 {
      %c0_21 = arith.constant 0 : index
      %c0_22 = arith.constant 0 : index
      %32 = vector.load %arg5[%c0_21, %c0_22] : memref<1x1xf32, #tpu.memory_space<vmem>>, vector<1x1xf32>
      %c0_23 = arith.constant 0 : index
      %c0_24 = arith.constant 0 : index
      %33 = vector.load %arg6[%c0_23, %c0_24] : memref<1x1xf32, #tpu.memory_space<vmem>>, vector<1x1xf32>
      %34 = arith.divf %32, %33 : vector<1x1xf32>
      %c0_25 = arith.constant 0 : index
      %c0_26 = arith.constant 0 : index
      %35 = vector.load %arg4[%c0_25, %c0_26] : memref<1x1xf32, #tpu.memory_space<vmem>>, vector<1x1xf32>
      tpu.vector_store %arg4[%c0_25, %c0_26], %34 {strides = array<i32>} : memref<1x1xf32, #tpu.memory_space<vmem>>, vector<1x1xf32>,
    } else {
    }
    return
  }
  func.func @transform_0(%arg0: i32) -> (i32, i32, i32) {
    %c0_i32 = arith.constant 0 : i32
    %c0_i32_0 = arith.constant 0 : i32
    %c0_i32_1 = arith.constant 0 : i32
    return %arg0, %c0_i32, %c0_i32_0 : i32, i32, i32
  }
  func.func @transform_1(%arg0: i32) -> (i32, i32, i32) {
    %c0_i32 = arith.constant 0 : i32
    %c0_i32_0 = arith.constant 0 : i32
    %c0_i32_1 = arith.constant 0 : i32
    return %arg0, %c0_i32, %c0_i32_0 : i32, i32, i32
  }
  func.func @transform_2(%arg0: i32) -> (i32, i32, i32) {
    %c0_i32 = arith.constant 0 : i32
    %c0_i32_0 = arith.constant 0 : i32
    %c0_i32_1 = arith.constant 0 : i32
    return %arg0, %c0_i32, %c0_i32_0 : i32, i32, i32
  }
  func.func @transform_3(%arg0: i32) -> (i32, i32) {
    %c0_i32 = arith.constant 0 : i32
    %c0_i32_0 = arith.constant 0 : i32
    %c0_i32_1 = arith.constant 0 : i32
    return %c0_i32, %c0_i32_0 : i32, i32
  }
}

</mosaic_0001>

<bundles_post_ra>
// kernel: _lambda_.6
= control target key start
LH: loop header
LB: loop body
LE: loop exit
PB: predicated region body
PF: predicated region fallthrough
CT: control target
= control target key end

     0   :  { %s420_s15 = smov 0   ;;  %s455_s0 = inlined_call_operand.vmem [shape: f32[2,16,48], index: 0, kind: input, shape index: {}]   ;;  %s456_s1 = inlined_call_operand.vmem [shape: bf16[48,32], index: 1, kind: input, shape index: {}]   ;;  %s457_s2 = inlined_call_operand.vmem [shape: f32[1,32], index: 2, kind: input, shape index: {}]   ;;  %s458_s3 = inlined_call_operand.vmem [shape: f32[16,32], index: 3, kind: input, shape index: {}]   ;;  %s459_s4 = inlined_call_operand.vmem [shape: f32[2,16,32], index: 4, kind: output, shape index: {}]  }
   0x1 LB: > { %s340_s16 = sadd.s32 4294967295, %s391_s15   ;;  %p344_p0 = scmp.ge.s32.totalorder %s391_s15, 1  ;;  %s391_s15 = sphi %s420_s15, %s14_s15  }
   0x2   : > { %p162_p1 = scmp.lt.s32.totalorder %s391_s15, 3 }
   0x4   : > { %p163_p2 = pnand %p344_p0, %p162_p1 }
   0x5   : > { %p188_p3 = scmp.lt.s32.totalorder (!%p163_p2), %s340_s16, 1 }
   0x6   : > { %166 = sbr.rel (%p163_p2) target bundleno = 226 (0xe2), region = 36 }
   0xb   : > { %v382_v0 = vld [vmem:[%s456_s1 + $0x10] sm:$0xff]   ;;  %v393_v1 = vmov 0.0   ;;  %v383_v2 = vld [vmem:[%s456_s1 + $0x8] sm:$0xff]   ;;  %vm394_vm0 = vmmov 0   ;;  %s461_s16 = smov (!%p188_p3, %s340_s16), 1  ;;  %v384_v3 = vld [vmem:[%s456_s1] sm:$0xff]  }
   0xc   : > { %362 = vmatprep.subr.bf16.mxu0 %v393_v1  ;;  %368 = vmatprep.mubr.msk.bf16.mxu0 %vm394_vm0, %v393_v1  ;;  %s356_s23 = sshll.u32 %s461_s16, 4  ;;  %vm233_vm1 = vcmask 392192   ;;  %v349_v7 = vld [vmem:[%s457_s2] ss:$0 sm:$0xff]  ;;  %vm282_vm2 = vcmask 261120   ;;  %v279_v14 = vld [vmem:[%s458_s3 + $0x8] sm:$0xff] }
   0xd   : > { %363 = vmatpush3.bf16.msra.mxu0 %v382_v0  ;;  %s192_s26 = scalar_lea.vmem %s455_s0, %s356_s23  ;;  %v278_v9 = vld [vmem:[%s458_s3] sm:$0xff]  ;;  %s197_s7 = scalar_lea.vmem %s459_s4, %s356_s23 }
   0xe   : > { %364 = vmatprep.subr.bf16.mxu0 %v393_v1  ;;  %v199_v4 = vld [vmem:[%s192_s26] sm:$0xff]  ;;  %v200_v5 = vld [vmem:[%s192_s26 + $0x8] sm:$0xff] }
   0xf   : > { %v201_v6 = vpack.c.bf16 %v200_v5, %v199_v4 }
  0x11   : > { %365 = vmatpush3.bf16.msra.mxu0 %v383_v2 }
  0x12   : > { %366 = vmatprep.subr.bf16.mxu0 %v393_v1 }
  0x15   : > { %367 = vmatpush3.bf16.msra.mxu0 %v384_v3 }
  0x18   : > { %369 = vmatmul.mubr.msk.bf16.vlgmr.msra.gmra.mxu0 %vm233_vm1, %v201_v6 }
  0xd8   : > { %v271_v8 = vpop.f32.mrf.mxu0 }
  0xd9   : > { %v272_v10 = vadd.f32 %v349_v7, %v271_v8 }
  0xda   : > { %v370_v11 = vpop.f32.mrf.mxu0 }
  0xdb   : > { %v280_v12 = vadd.f32 %v278_v9, %v272_v10 }
  0xdc   : > { %v274_v13 = vpop.f32.mrf.mxu0 }
  0xdd   : > { %283 = vst.msk [vmem:[%s197_s7] sm:$0xff] %vm282_vm2, %v280_v12  ;;  %v275_v15 = vadd.f32 %v349_v7, %v274_v13 }
  0xde   : > { %v371_v16 = vpop.f32.mrf.mxu0 }
  0xdf   : > { %v281_v17 = vadd.f32 %v279_v14, %v275_v15 }
  0xe1   : > { %284 = vst.msk [vmem:[%s197_s7 + $0x8] sm:$0xff] %vm282_vm2, %v281_v17 }
  0xe2 PF: > { %s14_s15 = sadd.s32 1, %s391_s15  }
  0xe3   : > { %p11_p4 = scmp.ge.s32.totalorder %s14_s15, 4  }
  0xe5   :  { %13 = sbr.rel (!%p11_p4) target bundleno = 1 (0x1), region = 66 }

// kernel: _lambda_.8
= control target key start
LH: loop header
LB: loop body
LE: loop exit
PB: predicated region body
PF: predicated region fallthrough
CT: control target
= control target key end

     0   :  { %s456_s18 = smov 0   ;;  %s495_s0 = inlined_call_operand.vmem [shape: f32[2,6,32], index: 0, kind: input, shape index: {}]   ;;  %s496_s1 = inlined_call_operand.vmem [shape: f32[1,32], index: 1, kind: input, shape index: {}]   ;;  %s497_s2 = inlined_call_operand.vmem [shape: f32[1,32], index: 2, kind: input, shape index: {}]   ;;  %s498_s3 = inlined_call_operand.vmem [shape: bf16[32,16], index: 3, kind: input, shape index: {}]   ;;  %s499_s4 = inlined_call_operand.vmem [shape: f32[1,16], index: 4, kind: input, shape index: {}]   ;;  %s500_s5 = inlined_call_operand.vmem [shape: f32[2,6,16], index: 5, kind: output, shape index: {}]  }
   0x1 LB: > { %s376_s19 = sadd.s32 4294967295, %s422_s18   ;;  %p380_p0 = scmp.ge.s32.totalorder %s422_s18, 1  ;;  %s422_s18 = sphi %s456_s18, %s15_s18  }
   0x2   : > { %p186_p1 = scmp.lt.s32.totalorder %s422_s18, 3 }
   0x4   : > { %p187_p2 = pnand %p380_p0, %p186_p1 }
   0x5   : > { %p212_p3 = scmp.lt.s32.totalorder (!%p187_p2), %s376_s19, 1 }
   0x6   : > { %190 = sbr.rel (%p187_p2) target bundleno = 524 (0x20c), region = 40 }
   0xb   : > { %s502_s19 = smov (!%p212_p3, %s376_s19), 1  ;;  %vm224_vm0 = vcmask 259072   ;;  %v412_v7 = vld [vmem:[%s498_s3 + $0x8] sm:$0xff]   ;;  %v424_v8 = vmov 0.0   ;;  %vm425_vm1 = vmmov 0   ;;  %v413_v9 = vld [vmem:[%s498_s3] sm:$0xff]  }
   0xc   : > { %s381_s20 = sshll.u32 %s502_s19, 3  ;;  %394 = vmatprep.subr.bf16.mxu0 %v424_v8  ;;  %398 = vmatprep.mubr.msk.bf16.mxu0 %vm425_vm1, %v424_v8  ;;  %v383_v14 = vld [vmem:[%s496_s1] ss:$0 sm:$0xff]  ;;  %vm277_vm2 = vcmask 261120   ;;  %vm321_vm3 = vcmask 128000  }
   0xd   : > { %s215_s23 = scalar_lea.vmem %s495_s0, %s381_s20  ;;  %395 = vmatpush3.bf16.msra.mxu0 %v412_v7  ;;  %v384_v16 = vld [vmem:[%s497_s2] ss:$0 sm:$0xff]  ;;  %s219_s11 = scalar_lea.vmem %s500_s5, %s381_s20 }
   0xe   : > { %v221_v0 = vld [vmem:[%s215_s23] sm:$0x3f]  ;;  %396 = vmatprep.subr.bf16.mxu0 %v424_v8 }
   0xf   : > { %v225_v1 = vsel %vm224_vm0, %v221_v0, 0.0  ;;  %v385_v20 = vld [vmem:[%s499_s4] ss:$0 sm:$0xff] }
  0x10   : > { %226 = vadd.xlane.f32.xlu0 %v225_v1 }
  0x11   : > { %397 = vmatpush3.bf16.msra.mxu0 %v413_v9 }
  0x99   : > { %v227_v2 = vpop.xlane.xlu0 %226 }
  0x9a   : > { %v229_v3 = vmul.f32 0.03125, %v227_v2 }
  0x9c   : > { %v230_v4 = vsub.f32 %v221_v0, %v229_v3 }
  0x9e   : > { %v231_v5 = vmul.f32 %v230_v4, %v230_v4 }
  0xa0   : > { %v232_v6 = vsel %vm224_vm0, %v231_v5, 0.0 }
  0xa1   : > { %233 = vadd.xlane.f32.xlu0 %v232_v6 }
 0x12a   : > { %v234_v10 = vpop.xlane.xlu0 %233 }
 0x12b   : > { %v235_v11 = vmul.f32 0.03125, %v234_v10 }
 0x12d   : > { %v236_v12 = vadd.f32 1e-05, %v235_v11 }
 0x12f   : > { %414 = vrsqrt.f32 %v236_v12 }
 0x13c   : > { %v415_v13 = vpop.eup %414 }
 0x13d   : > { %v238_v15 = vmul.f32 %v415_v13, %v230_v4 }
 0x13f   : > { %v245_v17 = vmul.f32 %v383_v14, %v238_v15 }
 0x141   : > { %v252_v18 = vadd.f32 %v384_v16, %v245_v17 }
 0x143   : > { %v253_v19 = vpack.c.bf16 %v252_v18, %v252_v18 }
 0x145   : > { %399 = vmatmul.mubr.msk.bf16.vlgmr.msra.gmra.mxu0 %vm277_vm2, %v253_v19 }
 0x205   : > { %v315_v21 = vpop.f32.mrf.mxu0 }
 0x206   : > { %v316_v22 = vadd.f32 %v385_v20, %v315_v21 }
 0x207   : > { %v400_v23 = vpop.f32.mrf.mxu0 }
 0x208   : > { %322 = vst.msk [vmem:[%s219_s11] sm:$0x3f] %vm321_vm3, %v316_v22 }
 0x209   : > { %v318_v24 = vpop.f32.mrf.mxu0 }
 0x20b   : > { %v401_v25 = vpop.f32.mrf.mxu0 }
 0x20c PF: > { %s15_s18 = sadd.s32 1, %s422_s18  }
 0x20d   : > { %p12_p4 = scmp.ge.s32.totalorder %s15_s18, 4  }
 0x20f   :  { %14 = sbr.rel (!%p12_p4) target bundleno = 1 (0x1), region = 70 }

// kernel: _lambda_.7
= control target key start
LH: loop header
LB: loop body
LE: loop exit
PB: predicated region body
PF: predicated region fallthrough
CT: control target
= control target key end

     0   :  { %s3077_s28 = smov 0   ;;  %s3079_s29 = smov 0   ;;  %s3511_s0 = inlined_call_operand.vmem [shape: f32[2,6,32], index: 0, kind: input, shape index: {}]   ;;  %s3512_s1 = inlined_call_operand.vmem [shape: f32[1,1,32], index: 1, kind: input, shape index: {}]   ;;  %s3513_s2 = inlined_call_operand.vmem [shape: f32[2,1,32], index: 2, kind: input, shape index: {}]   ;;  %s3514_s3 = inlined_call_operand.vmem [shape: f32[2,1,32], index: 3, kind: input, shape index: {}]   ;;  %s3515_s4 = inlined_call_operand.vmem [shape: bf16[2,32,96], index: 4, kind: input, shape index: {}]   ;;  %s3516_s5 = inlined_call_operand.vmem [shape: f32[2,1,96], index: 5, kind: input, shape index: {}]   ;;  %s3517_s6 = inlined_call_operand.vmem [shape: bf16[2,32,32], index: 6, kind: input, shape index: {}]   ;;  %s3518_s7 = inlined_call_operand.vmem [shape: f32[2,1,32], index: 7, kind: input, shape index: {}]   ;;  %s3519_s8 = inlined_call_operand.vmem [shape: f32[2,1,32], index: 8, kind: input, shape index: {}]   ;;  %s3520_s9 = inlined_call_operand.vmem [shape: f32[2,1,32], index: 9, kind: input, shape index: {}]   ;;  %s3521_s10 = inlined_call_operand.vmem [shape: bf16[2,32,128], index: 10, kind: input, shape index: {}]   ;;  %s3522_s11 = inlined_call_operand.vmem [shape: f32[2,1,128], index: 11, kind: input, shape index: {}]   ;;  %s3523_s12 = inlined_call_operand.vmem [shape: bf16[2,128,32], index: 12, kind: input, shape index: {}]   ;;  %s3524_s13 = inlined_call_operand.vmem [shape: f32[2,1,32], index: 13, kind: input, shape index: {}]   ;;  %s3525_s14 = inlined_call_operand.vmem [shape: f32[2,6,32], index: 14, kind: output, shape index: {}]  }
   0x1   :  { %3529 = sst [smem:[#allocation6_spill]] %s3514_s3  ;;  %s3081_s30 = smov 0  }
   0x2   :  { %3530 = sst [smem:[#allocation7_spill]] %s3515_s4 }
   0x3   :  { %3531 = sst [smem:[#allocation8_spill]] %s3517_s6 }
   0x4 LB: > { %3532 = sst [smem:[#allocation2_spill]] %s2984_s29  ;;  %s33_s15 = sadd.s32 1, %s2984_s29  ;;  %s2988_s30 = sphi %s3081_s30, %s24_s30   ;;  %s2984_s29 = sphi %s3079_s29, %s3547_s29   ;;  %s2980_s28 = sphi %s3077_s28, %s3546_s28  }
   0x5   : > { %3533 = sst [smem:[#allocation3_spill]] %s2988_s30  ;;  %p2703_p0 = scmp.ge.s32.totalorder %s2988_s30, 1 }
   0x6   : > { %p34_p1 = scmp.ge.s32.totalorder %s33_s15, 2  ;;  %p529_p2 = scmp.lt.s32.totalorder %s2988_s30, 3 }
   0x8   : > { %s3549_s15 = smov (%p34_p1, %s33_s15), 0  ;;  %p530_p3 = pnand %p2703_p0, %p529_p2 }
   0x9   : > { %3534 = sst [smem:[#allocation4_spill]] %s3549_s15 }
   0xa   : > { %533 = sbr.rel (%p530_p3) target bundleno = 2923 (0xb6b), region = 76 }
   0xf   : > { %p625_p4 = scmp.lt.s32.totalorder %s2980_s28, 1  ;;  %s3536_s4 = sld [smem:[#allocation7_spill]] }
  0x10   : > { %s3537_s6 = sld [smem:[#allocation8_spill]]  ;;  %p2712_p5 = scmp.ne.s32.totalorder %s2980_s28, 0 }
  0x11   : > { %s3095_s1 = scalar_select %p625_p4, %s2980_s28, 1 }
  0x13   : > { %s2751_s22 = sshll.u32 %s3095_s1, 4  ;;  %s649_s3 = scalar_lea.vmem %s3519_s8, %s3095_s1 }
  0x14   : > { %s652_s25 = scalar_lea.vmem %s3520_s9, %s3095_s1  ;;  %s668_s23 = scalar_lea.vmem %s3524_s13, %s3095_s1 }
  0x15   : > { %s3113_s16 = scalar_lea.vmem %s3536_s4, %s2751_s22  ;;  %s3135_s4 = scalar_lea.vmem %s3521_s10, %s2751_s22 }
  0x16   : > { %s3118_s29 = scalar_lea.vmem %s3537_s6, %s2751_s22  ;;  %s660_s6 = scalar_lea.vmem %s3522_s11, %s3095_s1 }
  0x17   : > { %3538 = sst [smem:[#allocation5_spill]] %s3118_s29  ;;  %s2754_s29 = sshll.u32 %s3095_s1, 6 }
  0x18   : > { %s3145_s19 = scalar_lea.vmem %s3523_s12, %s2754_s29  ;;  %679 = sbr.rel (%p2712_p5) target bundleno = 31 (0x1f), region = 80 }
  0x1d   : > { %v680_v0 = vld [vmem:[%s3511_s0] sm:$0x3f]  ;;  %vm682_vm0 = vcmask 259072   ;;  %v681_v1 = vld [vmem:[%s3511_s0 + $0x8] sm:$0x3f] }
  0x1e   : > { %683 = vst.msk [vmem:[%s3525_s14] sm:$0x3f] %vm682_vm0, %v680_v0  ;;  %684 = vst.msk [vmem:[%s3525_s14 + $0x8] sm:$0x3f] %vm682_vm0, %v681_v1 }
  0x1f PF: > { %v693_v3 = vlaneseq  ;;  %v2990_v4 = vmov 1983009808   ;;  %vm756_vm1 = vcmask 261120   ;;  %vm760_vm2 = vcmask 257024   ;;  %s3539_s26 = scalar_lea.vmem %s3513_s2, %s3095_s1  ;;  %s3540_s15 = sld [smem:[#allocation6_spill]] }
  0x20   : > { %v691_v5 = vunpack.c.l.s4 %v2990_v4  ;;  %v2991_v27 = vmov 269488144   ;;  %v2992_v29 = vmov 842150450   ;;  %v2993_v31 = vmov 1414812756   ;;  %s3542_s28 = scalar_lea.vmem %s3516_s5, %s3095_s1 }
  0x21   : > { %v694_v7 = vshrl.u32 %v693_v3, 7  ;;  %v770_v28 = vunpack.c.l.s4 %v2991_v27  ;;  %v777_v30 = vunpack.c.l.s4 %v2992_v29  ;;  %v784_v32 = vunpack.c.l.s4 %v2993_v31  ;;  %s2997_s18 = smov 96   ;;  %s2998_s21 = smov 64  }
  0x22   : > { %v692_v9 = vunpack.c.0.s8 %v691_v5  ;;  %v2994_v33 = vmov 1987475062   ;;  %vm2996_vm3 = vmmov 0   ;;  %vm1165_vm4 = vcmask 130048   ;;  %s2999_s20 = smov 80   ;;  %s3000_s24 = smov 112  }
  0x23   : > { %v791_v34 = vunpack.c.l.s4 %v2994_v33  ;;  %v771_v35 = vunpack.c.0.s8 %v770_v28  ;;  %v778_v36 = vunpack.c.0.s8 %v777_v30  ;;  %v785_v37 = vunpack.c.0.s8 %v784_v32 }
  0x24   : > { %v3169_v11 = vsub.s32 %v692_v9, %v694_v7  ;;  %vm1263_vm5 = vcmask 46080   ;;  %vm1294_vm6 = vcmask 1042432   ;;  %vm1290_vm7 = vcmask 48128  }
  0x25   : > { %v685_v2 = vld [vmem:[%s3525_s14] sm:$0x3f]  ;;  %v686_v6 = vld [vmem:[%s3525_s14 + $0x8] sm:$0x3f]  ;;  %v792_v38 = vunpack.c.0.s8 %v791_v34  ;;  %v3202_v39 = vsub.s32 %v771_v35, %v694_v7  ;;  %v3204_v40 = vsub.s32 %v778_v36, %v694_v7  ;;  %v3206_v41 = vsub.s32 %v785_v37, %v694_v7  ;;  %s3541_s17 = scalar_lea.vmem %s3540_s15, %s3095_s1  ;;  %s3544_s15 = scalar_lea.vmem %s3518_s7, %s3095_s1 }
  0x26   : > { %v689_v8 = vcombine.high %v685_v2, %v685_v2  ;;  %v705_v10 = vcombine.high %v686_v6, %v686_v6  ;;  %v3172_v12 = vrot.slane %v685_v2, %v3169_v11  ;;  %v3178_v14 = vrot.slane %v686_v6, %v3169_v11  ;;  %v2714_v27 = vld [vmem:[%s3541_s17] ss:$0 sm:$0xff] }
  0x27   : > { %v3208_v42 = vsub.s32 %v792_v38, %v694_v7  ;;  %v967_v30 = vcombine.high %v2714_v27, %v2714_v27  ;;  %v974_v32 = vrot.slane %v2714_v27, %v3169_v11  ;;  %vm2511_vm8 = vcmask 259072  }
  0x28   : > { %v3175_v13 = vrot.slane %v689_v8, %v3169_v11  ;;  %v3181_v15 = vrot.slane %v705_v10, %v3169_v11  ;;  %v3185_v16 = vcombine.high %v3172_v12, %v3172_v12  ;;  %v3191_v18 = vcombine.high %v3178_v14, %v3178_v14  ;;  %v2924_v10 = vld [vmem:[%s3113_s16 + $0x8] sm:$0xff]  }
  0x29   : > { %v981_v35 = vrot.slane %v967_v30, %v3169_v11 }
  0x2a   : > { %v730_v17 = vcombine.low %v3175_v13, %v3178_v14  ;;  %v729_v19 = vcombine.low %v3172_v12, %v3185_v16  ;;  %v746_v21 = vcombine.low %v3191_v18, %v3181_v15 }
  0x2c   : > { %v744_v20 = vrot.slane %v730_v17, %v3169_v11  ;;  %v737_v22 = vrot.slane %v729_v19, %v3169_v11  ;;  %v753_v24 = vrot.slane %v746_v21, %v3169_v11  ;;  %v2995_v17 = vmov 0.0   ;;  %v2925_v19 = vld [vmem:[%s3113_s16] sm:$0xff]   ;;  %s3001_s16 = smov 48  }
  0x2d   : > { %2790 = vmatprep.subr.bf16.mxu1 %v2995_v17  ;;  %2794 = vmatprep.mubr.msk.bf16.mxu1 %vm2996_vm3, %v2995_v17 }
  0x2e   : > { %v745_v23 = vcombine.low %v737_v22, %v744_v20  ;;  %v761_v26 = vsel %vm760_vm2, %v753_v24, 0.0  ;;  %2791 = vmatpush3.bf16.msra.mxu1 %v2924_v10  ;;  %2816 = vmatprep.subr.bf16.mxu0 %v2995_v17 }
  0x2f   : > { %2792 = vmatprep.subr.bf16.mxu1 %v2995_v17  ;;  %2818 = vmatprep.mubr.msk.bf16.mxu0 %vm2996_vm3, %v2995_v17 }
  0x30   : > { %v757_v25 = vsel %vm756_vm1, %v745_v23, 0.0 }
  0x31   : > { %758 = vadd.xlane.f32.xlu0 %v757_v25 }
  0x32   : > { %2793 = vmatpush3.bf16.msra.mxu1 %v2925_v19 }
  0x33   : > { %2798 = vmatprep.subr.bf16.mxu1 %v2995_v17 }
  0x35   : > { %762 = vadd.xlane.f32.xlu0 %v761_v26  ;;  %v2713_v26 = vld [vmem:[%s3539_s26] ss:$0 sm:$0xff]  ;;  %s3543_s26 = sld [smem:[#allocation5_spill]] }
  0x36   : > { %v935_v28 = vcombine.high %v2713_v26, %v2713_v26  ;;  %v942_v29 = vrot.slane %v2713_v26, %v3169_v11 }
  0x38   : > { %v949_v31 = vrot.slane %v935_v28, %v3169_v11  ;;  %v950_v34 = vcombine.high %v942_v29, %v942_v29 }
  0xba   : > { %v759_v43 = vpop.xlane.xlu0 %758 }
  0xbb   : > { %v765_v44 = vmul.f32 0.03125, %v759_v43 }
  0xbd   : > { %v775_v45 = vrot.slane %v765_v44, %v3202_v39  ;;  %v782_v46 = vrot.slane %v765_v44, %v3204_v40  ;;  %v789_v47 = vrot.slane %v765_v44, %v3206_v41  ;;  %v796_v48 = vrot.slane %v765_v44, %v3208_v42 }
  0xbe   : > { %v763_v49 = vpop.xlane.xlu0 %762  ;;  %v951_v44 = vcombine.high %v949_v31, %v949_v31 }
  0xbf   : > { %v766_v50 = vmul.f32 0.03125, %v763_v49  ;;  %v817_v51 = vsub.f32 %v3172_v12, %v775_v45  ;;  %v818_v52 = vsub.f32 %v3185_v16, %v782_v46  ;;  %v819_v53 = vsub.f32 %v3175_v13, %v789_v47 }
  0xc0   : > { %v820_v54 = vsub.f32 %v3178_v14, %v796_v48  ;;  %v982_v45 = vcombine.high %v974_v32, %v974_v32 }
  0xc1   : > { %v803_v55 = vrot.slane %v766_v50, %v3202_v39  ;;  %v810_v56 = vrot.slane %v766_v50, %v3204_v40  ;;  %v823_v57 = vmul.f32 %v817_v51, %v817_v51  ;;  %v824_v58 = vmul.f32 %v818_v52, %v818_v52 }
  0xc2   : > { %v825_v59 = vmul.f32 %v819_v53, %v819_v53  ;;  %v826_v60 = vmul.f32 %v820_v54, %v820_v54 }
  0xc3   : > { %v3221_v61 = vsub.f32 %v3191_v18, %v803_v55  ;;  %v3224_v62 = vsub.f32 %v3181_v15, %v810_v56  ;;  %v835_v63 = vcombine.low %v823_v57, %v824_v58  ;;  %v983_v55 = vcombine.high %v981_v35, %v981_v35 }
  0xc4   : > { %v836_v0 = vcombine.low %v825_v59, %v826_v60 }
  0xc5   : > { %v843_v1 = vrot.slane %v835_v63, %v3169_v11  ;;  %v827_v2 = vmul.f32 %v3221_v61, %v3221_v61  ;;  %v828_v3 = vmul.f32 %v3224_v62, %v3224_v62 }
  0xc6   : > { %v850_v4 = vrot.slane %v836_v0, %v3169_v11 }
  0xc7   : > { %v852_v5 = vcombine.low %v827_v2, %v828_v3 }
  0xc8   : > { %v851_v6 = vcombine.low %v843_v1, %v850_v4 }
  0xc9   : > { %v859_v7 = vrot.slane %v852_v5, %v3169_v11 }
  0xca   : > { %v862_v8 = vsel %vm756_vm1, %v851_v6, 0.0 }
  0xcb   : > { %863 = vadd.xlane.f32.xlu1 %v862_v8  ;;  %v865_v9 = vsel %vm760_vm2, %v859_v7, 0.0 }
  0xcf   : > { %866 = vadd.xlane.f32.xlu1 %v865_v9 }
 0x154   : > { %v864_v20 = vpop.xlane.xlu1 %863 }
 0x155   : > { %v868_v21 = vmul.f32 0.03125, %v864_v20  ;;  %v2715_v20 = vld [vmem:[%s3542_s28] ss:$0 sm:$0xff] }
 0x157   : > { %v870_v22 = vadd.f32 1e-05, %v868_v21 }
 0x158   : > { %v867_v23 = vpop.xlane.xlu1 %866 }
 0x159   : > { %2938 = vrsqrt.f32 %v870_v22  ;;  %v869_v24 = vmul.f32 0.03125, %v867_v23 }
 0x15b   : > { %v871_v25 = vadd.f32 1e-05, %v869_v24 }
 0x15d   : > { %2940 = vrsqrt.f32 %v871_v25 }
 0x166   : > { %v2939_v33 = vpop.eup %2938 }
 0x167   : > { %v882_v36 = vrot.slane %v2939_v33, %v3202_v39  ;;  %v889_v37 = vrot.slane %v2939_v33, %v3204_v40  ;;  %v896_v38 = vrot.slane %v2939_v33, %v3206_v41  ;;  %v903_v43 = vrot.slane %v2939_v33, %v3208_v42 }
 0x169   : > { %v924_v46 = vmul.f32 %v882_v36, %v817_v51  ;;  %v925_v47 = vmul.f32 %v889_v37, %v818_v52  ;;  %v926_v48 = vmul.f32 %v896_v38, %v819_v53  ;;  %v927_v49 = vmul.f32 %v903_v43, %v820_v54 }
 0x16a   : > { %v2941_v50 = vpop.eup %2940 }
 0x16b   : > { %v910_v56 = vrot.slane %v2941_v50, %v3202_v39  ;;  %v917_v57 = vrot.slane %v2941_v50, %v3204_v40  ;;  %v956_v58 = vmul.f32 %v942_v29, %v924_v46  ;;  %v957_v59 = vmul.f32 %v950_v34, %v925_v47 }
 0x16c   : > { %v958_v60 = vmul.f32 %v949_v31, %v926_v48  ;;  %v959_v63 = vmul.f32 %v951_v44, %v927_v49 }
 0x16d   : > { %v928_v0 = vmul.f32 %v910_v56, %v3221_v61  ;;  %v929_v1 = vmul.f32 %v917_v57, %v3224_v62  ;;  %v988_v2 = vadd.f32 %v974_v32, %v956_v58  ;;  %v989_v3 = vadd.f32 %v982_v45, %v957_v59 }
 0x16e   : > { %v990_v51 = vadd.f32 %v981_v35, %v958_v60  ;;  %v991_v52 = vadd.f32 %v983_v55, %v959_v63 }
 0x16f   : > { %v960_v53 = vmul.f32 %v942_v29, %v928_v0  ;;  %v961_v54 = vmul.f32 %v950_v34, %v929_v1  ;;  %v1000_v4 = vcombine.low %v988_v2, %v989_v3 }
 0x170   : > { %v1001_v5 = vcombine.low %v990_v51, %v991_v52 }
 0x171   : > { %v992_v6 = vadd.f32 %v974_v32, %v960_v53  ;;  %v993_v7 = vadd.f32 %v982_v45, %v961_v54  ;;  %v1008_v8 = vrot.slane %v1000_v4, %v3169_v11 }
 0x172   : > { %v1015_v9 = vrot.slane %v1001_v5, %v3169_v11 }
 0x173   : > { %v1017_v10 = vcombine.low %v992_v6, %v993_v7 }
 0x174   : > { %v1016_v19 = vcombine.low %v1008_v8, %v1015_v9 }
 0x175   : > { %v1024_v61 = vrot.slane %v1017_v10, %v3169_v11 }
 0x177   : > { %v1027_v62 = vpack.c.bf16 %v1024_v61, %v1016_v19 }
 0x179   : > { %2795 = vmatmul.mubr.msk.bf16.vlgmr.msra.gmra.mxu1 %vm756_vm1, %v1027_v62 }
 0x17a   : > { %2800 = vmatprep.mubr.msk.bf16.mxu1 %vm2996_vm3, %v2995_v17 }
 0x239   : > { %v1088_v21 = vpop.f32.mrf.mxu1 }
 0x23a   : > { %v1089_v22 = vadd.f32 %v2715_v20, %v1088_v21 }
 0x23b   : > { %v2796_v23 = vpop.f32.mrf.mxu1 }
 0x23c   : > { %v1097_v24 = vcombine.high %v1089_v22, %v1089_v22  ;;  %v1104_v25 = vrot.slane %v1089_v22, %v3169_v11 }
 0x23d   : > { %v1091_v26 = vpop.f32.mrf.mxu1 }
 0x23e   : > { %v1111_v27 = vrot.slane %v1097_v24, %v3169_v11  ;;  %v1112_v28 = vcombine.high %v1104_v25, %v1104_v25  ;;  %v1092_v29 = vadd.f32 %v2715_v20, %v1091_v26 }
 0x23f   : > { %v2797_v30 = vpop.f32.mrf.mxu1 }
 0x240   : > { %v1126_v31 = vcombine.low %v1104_v25, %v1112_v28  ;;  %v1113_v32 = vcombine.high %v1111_v27, %v1111_v27  ;;  %v1120_v33 = vrot.slane %v1092_v29, %v3169_v11  ;;  %v1140_v35 = vrot.slane %v1111_v27, %v3169_v11 }
 0x242   : > { %v1133_v34 = vrot.slane %v1126_v31, %v3169_v11  ;;  %v1121_v36 = vcombine.high %v1120_v33, %v1120_v33  ;;  %v1142_v37 = vcombine.low %v1113_v32, %v1120_v33 }
 0x244   : > { %v1141_v38 = vcombine.low %v1133_v34, %v1140_v35  ;;  %v1149_v43 = vrot.slane %v1142_v37, %v3169_v11  ;;  %v1156_v44 = vrot.slane %v1121_v36, %v3169_v11 }
 0x246   : > { %v3285_v45 = vpack.c.bf16 %v1141_v38, %v1141_v38  ;;  %v1157_v46 = vcombine.low %v1149_v43, %v1156_v44 }
 0x248   : > { %v3287_v47 = vpack.c.bf16 %v1157_v46, %v1157_v46  ;;  %1163 = vrot.lane.b32.xlu0 %v3285_v45, %s2997_s18 }
 0x24a   : > { %1213 = vrot.lane.b32.xlu1 %v3287_v47, %s2997_s18 }
 0x2ba   : > { %v1164_v48 = vpop.permute.xlu0 %1163 }
 0x2bb   : > { %v1170_v49 = vsel %vm1165_vm4, %v1164_v48, 0 }
 0x2bc   : > { %2799 = vmatpush3.bf16.xpose.msra.mxu1 %v1170_v49  ;;  %v1214_v50 = vpop.permute.xlu1 %1213 }
 0x2bd   : > { %2804 = vmatprep.subr.bf16.mxu1 %v2995_v17  ;;  %v1219_v55 = vsel %vm1165_vm4, %v1214_v50, 0 }
 0x2c3   : > { %2801 = vmatmul.mubr.msk.bf16.vlgmr.msra.gmra.mxu1 %vm1165_vm4, %v3285_v45 }
 0x2c4   : > { %2805 = vmatpush3.bf16.xpose.msra.mxu1 %v1219_v55  ;;  %2806 = vmatprep.mubr.msk.bf16.mxu1 %vm2996_vm3, %v2995_v17 }
 0x2c5   : > { %2810 = vmatprep.subr.bf16.mxu1 %v2995_v17 }
 0x2cb   : > { %2807 = vmatmul.mubr.msk.bf16.vlgmr.msra.gmra.mxu1 %vm1165_vm4, %v3287_v47 }
 0x2cc   : > { %2812 = vmatprep.mubr.msk.bf16.mxu1 %vm2996_vm3, %v2995_v17 }
 0x383   : > { %v1206_v56 = vpop.f32.mrf.mxu1 }
 0x384   : > { %v1261_v57 = vmul.f32 0.25, %v1206_v56 }
 0x385   : > { %v2802_v58 = vpop.f32.mrf.mxu1 }
 0x386   : > { %v1264_v59 = vsel %vm1263_vm5, %v1261_v57, -inf }
 0x387   : > { %1265 = vmax.xlane.f32.xlu1 %v1264_v59  ;;  %v1209_v60 = vpop.f32.mrf.mxu1 }
 0x389   : > { %v2803_v63 = vpop.f32.mrf.mxu1 }
 0x38b   : > { %v1255_v0 = vpop.f32.mrf.mxu1 }
 0x38c   : > { %v1262_v1 = vmul.f32 0.25, %v1255_v0 }
 0x38d   : > { %v2808_v2 = vpop.f32.mrf.mxu1 }
 0x38e   : > { %v1267_v3 = vsel %vm1263_vm5, %v1262_v1, -inf }
 0x38f   : > { %1268 = vmax.xlane.f32.xlu0 %v1267_v3  ;;  %v1258_v51 = vpop.f32.mrf.mxu1 }
 0x391   : > { %v2809_v52 = vpop.f32.mrf.mxu1 }
 0x398   : > { %1338 = vrot.lane.b32.xlu1 %v3287_v47, %s2998_s21 }
 0x39c   : > { %1450 = vrot.lane.b32.xlu1 %v3285_v45, %s2999_s20 }
 0x410   : > { %v1266_v53 = vpop.xlane.xlu1 %1265 }
 0x411   : > { %v1270_v54 = vsub.f32 %v1261_v57, %v1266_v53 }
 0x413   : > { %v1272_v4 = vmul.f32 1.442695, %v1270_v54 }
 0x414   : > { %v1339_v5 = vpop.permute.xlu1 %1338 }
 0x415   : > { %2942 = vpow2.f32 %v1272_v4  ;;  %v1344_v6 = vsel %vm1294_vm6, %v1339_v5, 0 }
 0x416   : > { %2817 = vmatpush3.bf16.msra.mxu0 %v1344_v6 }
 0x417   : > { %2828 = vmatprep.subr.bf16.mxu0 %v2995_v17 }
 0x418   : > { %v1269_v7 = vpop.xlane.xlu0 %1268  ;;  %v1451_v21 = vpop.permute.xlu1 %1450 }
 0x419   : > { %v1271_v8 = vsub.f32 %v1262_v1, %v1269_v7  ;;  %v1456_v28 = vsel %vm1165_vm4, %v1451_v21, 0 }
 0x41b   : > { %v1274_v9 = vmul.f32 1.442695, %v1271_v8 }
 0x41d   : > { %2944 = vpow2.f32 %v1274_v9 }
 0x422   : > { %v2943_v10 = vpop.eup %2942 }
 0x423   : > { %v1276_v19 = vsel %vm1263_vm5, %v2943_v10, 0.0 }
 0x424   : > { %1277 = vadd.xlane.f32.xlu0 %v1276_v19 }
 0x42a   : > { %v2945_v61 = vpop.eup %2944 }
 0x42b   : > { %v1279_v62 = vsel %vm1263_vm5, %v2945_v61, 0.0 }
 0x42c   : > { %1280 = vadd.xlane.f32.xlu1 %v1279_v62 }
 0x43a   : > { %1288 = vrot.lane.b32.xlu0 %v3285_v45, %s2998_s21 }
 0x43d   : > { %1500 = vrot.lane.b32.xlu1 %v3287_v47, %s2999_s20 }
 0x43e   : > { %1448 = vrot.lane.b32.xlu0 %v3285_v45, %s3000_s24 }
 0x441   : > { %1498 = vrot.lane.b32.xlu1 %v3287_v47, %s3000_s24 }
 0x4ad   : > { %v1278_v20 = vpop.xlane.xlu0 %1277 }
 0x4ae   : > { %2946 = vrcp.f32 %v1278_v20 }
 0x4b1   : > { %v1289_v22 = vpop.permute.xlu0 %1288 }
 0x4b2   : > { %v1296_v23 = vsel %vm1294_vm6, %v1289_v22, 0 }
 0x4b3   : > { %2811 = vmatpush3.bf16.msra.mxu1 %v1296_v23 }
 0x4b4   : > { %2822 = vmatprep.subr.bf16.mxu1 %v2995_v17 }
 0x4b5   : > { %v1281_v24 = vpop.xlane.xlu1 %1280  ;;  %v1449_v33 = vpop.permute.xlu0 %1448 }
 0x4b6   : > { %2948 = vrcp.f32 %v1281_v24 }
 0x4b9   : > { %v1501_v31 = vpop.permute.xlu1 %1500 }
 0x4ba   : > { %v1506_v34 = vsel %vm1165_vm4, %v1501_v31, 0 }
 0x4bb   : > { %v2947_v25 = vpop.eup %2946 }
 0x4bc   : > { %v1284_v26 = vmul.f32 %v2947_v25, %v2943_v10 }
 0x4bd   : > { %v1499_v35 = vpop.permute.xlu1 %1498 }
 0x4be   : > { %v1286_v27 = vpack.c.bf16 %v1284_v26, %v1284_v26 }
 0x4c0   : > { %2813 = vmatmul.mubr.msk.bf16.vlgmr.msra.gmra.mxu1 %vm1290_vm7, %v1286_v27 }
 0x4c1   : > { %2823 = vmatpush3.bf16.xpose.msra.mxu1 %v1456_v28  ;;  %2824 = vmatprep.mubr.msk.bf16.mxu1 %vm2996_vm3, %v2995_v17 }
 0x4c2   : > { %2834 = vmatprep.subr.bf16.mxu1 %v2995_v17 }
 0x4c3   : > { %v2949_v29 = vpop.eup %2948 }
 0x4c4   : > { %v1285_v30 = vmul.f32 %v2949_v29, %v2945_v61 }
 0x4c6   : > { %v1287_v32 = vpack.c.bf16 %v1285_v30, %v1285_v30 }
 0x4c8   : > { %2819 = vmatmul.mubr.msk.bf16.vlgmr.msra.gmra.mxu0 %vm1290_vm7, %v1287_v32  ;;  %2825 = vmatmul.mubr.msk.bf16.vlgmr.msra.gmra.mxu1 %vm1165_vm4, %v1449_v33 }
 0x4c9   : > { %2829 = vmatpush3.bf16.xpose.msra.mxu0 %v1506_v34  ;;  %2830 = vmatprep.mubr.msk.bf16.mxu0 %vm2996_vm3, %v2995_v17 }
 0x4ca   : > { %2840 = vmatprep.subr.bf16.mxu0 %v2995_v17  ;;  %2836 = vmatprep.mubr.msk.bf16.mxu1 %vm2996_vm3, %v2995_v17 }
 0x4d0   : > { %2831 = vmatmul.mubr.msk.bf16.vlgmr.msra.gmra.mxu0 %vm1165_vm4, %v1499_v35 }
 0x4d1   : > { %2842 = vmatprep.mubr.msk.bf16.mxu0 %vm2996_vm3, %v2995_v17 }
 0x580   : > { %v1332_v36 = vpop.f32.mrf.mxu1 }
 0x581   : > { %v1395_v37 = vrot.slane %v1332_v36, %v3169_v11  ;;  %v1388_v43 = vcombine.high %v1332_v36, %v1332_v36 }
 0x582   : > { %v2814_v38 = vpop.f32.mrf.mxu1 }
 0x583   : > { %v1403_v46 = vcombine.high %v1395_v37, %v1395_v37  ;;  %v1402_v49 = vrot.slane %v1388_v43, %v3169_v11 }
 0x584   : > { %v1335_v44 = vpop.f32.mrf.mxu1 }
 0x585   : > { %v1420_v56 = vcombine.low %v1395_v37, %v1403_v46  ;;  %v2926_v46 = vld [vmem:[%s3543_s26] sm:$0xff]  }
 0x586   : > { %v2815_v48 = vpop.f32.mrf.mxu1 }
 0x587   : > { %v1428_v53 = vrot.slane %v1420_v56, %v3169_v11 }
 0x588   : > { %v1380_v50 = vpop.f32.mrf.mxu0  ;;  %v1492_v55 = vpop.f32.mrf.mxu1 }
 0x589   : > { %v1404_v57 = vcombine.high %v1380_v50, %v1380_v50  ;;  %v1411_v58 = vrot.slane %v1380_v50, %v3169_v11  ;;  %v1548_v59 = vmul.f32 0.25, %v1492_v55 }
 0x58a   : > { %v2820_v60 = vpop.f32.mrf.mxu0  ;;  %v2826_v63 = vpop.f32.mrf.mxu1 }
 0x58b   : > { %v1418_v0 = vrot.slane %v1404_v57, %v3169_v11  ;;  %v1419_v1 = vcombine.high %v1411_v58, %v1411_v58  ;;  %v1421_v2 = vcombine.low %v1402_v49, %v1411_v58  ;;  %v1550_v3 = vsel %vm1263_vm5, %v1548_v59, -inf  ;;  %v2927_v49 = vld [vmem:[%s3543_s26 + $0x8] sm:$0xff]  }
 0x58c   : > { %v1383_v51 = vpop.f32.mrf.mxu0  ;;  %1551 = vmax.xlane.f32.xlu0 %v1550_v3  ;;  %v1495_v52 = vpop.f32.mrf.mxu1 }
 0x58d   : > { %v1435_v54 = vrot.slane %v1421_v2, %v3169_v11  ;;  %v1437_v4 = vcombine.low %v1419_v1, %v1418_v0 }
 0x58e   : > { %v2821_v5 = vpop.f32.mrf.mxu0  ;;  %v2827_v6 = vpop.f32.mrf.mxu1 }
 0x58f   : > { %v1436_v7 = vcombine.low %v1428_v53, %v1435_v54  ;;  %v1444_v8 = vrot.slane %v1437_v4, %v3169_v11 }
 0x590   : > { %v1542_v9 = vpop.f32.mrf.mxu0 }
 0x591   : > { %v1447_v10 = vpack.c.bf16 %v1444_v8, %v1436_v7  ;;  %v1549_v19 = vmul.f32 0.25, %v1542_v9 }
 0x592   : > { %v2832_v61 = vpop.f32.mrf.mxu0 }
 0x593   : > { %v1553_v62 = vsel %vm1263_vm5, %v1549_v19, -inf }
 0x594   : > { %1554 = vmax.xlane.f32.xlu1 %v1553_v62  ;;  %v1545_v20 = vpop.f32.mrf.mxu0 }
 0x596   : > { %v2833_v21 = vpop.f32.mrf.mxu0 }
 0x5a5   : > { %1622 = vrot.lane.b32.xlu1 %v3287_v47, %s3001_s16 }
 0x615   : > { %v1552_v22 = vpop.xlane.xlu0 %1551 }
 0x616   : > { %v1556_v23 = vsub.f32 %v1548_v59, %v1552_v22  ;;  %v2731_v22 = vld [vmem:[%s3544_s15] ss:$0 sm:$0xff] }
 0x618   : > { %v1558_v24 = vmul.f32 1.442695, %v1556_v23  ;;  %v1877_v23 = vcombine.high %v2731_v22, %v2731_v22 }
 0x61a   : > { %2950 = vpow2.f32 %v1558_v24 }
 0x61d   : > { %v1555_v25 = vpop.xlane.xlu1 %1554 }
 0x61e   : > { %v1557_v26 = vsub.f32 %v1549_v19, %v1555_v25  ;;  %v1884_v25 = vrot.slane %v2731_v22, %v3169_v11 }
 0x620   : > { %v1560_v27 = vmul.f32 1.442695, %v1557_v26 }
 0x621   : > { %v1623_v28 = vpop.permute.xlu1 %1622 }
 0x622   : > { %2952 = vpow2.f32 %v1560_v27  ;;  %v1628_v29 = vsel %vm1294_vm6, %v1623_v28, 0 }
 0x623   : > { %2841 = vmatpush3.bf16.msra.mxu0 %v1628_v29 }
 0x624   : > { %2852 = vmatprep.subr.bf16.mxu0 %v2995_v17 }
 0x627   : > { %v2951_v30 = vpop.eup %2950 }
 0x628   : > { %v1562_v31 = vsel %vm1263_vm5, %v2951_v30, 0.0 }
 0x629   : > { %1563 = vadd.xlane.f32.xlu0 %v1562_v31  ;;  %v1892_v31 = vcombine.high %v1884_v25, %v1884_v25 }
 0x62f   : > { %v2953_v32 = vpop.eup %2952 }
 0x630   : > { %v1565_v47 = vsel %vm1263_vm5, %v2953_v32, 0.0 }
 0x631   : > { %1566 = vadd.xlane.f32.xlu0 %v1565_v47 }
 0x647   : > { %1574 = vrot.lane.b32.xlu0 %v3285_v45, %s3001_s16 }
 0x6b2   : > { %v1564_v33 = vpop.xlane.xlu0 %1563 }
 0x6b3   : > { %2954 = vrcp.f32 %v1564_v33 }
 0x6ba   : > { %v1567_v34 = vpop.xlane.xlu0 %1566 }
 0x6bb   : > { %2956 = vrcp.f32 %v1567_v34 }
 0x6be   : > { %v1575_v35 = vpop.permute.xlu0 %1574 }
 0x6bf   : > { %v1580_v36 = vsel %vm1294_vm6, %v1575_v35, 0 }
 0x6c0   : > { %v2955_v37 = vpop.eup %2954  ;;  %2835 = vmatpush3.bf16.msra.mxu1 %v1580_v36 }
 0x6c1   : > { %v1570_v38 = vmul.f32 %v2955_v37, %v2951_v30  ;;  %2846 = vmatprep.subr.bf16.mxu1 %v2995_v17  ;;  %v1891_v30 = vrot.slane %v1877_v23, %v3169_v11 }
 0x6c3   : > { %v1572_v43 = vpack.c.bf16 %v1570_v38, %v1570_v38 }
 0x6c5   : > { %2837 = vmatmul.mubr.msk.bf16.vlgmr.msra.gmra.mxu1 %vm1290_vm7, %v1572_v43 }
 0x6c6   : > { %2848 = vmatprep.mubr.msk.bf16.mxu1 %vm2996_vm3, %v2995_v17  ;;  %2847 = vmatpush3.bf16.msra.mxu1 %v2927_v49 }
 0x6c7   : > { %2858 = vmatprep.subr.bf16.mxu1 %v2995_v17 }
 0x6c8   : > { %v2957_v45 = vpop.eup %2956 }
 0x6c9   : > { %v1571_v44 = vmul.f32 %v2957_v45, %v2953_v32  ;;  %v1893_v45 = vcombine.high %v1891_v30, %v1891_v30 }
 0x6cb   : > { %v1573_v48 = vpack.c.bf16 %v1571_v44, %v1571_v44 }
 0x6cd   : > { %2843 = vmatmul.mubr.msk.bf16.vlgmr.msra.gmra.mxu0 %vm1290_vm7, %v1573_v48 }
 0x6ce   : > { %2853 = vmatpush3.bf16.msra.mxu0 %v2926_v46  ;;  %2854 = vmatprep.mubr.msk.bf16.mxu0 %vm2996_vm3, %v2995_v17 }
 0x6cf   : > { %2866 = vmatprep.subr.bf16.mxu0 %v2995_v17 }
 0x6d5   : > { %2855 = vmatmul.mubr.msk.bf16.vlgmr.msra.gmra.mxu0 %vm1165_vm4, %v1447_v10 }
 0x6d6   : > { %2882 = vmatprep.mubr.msk.bf16.mxu0 %vm2996_vm3, %v2995_v17 }
 0x785   : > { %v1616_v50 = vpop.f32.mrf.mxu1 }
 0x786   : > { %v1679_v55 = vrot.slane %v1616_v50, %v3169_v11  ;;  %v1672_v58 = vcombine.high %v1616_v50, %v1616_v50 }
 0x787   : > { %v2838_v56 = vpop.f32.mrf.mxu1 }
 0x788   : > { %v1687_v59 = vcombine.high %v1679_v55, %v1679_v55  ;;  %v1686_v0 = vrot.slane %v1672_v58, %v3169_v11 }
 0x789   : > { %v1619_v57 = vpop.f32.mrf.mxu1 }
 0x78a   : > { %v1704_v1 = vcombine.low %v1679_v55, %v1687_v59 }
 0x78b   : > { %v2839_v60 = vpop.f32.mrf.mxu1 }
 0x78c   : > { %v1712_v5 = vrot.slane %v1704_v1, %v3169_v11 }
 0x78d   : > { %v1664_v63 = vpop.f32.mrf.mxu0 }
 0x78e   : > { %v1688_v2 = vcombine.high %v1664_v63, %v1664_v63  ;;  %v1695_v3 = vrot.slane %v1664_v63, %v3169_v11 }
 0x78f   : > { %v2844_v51 = vpop.f32.mrf.mxu0 }
 0x790   : > { %v1702_v52 = vrot.slane %v1688_v2, %v3169_v11  ;;  %v1703_v53 = vcombine.high %v1695_v3, %v1695_v3  ;;  %v1705_v54 = vcombine.low %v1686_v0, %v1695_v3 }
 0x791   : > { %v1667_v4 = vpop.f32.mrf.mxu0 }
 0x792   : > { %v1719_v6 = vrot.slane %v1705_v54, %v3169_v11  ;;  %v1721_v7 = vcombine.low %v1703_v53, %v1702_v52 }
 0x793   : > { %v2845_v8 = vpop.f32.mrf.mxu0 }
 0x794   : > { %v1720_v9 = vcombine.low %v1712_v5, %v1719_v6  ;;  %v1728_v10 = vrot.slane %v1721_v7, %v3169_v11 }
 0x795   : > { %v1825_v19 = vpop.f32.mrf.mxu0 }
 0x796   : > { %v1731_v61 = vpack.c.bf16 %v1728_v10, %v1720_v9 }
 0x797   : > { %v2856_v62 = vpop.f32.mrf.mxu0 }
 0x798   : > { %2849 = vmatmul.mubr.msk.bf16.vlgmr.msra.gmra.mxu1 %vm1165_vm4, %v1731_v61 }
 0x799   : > { %v1828_v20 = vpop.f32.mrf.mxu0  ;;  %2862 = vmatprep.mubr.msk.bf16.mxu1 %vm2996_vm3, %v2995_v17 }
 0x79b   : > { %v2857_v21 = vpop.f32.mrf.mxu0 }
 0x858   : > { %v1775_v24 = vpop.f32.mrf.mxu1 }
 0x859   : > { %v1826_v26 = vadd.f32 %v1825_v19, %v1775_v24 }
 0x85a   : > { %v2850_v27 = vpop.f32.mrf.mxu1 }
 0x85b   : > { %v1834_v28 = vcombine.high %v1826_v26, %v1826_v26  ;;  %v1841_v29 = vrot.slane %v1826_v26, %v3169_v11 }
 0x85c   : > { %v1778_v32 = vpop.f32.mrf.mxu1 }
 0x85d   : > { %v1848_v47 = vrot.slane %v1834_v28, %v3169_v11  ;;  %v1849_v33 = vcombine.high %v1841_v29, %v1841_v29  ;;  %v1865_v34 = vadd.f32 %v1841_v29, %v3172_v12  ;;  %v1829_v35 = vadd.f32 %v1828_v20, %v1778_v32 }
 0x85e   : > { %v2851_v36 = vpop.f32.mrf.mxu1 }
 0x85f   : > { %v1850_v37 = vcombine.high %v1848_v47, %v1848_v47  ;;  %v1866_v38 = vadd.f32 %v1849_v33, %v3185_v16  ;;  %v1867_v43 = vadd.f32 %v1848_v47, %v3175_v13  ;;  %v1857_v44 = vrot.slane %v1829_v35, %v3169_v11  ;;  %v2929_v35 = vld [vmem:[%s3135_s4] sm:$0xff]  }
 0x860   : > { %v3387_v48 = vadd.f32 %v1884_v25, %v1865_v34  ;;  %v2928_v34 = vld [vmem:[%s3135_s4 + $0x8] sm:$0xff]  }
 0x861   : > { %v1868_v46 = vadd.f32 %v1850_v37, %v3178_v14  ;;  %v3389_v49 = vadd.f32 %v1892_v31, %v1866_v38  ;;  %v1858_v50 = vcombine.high %v1857_v44, %v1857_v44  ;;  %v1869_v55 = vadd.f32 %v1857_v44, %v3191_v18  ;;  %2859 = vmatpush3.bf16.msra.mxu1 %v2928_v34  ;;  %v2932_v34 = vld [vmem:[%s3145_s19 + $0x28] sm:$0xff]  }
 0x862   : > { %v3392_v12 = vadd.f32 %v1891_v30, %v1867_v43  ;;  %2860 = vmatprep.subr.bf16.mxu1 %v2995_v17 }
 0x863   : > { %v3394_v56 = vadd.f32 %v1893_v45, %v1868_v46  ;;  %v1912_v16 = vcombine.low %v3387_v48, %v3389_v49  ;;  %v1870_v13 = vadd.f32 %v1858_v50, %v3181_v15  ;;  %v3401_v14 = vadd.f32 %v1884_v25, %v1869_v55  ;;  %v2732_v46 = vld [vmem:[%s649_s3] ss:$0 sm:$0xff] }
 0x864   : > { %v2733_v50 = vld [vmem:[%s652_s25] ss:$0 sm:$0xff]  ;;  %v2115_v55 = vcombine.high %v2732_v46, %v2732_v46 }
 0x865   : > { %v1913_v57 = vcombine.low %v3392_v12, %v3394_v56  ;;  %v3403_v58 = vadd.f32 %v1892_v31, %v1870_v13  ;;  %v1920_v59 = vrot.slane %v1912_v16, %v3169_v11  ;;  %2861 = vmatpush3.bf16.msra.mxu1 %v2929_v35  ;;  %v2147_v16 = vcombine.high %v2733_v50, %v2733_v50  ;;  %v2933_v35 = vld [vmem:[%s3145_s19 + $0x20] sm:$0xff]  }
 0x866   : > { %v2122_v13 = vrot.slane %v2732_v46, %v3169_v11 }
 0x867   : > { %v1927_v18 = vrot.slane %v1913_v57, %v3169_v11  ;;  %v1929_v60 = vcombine.low %v3401_v14, %v3403_v58  ;;  %v2129_v57 = vrot.slane %v2115_v55, %v3169_v11 }
 0x869   : > { %v1928_v63 = vcombine.low %v1920_v59, %v1927_v18  ;;  %v1936_v0 = vrot.slane %v1929_v60, %v3169_v11  ;;  %v2154_v59 = vrot.slane %v2733_v50, %v3169_v11  ;;  %v2161_v18 = vrot.slane %v2147_v16, %v3169_v11 }
 0x86b   : > { %v1939_v1 = vsel %vm756_vm1, %v1928_v63, 0.0  ;;  %v1942_v15 = vsel %vm760_vm2, %v1936_v0, 0.0  ;;  %v2130_v0 = vcombine.high %v2122_v13, %v2122_v13 }
 0x86c   : > { %1940 = vadd.xlane.f32.xlu1 %v1939_v1  ;;  %1943 = vadd.xlane.f32.xlu0 %v1942_v15 }
 0x8f5   : > { %v1941_v2 = vpop.xlane.xlu1 %1940  ;;  %v1944_v51 = vpop.xlane.xlu0 %1943 }
 0x8f6   : > { %v1945_v3 = vmul.f32 0.03125, %v1941_v2  ;;  %v1946_v52 = vmul.f32 0.03125, %v1944_v51  ;;  %v2131_v2 = vcombine.high %v2129_v57, %v2129_v57 }
 0x8f8   : > { %v1955_v53 = vrot.slane %v1945_v3, %v3202_v39  ;;  %v1962_v54 = vrot.slane %v1945_v3, %v3204_v40  ;;  %v1969_v4 = vrot.slane %v1945_v3, %v3206_v41  ;;  %v1976_v5 = vrot.slane %v1945_v3, %v3208_v42 }
 0x8f9   : > { %v1983_v6 = vrot.slane %v1946_v52, %v3202_v39  ;;  %v1990_v7 = vrot.slane %v1946_v52, %v3204_v40 }
 0x8fa   : > { %v1997_v8 = vsub.f32 %v3387_v48, %v1955_v53  ;;  %v1998_v9 = vsub.f32 %v3389_v49, %v1962_v54  ;;  %v1999_v10 = vsub.f32 %v3392_v12, %v1969_v4  ;;  %v2000_v19 = vsub.f32 %v3394_v56, %v1976_v5 }
 0x8fb   : > { %v2001_v61 = vsub.f32 %v3401_v14, %v1983_v6  ;;  %v2002_v62 = vsub.f32 %v3403_v58, %v1990_v7  ;;  %v2162_v5 = vcombine.high %v2154_v59, %v2154_v59  ;;  %v2163_v6 = vcombine.high %v2161_v18, %v2161_v18 }
 0x8fc   : > { %v2003_v20 = vmul.f32 %v1997_v8, %v1997_v8  ;;  %v2004_v21 = vmul.f32 %v1998_v9, %v1998_v9  ;;  %v2005_v22 = vmul.f32 %v1999_v10, %v1999_v10  ;;  %v2006_v23 = vmul.f32 %v2000_v19, %v2000_v19 }
 0x8fd   : > { %v2007_v24 = vmul.f32 %v2001_v61, %v2001_v61  ;;  %v2008_v25 = vmul.f32 %v2002_v62, %v2002_v62 }
 0x8fe   : > { %v2015_v26 = vcombine.low %v2003_v20, %v2004_v21  ;;  %v2016_v27 = vcombine.low %v2005_v22, %v2006_v23 }
 0x8ff   : > { %v2032_v28 = vcombine.low %v2007_v24, %v2008_v25 }
 0x900   : > { %v2023_v29 = vrot.slane %v2015_v26, %v3169_v11  ;;  %v2030_v30 = vrot.slane %v2016_v27, %v3169_v11 }
 0x901   : > { %v2039_v31 = vrot.slane %v2032_v28, %v3169_v11 }
 0x902   : > { %v2031_v32 = vcombine.low %v2023_v29, %v2030_v30 }
 0x903   : > { %v2045_v47 = vsel %vm760_vm2, %v2039_v31, 0.0 }
 0x904   : > { %2046 = vadd.xlane.f32.xlu1 %v2045_v47  ;;  %v2042_v33 = vsel %vm756_vm1, %v2031_v32, 0.0  ;;  %v2930_v47 = vld [vmem:[%s3145_s19 + $0x38] sm:$0xff]  }
 0x905   : > { %2043 = vadd.xlane.f32.xlu0 %v2042_v33  ;;  %2867 = vmatpush3.bf16.msra.mxu0 %v2930_v47  ;;  %v2931_v33 = vld [vmem:[%s3145_s19 + $0x30] sm:$0xff]  }
 0x906   : > { %2868 = vmatprep.subr.bf16.mxu0 %v2995_v17 }
 0x909   : > { %2869 = vmatpush3.bf16.msra.mxu0 %v2931_v33 }
 0x90a   : > { %2870 = vmatprep.subr.bf16.mxu0 %v2995_v17 }
 0x90d   : > { %2871 = vmatpush3.bf16.msra.mxu0 %v2932_v34 }
 0x90e   : > { %2872 = vmatprep.subr.bf16.mxu0 %v2995_v17 }
 0x911   : > { %2873 = vmatpush3.bf16.msra.mxu0 %v2933_v35 }
 0x912   : > { %2874 = vmatprep.subr.bf16.mxu0 %v2995_v17 }
 0x98d   : > { %v2047_v36 = vpop.xlane.xlu1 %2046 }
 0x98e   : > { %v2049_v37 = vmul.f32 0.03125, %v2047_v36  ;;  %v2044_v38 = vpop.xlane.xlu0 %2043  ;;  %v2934_v36 = vld [vmem:[%s3145_s19 + $0x18] sm:$0xff]  }
 0x98f   : > { %v2048_v43 = vmul.f32 0.03125, %v2044_v38  ;;  %2875 = vmatpush3.bf16.msra.mxu0 %v2934_v36  ;;  %v2936_v38 = vld [vmem:[%s3145_s19 + $0x8] sm:$0xff]  }
 0x990   : > { %v2051_v45 = vadd.f32 1e-05, %v2049_v37  ;;  %2876 = vmatprep.subr.bf16.mxu0 %v2995_v17  ;;  %v2935_v37 = vld [vmem:[%s3145_s19 + $0x10] sm:$0xff]  }
 0x991   : > { %v2050_v44 = vadd.f32 1e-05, %v2048_v43  ;;  %v2937_v43 = vld [vmem:[%s3145_s19] sm:$0xff]  }
 0x992   : > { %2958 = vrsqrt.f32 %v2051_v45  ;;  %v2734_v45 = vld [vmem:[%s660_s6] ss:$0 sm:$0xff] }
 0x993   : > { %2960 = vrsqrt.f32 %v2050_v44  ;;  %2877 = vmatpush3.bf16.msra.mxu0 %v2935_v37 }
 0x994   : > { %2878 = vmatprep.subr.bf16.mxu0 %v2995_v17 }
 0x997   : > { %2879 = vmatpush3.bf16.msra.mxu0 %v2936_v38 }
 0x998   : > { %2880 = vmatprep.subr.bf16.mxu0 %v2995_v17 }
 0x99b   : > { %2881 = vmatpush3.bf16.msra.mxu0 %v2937_v43 }
 0x99f   : > { %v2959_v60 = vpop.eup %2958 }
 0x9a0   : > { %v2961_v63 = vpop.eup %2960  ;;  %v2090_v1 = vrot.slane %v2959_v60, %v3202_v39  ;;  %v2097_v15 = vrot.slane %v2959_v60, %v3204_v40 }
 0x9a1   : > { %v2062_v3 = vrot.slane %v2961_v63, %v3202_v39  ;;  %v2069_v51 = vrot.slane %v2961_v63, %v3204_v40  ;;  %v2076_v52 = vrot.slane %v2961_v63, %v3206_v41  ;;  %v2083_v53 = vrot.slane %v2961_v63, %v3208_v42 }
 0x9a2   : > { %v2108_v54 = vmul.f32 %v2090_v1, %v2001_v61  ;;  %v2109_v4 = vmul.f32 %v2097_v15, %v2002_v62 }
 0x9a3   : > { %v2104_v7 = vmul.f32 %v2062_v3, %v1997_v8  ;;  %v2105_v20 = vmul.f32 %v2069_v51, %v1998_v9  ;;  %v2106_v21 = vmul.f32 %v2076_v52, %v1999_v10  ;;  %v2107_v22 = vmul.f32 %v2083_v53, %v2000_v19 }
 0x9a4   : > { %v2140_v23 = vmul.f32 %v2122_v13, %v2108_v54  ;;  %v2141_v24 = vmul.f32 %v2130_v0, %v2109_v4 }
 0x9a5   : > { %v2136_v25 = vmul.f32 %v2122_v13, %v2104_v7  ;;  %v2137_v26 = vmul.f32 %v2130_v0, %v2105_v20  ;;  %v2138_v27 = vmul.f32 %v2129_v57, %v2106_v21  ;;  %v2139_v39 = vmul.f32 %v2131_v2, %v2107_v22  ;;  %v2746_v20 = vld [vmem:[%s668_s23] ss:$0 sm:$0xff] }
 0x9a6   : > { %v2172_v40 = vadd.f32 %v2154_v59, %v2140_v23  ;;  %v2173_v28 = vadd.f32 %v2162_v5, %v2141_v24  ;;  %v2444_v21 = vcombine.high %v2746_v20, %v2746_v20  ;;  %v2451_v22 = vrot.slane %v2746_v20, %v3169_v11 }
 0x9a7   : > { %v2168_v41 = vadd.f32 %v2154_v59, %v2136_v25  ;;  %v2169_v42 = vadd.f32 %v2162_v5, %v2137_v26  ;;  %v2170_v61 = vadd.f32 %v2161_v18, %v2138_v27  ;;  %v2171_v62 = vadd.f32 %v2163_v6, %v2139_v39 }
 0x9a8   : > { %v2197_v9 = vcombine.low %v2172_v40, %v2173_v28  ;;  %v2458_v26 = vrot.slane %v2444_v21, %v3169_v11 }
 0x9a9   : > { %v2180_v29 = vcombine.low %v2168_v41, %v2169_v42  ;;  %v2181_v8 = vcombine.low %v2170_v61, %v2171_v62  ;;  %v2459_v41 = vcombine.high %v2451_v22, %v2451_v22 }
 0x9aa   : > { %v2204_v31 = vrot.slane %v2197_v9, %v3169_v11 }
 0x9ab   : > { %v2188_v10 = vrot.slane %v2180_v29, %v3169_v11  ;;  %v2195_v19 = vrot.slane %v2181_v8, %v3169_v11  ;;  %v2460_v8 = vcombine.high %v2458_v26, %v2458_v26 }
 0x9ad   : > { %v2196_v30 = vcombine.low %v2188_v10, %v2195_v19 }
 0x9af   : > { %v2207_v32 = vpack.c.bf16 %v2204_v31, %v2196_v30 }
 0x9b1   : > { %2863 = vmatmul.mubr.msk.bf16.vlgmr.msra.gmra.mxu1 %vm756_vm1, %v2207_v32 }
 0xa71   : > { %v2268_v44 = vpop.f32.mrf.mxu1 }
 0xa72   : > { %v2269_v46 = vadd.f32 %v2734_v45, %v2268_v44 }
 0xa73   : > { %v2864_v50 = vpop.f32.mrf.mxu1 }
 0xa74   : > { %v2275_v55 = vmul.f32 %v2269_v46, %v2269_v46 }
 0xa75   : > { %v2271_v16 = vpop.f32.mrf.mxu1 }
 0xa76   : > { %v2277_v13 = vmul.f32 %v2275_v55, %v2269_v46  ;;  %v2272_v57 = vadd.f32 %v2734_v45, %v2271_v16 }
 0xa77   : > { %v2865_v59 = vpop.f32.mrf.mxu1 }
 0xa78   : > { %v2279_v18 = vmul.f32 0.044715, %v2277_v13  ;;  %v2276_v60 = vmul.f32 %v2272_v57, %v2272_v57 }
 0xa7a   : > { %v2281_v63 = vadd.f32 %v2279_v18, %v2269_v46  ;;  %v2278_v0 = vmul.f32 %v2276_v60, %v2272_v57 }
 0xa7c   : > { %v2283_v17 = vmul.f32 0.7978846, %v2281_v63  ;;  %v2280_v1 = vmul.f32 0.044715, %v2278_v0 }
 0xa7e   : > { %2962 = vtanh.f32 %v2283_v17  ;;  %v2282_v15 = vadd.f32 %v2280_v1, %v2272_v57 }
 0xa80   : > { %v2284_v2 = vmul.f32 0.7978846, %v2282_v15 }
 0xa82   : > { %2964 = vtanh.f32 %v2284_v2 }
 0xa8b   : > { %v2963_v3 = vpop.eup %2962 }
 0xa8c   : > { %v2287_v51 = vadd.f32 1.0, %v2963_v3 }
 0xa8e   : > { %v2289_v53 = vmul.f32 0.5, %v2287_v51 }
 0xa8f   : > { %v2965_v52 = vpop.eup %2964 }
 0xa90   : > { %v2288_v54 = vadd.f32 1.0, %v2965_v52  ;;  %v2291_v5 = vmul.f32 %v2289_v53, %v2269_v46 }
 0xa92   : > { %v2290_v4 = vmul.f32 0.5, %v2288_v54 }
 0xa94   : > { %v2292_v6 = vmul.f32 %v2290_v4, %v2272_v57 }
 0xa96   : > { %v2293_v7 = vpack.c.bf16 %v2292_v6, %v2291_v5 }
 0xa98   : > { %2883 = vmatmul.mubr.bf16.vlgmr.msra.gmra.mxu0 %v2293_v7 }
 0xb58   : > { %v2392_v23 = vpop.f32.mrf.mxu0 }
 0xb59   : > { %v2401_v24 = vcombine.high %v2392_v23, %v2392_v23  ;;  %v2408_v25 = vrot.slane %v2392_v23, %v3169_v11 }
 0xb5a   : > { %v2884_v27 = vpop.f32.mrf.mxu0 }
 0xb5b   : > { %v2415_v39 = vrot.slane %v2401_v24, %v3169_v11  ;;  %v2416_v40 = vcombine.high %v2408_v25, %v2408_v25  ;;  %v2432_v28 = vadd.f32 %v2408_v25, %v3387_v48 }
 0xb5c   : > { %v2395_v42 = vpop.f32.mrf.mxu0 }
 0xb5d   : > { %v2417_v61 = vcombine.high %v2415_v39, %v2415_v39  ;;  %v2433_v62 = vadd.f32 %v2416_v40, %v3389_v49  ;;  %v2434_v29 = vadd.f32 %v2415_v39, %v3392_v12  ;;  %v2424_v9 = vrot.slane %v2395_v42, %v3169_v11 }
 0xb5e   : > { %v2885_v10 = vpop.f32.mrf.mxu0  ;;  %v2465_v30 = vadd.f32 %v2451_v22, %v2432_v28 }
 0xb5f   : > { %v2435_v19 = vadd.f32 %v2417_v61, %v3394_v56  ;;  %v2466_v31 = vadd.f32 %v2459_v41, %v2433_v62  ;;  %v2467_v32 = vadd.f32 %v2458_v26, %v2434_v29  ;;  %v2425_v47 = vcombine.high %v2424_v9, %v2424_v9 }
 0xb60   : > { %v2436_v33 = vadd.f32 %v2424_v9, %v3401_v14 }
 0xb61   : > { %v2477_v48 = vcombine.low %v2465_v30, %v2466_v31  ;;  %v2468_v34 = vadd.f32 %v2460_v8, %v2435_v19  ;;  %v2437_v35 = vadd.f32 %v2425_v47, %v3403_v58  ;;  %v2491_v12 = vrot.slane %v2467_v32, %v3169_v11 }
 0xb62   : > { %v2469_v36 = vadd.f32 %v2451_v22, %v2436_v33 }
 0xb63   : > { %v2484_v49 = vrot.slane %v2477_v48, %v3169_v11  ;;  %v2470_v37 = vadd.f32 %v2459_v41, %v2437_v35 }
 0xb64   : > { %v2493_v38 = vcombine.low %v2468_v34, %v2469_v36 }
 0xb65   : > { %v2492_v43 = vcombine.low %v2484_v49, %v2491_v12  ;;  %v2507_v45 = vrot.slane %v2470_v37, %v3169_v11 }
 0xb66   : > { %v2500_v56 = vrot.slane %v2493_v38, %v3169_v11 }
 0xb67   : > { %2512 = vst.msk [vmem:[%s3525_s14] sm:$0x3f] %vm2511_vm8, %v2492_v43 }
 0xb68   : > { %v2508_v14 = vcombine.low %v2500_v56, %v2507_v45 }
 0xb6a   : > { %2513 = vst.msk [vmem:[%s3525_s14 + $0x8] sm:$0x3f] %vm2511_vm8, %v2508_v14 }
 0xb6b PF: > { %s3545_s21 = sld [smem:[#allocation3_spill]] }
 0xb6c   : > { %s3546_s28 = sld [smem:[#allocation2_spill]] }
 0xb6d   : > { %s3547_s29 = sld [smem:[#allocation4_spill]] }
 0xb71   : > { %s24_s30 = sadd.s32 1, %s3545_s21  }
 0xb72   : > { %p21_p6 = scmp.ge.s32.totalorder %s24_s30, 4  }
 0xb74   :  { %23 = sbr.rel (!%p21_p6) target bundleno = 4 (0x4), region = 146 }

// kernel: _lambda_.10
= control target key start
LH: loop header
LB: loop body
LE: loop exit
PB: predicated region body
PF: predicated region fallthrough
CT: control target
= control target key end

     0   :  { %s725_s27 = smov 0   ;;  %s778_s0 = inlined_call_operand.vmem [shape: f32[2,18,16], index: 0, kind: input, shape index: {}]   ;;  %s779_s1 = inlined_call_operand.vmem [shape: f32[1,16], index: 1, kind: input, shape index: {}]   ;;  %s780_s2 = inlined_call_operand.vmem [shape: f32[1,16], index: 2, kind: input, shape index: {}]   ;;  %s781_s3 = inlined_call_operand.vmem [shape: bf16[16,48], index: 3, kind: input, shape index: {}]   ;;  %s782_s4 = inlined_call_operand.vmem [shape: f32[1,48], index: 4, kind: input, shape index: {}]   ;;  %s783_s5 = inlined_call_operand.vmem [shape: bf16[16,32], index: 5, kind: input, shape index: {}]   ;;  %s784_s6 = inlined_call_operand.vmem [shape: f32[1,32], index: 6, kind: input, shape index: {}]   ;;  %s785_s7 = inlined_call_operand.vmem [shape: f32[2,18,48], index: 7, kind: output, shape index: {0}]   ;;  %s786_s8 = inlined_call_operand.vmem [shape: f32[2,18,32], index: 8, kind: output, shape index: {1}]  }
   0x1 LB: > { %s617_s28 = sadd.s32 4294967295, %s678_s27   ;;  %p621_p0 = scmp.ge.s32.totalorder %s678_s27, 1  ;;  %s678_s27 = sphi %s725_s27, %s19_s27  }
   0x2   : > { %p265_p1 = scmp.lt.s32.totalorder %s678_s27, 3 }
   0x4   : > { %p266_p2 = pnand %p621_p0, %p265_p1 }
   0x5   : > { %p304_p3 = scmp.lt.s32.totalorder (!%p266_p2), %s617_s28, 1 }
   0x6   : > { %269 = sbr.rel (%p266_p2) target bundleno = 535 (0x217), region = 48 }
   0xb   : > { %s788_s28 = smov (!%p304_p3, %s617_s28), 1  ;;  %vm325_vm0 = vcmask 130048   ;;  %vm332_vm1 = vcmask 123904   ;;  %v664_v21 = vld [vmem:[%s781_s3] sm:$0xff]   ;;  %vm459_vm2 = vcmask 386048   ;;  %vm527_vm3 = vcmask 254976  }
   0xc   : > { %s733_s29 = smul.u32 24, %s788_s28  ;;  %v665_v22 = vld [vmem:[%s783_s5] sm:$0xff]   ;;  %643 = vmatprep.subr.bf16.mxu0 %v664_v21  ;;  %vm456_vm4 = vcmask 392192   ;;  %vm524_vm5 = vcmask 261120  }
   0xd   : > { %649 = vmatprep.subr.bf16.mxu1 %v665_v22  ;;  %644 = vmatpush3.bf16.msra.mxu0 %v664_v21  ;;  %v625_v34 = vld [vmem:[%s779_s1] ss:$0 sm:$0xff] }
   0xe   : > { %s308_s10 = scalar_lea.vmem %s778_s0, %s733_s29  ;;  %650 = vmatpush3.bf16.msra.mxu1 %v665_v22  ;;  %v626_v40 = vld [vmem:[%s780_s2] ss:$0 sm:$0xff]  ;;  %s313_s25 = scalar_lea.vmem %s785_s7, %s733_s29 }
   0xf   : > { %v320_v0 = vld [vmem:[%s308_s10] sm:$0xff]  ;;  %v322_v1 = vld [vmem:[%s308_s10 + $0x10] sm:$0x3]  ;;  %v321_v2 = vld [vmem:[%s308_s10 + $0x8] sm:$0xff]  ;;  %s318_s30 = scalar_lea.vmem %s786_s8, %s733_s29 }
  0x10   : > { %v326_v3 = vsel %vm325_vm0, %v320_v0, 0.0  ;;  %v333_v4 = vsel %vm332_vm1, %v322_v1, 0.0  ;;  %v329_v5 = vsel %vm325_vm0, %v321_v2, 0.0  ;;  %v627_v48 = vld [vmem:[%s782_s4] ss:$0 sm:$0xff] }
  0x11   : > { %327 = vadd.xlane.f32.xlu0 %v326_v3  ;;  %334 = vadd.xlane.f32.xlu1 %v333_v4  ;;  %v631_v49 = vld [vmem:[%s784_s6] ss:$0 sm:$0xff] }
  0x15   : > { %330 = vadd.xlane.f32.xlu0 %v329_v5 }
  0x9a   : > { %v328_v6 = vpop.xlane.xlu0 %327  ;;  %v335_v7 = vpop.xlane.xlu1 %334 }
  0x9b   : > { %v337_v8 = vmul.f32 0.0625, %v328_v6  ;;  %v339_v9 = vmul.f32 0.0625, %v335_v7 }
  0x9d   : > { %v340_v10 = vsub.f32 %v320_v0, %v337_v8  ;;  %v342_v11 = vsub.f32 %v322_v1, %v339_v9 }
  0x9e   : > { %v331_v12 = vpop.xlane.xlu0 %330 }
  0x9f   : > { %v338_v13 = vmul.f32 0.0625, %v331_v12  ;;  %v343_v14 = vmul.f32 %v340_v10, %v340_v10  ;;  %v345_v15 = vmul.f32 %v342_v11, %v342_v11 }
  0xa1   : > { %v341_v16 = vsub.f32 %v321_v2, %v338_v13  ;;  %v346_v17 = vsel %vm325_vm0, %v343_v14, 0.0  ;;  %v352_v18 = vsel %vm332_vm1, %v345_v15, 0.0 }
  0xa2   : > { %347 = vadd.xlane.f32.xlu1 %v346_v17 }
  0xa3   : > { %v344_v19 = vmul.f32 %v341_v16, %v341_v16 }
  0xa5   : > { %v349_v20 = vsel %vm325_vm0, %v344_v19, 0.0 }
  0xa6   : > { %353 = vadd.xlane.f32.xlu1 %v352_v18  ;;  %350 = vadd.xlane.f32.xlu0 %v349_v20 }
 0x12b   : > { %v348_v23 = vpop.xlane.xlu1 %347 }
 0x12c   : > { %v355_v24 = vmul.f32 0.0625, %v348_v23 }
 0x12e   : > { %v358_v25 = vadd.f32 1e-05, %v355_v24 }
 0x12f   : > { %v354_v26 = vpop.xlane.xlu1 %353  ;;  %v351_v27 = vpop.xlane.xlu0 %350 }
 0x130   : > { %666 = vrsqrt.f32 %v358_v25  ;;  %v357_v28 = vmul.f32 0.0625, %v354_v26  ;;  %v356_v29 = vmul.f32 0.0625, %v351_v27 }
 0x132   : > { %v360_v30 = vadd.f32 1e-05, %v357_v28  ;;  %v359_v31 = vadd.f32 1e-05, %v356_v29 }
 0x134   : > { %668 = vrsqrt.f32 %v360_v30 }
 0x135   : > { %670 = vrsqrt.f32 %v359_v31 }
 0x13d   : > { %v667_v32 = vpop.eup %666 }
 0x13e   : > { %v364_v33 = vmul.f32 %v667_v32, %v340_v10 }
 0x140   : > { %v373_v39 = vmul.f32 %v625_v34, %v364_v33 }
 0x141   : > { %v669_v35 = vpop.eup %668 }
 0x142   : > { %v671_v36 = vpop.eup %670  ;;  %v366_v37 = vmul.f32 %v669_v35, %v342_v11  ;;  %v382_v44 = vadd.f32 %v626_v40, %v373_v39 }
 0x143   : > { %v365_v38 = vmul.f32 %v671_v36, %v341_v16 }
 0x144   : > { %v375_v41 = vmul.f32 %v625_v34, %v366_v37 }
 0x145   : > { %v374_v42 = vmul.f32 %v625_v34, %v365_v38 }
 0x146   : > { %v384_v43 = vadd.f32 %v626_v40, %v375_v41 }
 0x147   : > { %v383_v45 = vadd.f32 %v626_v40, %v374_v42 }
 0x148   : > { %v386_v46 = vpack.c.bf16 %v384_v43, %v384_v43 }
 0x149   : > { %v385_v47 = vpack.c.bf16 %v383_v45, %v382_v44 }
 0x14b   : > { %645 = vmatprep.mubr.msk.bf16.mxu0 %vm325_vm0, %v385_v47  ;;  %651 = vmatprep.mubr.msk.bf16.mxu1 %vm325_vm0, %v385_v47 }
 0x14c   : > { %646 = vmatmul.mubr.msk.bf16.vlgmr.msra.gmra.mxu0 %vm325_vm0, %v386_v46  ;;  %652 = vmatmul.mubr.msk.bf16.vlgmr.msra.gmra.mxu1 %vm325_vm0, %v386_v46 }
 0x20c   : > { %v647_v50 = vpop.f32.mrf.mxu0  ;;  %v653_v51 = vpop.f32.mrf.mxu1 }
 0x20d   : > { %v451_v52 = vadd.f32 %v647_v50, %v627_v48  ;;  %v519_v53 = vadd.f32 %v653_v51, %v631_v49 }
 0x20e   : > { %v442_v54 = vpop.f32.mrf.mxu0  ;;  %v510_v55 = vpop.f32.mrf.mxu1 }
 0x20f   : > { %460 = vst.msk [vmem:[%s313_s25 + $0x10] sm:$0x3] %vm459_vm2, %v451_v52  ;;  %v443_v56 = vadd.f32 %v627_v48, %v442_v54  ;;  %v511_v57 = vadd.f32 %v631_v49, %v510_v55 }
 0x210   : > { %528 = vst.msk [vmem:[%s318_s30 + $0x10] sm:$0x3] %vm527_vm3, %v519_v53  ;;  %v648_v58 = vpop.f32.mrf.mxu0  ;;  %v654_v59 = vpop.f32.mrf.mxu1 }
 0x211   : > { %457 = vst.msk [vmem:[%s313_s25] sm:$0xff] %vm456_vm4, %v443_v56 }
 0x212   : > { %525 = vst.msk [vmem:[%s318_s30] sm:$0xff] %vm524_vm5, %v511_v57  ;;  %v445_v60 = vpop.f32.mrf.mxu0  ;;  %v513_v61 = vpop.f32.mrf.mxu1 }
 0x213   : > { %v446_v62 = vadd.f32 %v627_v48, %v445_v60  ;;  %v514_v63 = vadd.f32 %v631_v49, %v513_v61 }
 0x215   : > { %458 = vst.msk [vmem:[%s313_s25 + $0x8] sm:$0xff] %vm456_vm4, %v446_v62 }
 0x216   : > { %526 = vst.msk [vmem:[%s318_s30 + $0x8] sm:$0xff] %vm524_vm5, %v514_v63 }
 0x217 PF: > { %s19_s27 = sadd.s32 1, %s678_s27  }
 0x218   : > { %p16_p4 = scmp.ge.s32.totalorder %s19_s27, 4  }
 0x21a   :  { %18 = sbr.rel (!%p16_p4) target bundleno = 1 (0x1), region = 90 }

// kernel: _lambda_.11
= control target key start
LH: loop header
LB: loop body
LE: loop exit
PB: predicated region body
PF: predicated region fallthrough
CT: control target
= control target key end

     0   :  { %8 = vsyncpa [#allocation5], 0  ;;  %s461_s12 = smov 0   ;;  %s499_s0 = inlined_call_operand.vmem [shape: f32[2,16,48], index: 0, kind: input, shape index: {}]   ;;  %s500_s1 = inlined_call_operand.vmem [shape: f32[2,16,48], index: 1, kind: input, shape index: {}]   ;;  %s501_s2 = inlined_call_operand.vmem [shape: f32[2,1,16], index: 2, kind: input, shape index: {}]   ;;  %s502_s3 = inlined_call_operand.hbm [shape: f32[1,1], index: 3, kind: output, shape index: {}]  }
   0x1 LB: > { %s467_s13 = sadd.s32 4294967295, %s436_s12   ;;  %p364_p0 = scmp.ge.s32.totalorder %s436_s12, 1  ;;  %s436_s12 = sphi %s461_s12, %s14_s12  }
   0x2   : > { %p151_p1 = scmp.lt.s32.totalorder %s436_s12, 3 }
   0x4   : > { %p152_p2 = pnand %p364_p0, %p151_p1 }
   0x5   : > { %p178_p3 = scmp.lt.s32.totalorder (!%p152_p2), %s467_s13, 1  ;;  %p369_p4 = scmp.ne.s32.totalorder (!%p152_p2), %s467_s13, 0 }
   0x6   : > { %155 = sbr.rel (%p152_p2) target bundleno = 547 (0x223), region = 32 }
   0xb   : > { %s179_s14 = scalar_select %p178_p3, %s467_s13, 1 }
   0xc   : > { %194 = sbr.rel (%p369_p4) target bundleno = 19 (0x13), region = 36 }
   0xd   : > { %s375_s15 = sshll.u32 %s179_s14, 4  ;;  %s190_s18 = scalar_lea.vmem %s501_s2, %s179_s14 }
   0xe   : > { %s182_s21 = scalar_lea.vmem %s499_s0, %s375_s15  ;;  %s187_s24 = scalar_lea.vmem %s500_s1, %s375_s15 }
  0x11   : > { %vm195_vm0 = vcmask 0   ;;  %v438_v0 = vmov 0.0  }
  0x12   : > { %196 = vst.msk [vmem:[#allocation2] sm:$0x1] %vm195_vm0, %v438_v0  ;;  %197 = vst.msk [vmem:[#allocation3] sm:$0x1] %vm195_vm0, %v438_v0 }
  0x13 PF: > { %v198_v1 = vld [vmem:[%s182_s21] sm:$0xff]  ;;  %v199_v3 = vld [vmem:[%s182_s21 + $0x8] sm:$0xff]  ;;  %v219_v4 = vlaneseq  ;;  %vm206_vm1 = vcmask 392192   ;;  %v439_v16 = vmov 0   ;;  %vm253_vm2 = vcmask 130112   ;;  %p370_p5 = scmp.ne.s32.totalorder %s467_s13, 1 }
  0x14   : > { %v200_v2 = vld [vmem:[%s187_s24] sm:$0xff]  ;;  %v201_v6 = vld [vmem:[%s187_s24 + $0x8] sm:$0xff]  ;;  %398 = vset.pattern.permute.xlu0 %v439_v16  ;;  %399 = vset.pattern.permute.xlu1 %v439_v16  ;;  %vm256_vm3 = vcmask 122880   ;;  %vm269_vm4 = vcmask 0  }
  0x15   : > { %v202_v5 = vsub.f32 %v198_v1, %v200_v2  ;;  %v203_v7 = vsub.f32 %v199_v3, %v201_v6  ;;  %v220_v8 = vshrl.u32 %v219_v4, 7  ;;  %v216_v10 = vld [vmem:[%s190_s18] sm:$0x1]  ;;  %v243_v25 = vand.u32 127, %v219_v4 }
  0x16   : > { %v272_v35 = vsel %vm256_vm3, %v216_v10, 0.0 }
  0x17   : > { %v204_v9 = vmul.f32 %v202_v5, %v202_v5  ;;  %v205_v11 = vmul.f32 %v203_v7, %v203_v7  ;;  %v221_v12 = vsub.s32 0, %v220_v8  ;;  %v248_v26 = vadd.s32 4294967288, %v243_v25 }
  0x18   : > { %v246_v27 = vsub.s32 %v243_v25, %v220_v8 }
  0x19   : > { %v207_v13 = vsel %vm206_vm1, %v204_v9, 0.0  ;;  %v222_v14 = vrot.slane %v216_v10, %v221_v12  ;;  %v210_v15 = vsel %vm206_vm1, %v205_v11, 0.0  ;;  %v251_v28 = vsub.s32 %v248_v26, %v220_v8  ;;  %v217_v50 = vld [vmem:[#allocation2] sm:$0x1]  ;;  %v271_v53 = vld [vmem:[#allocation3] sm:$0x1] }
  0x1a   : > { %208 = vadd.xlane.f32.xlu0 %v207_v13 }
  0x1b   : > { %224 = vbcast.lane.b32.xlu1 %v222_v14, 256 }
  0x1e   : > { %211 = vadd.xlane.f32.xlu0 %v210_v15 }
  0x1f   : > { %228 = vbcast.lane.b32.xlu1 %v222_v14, 264 }
  0x8d   : > { %v225_v17 = vpop.permute.xlu1 %224 }
  0x91   : > { %v229_v22 = vpop.permute.xlu1 %228 }
  0xa3   : > { %v209_v18 = vpop.xlane.xlu0 %208 }
  0xa4   : > { %v214_v19 = vmul.f32 0.020833334, %v209_v18 }
  0xa6   : > { %v232_v20 = vmul.f32 %v225_v17, %v214_v19 }
  0xa7   : > { %v212_v21 = vpop.xlane.xlu0 %211 }
  0xa8   : > { %v215_v23 = vmul.f32 0.020833334, %v212_v21  ;;  %237 = vperm.xlu0 %398, %v232_v20  }
  0xaa   : > { %v233_v24 = vmul.f32 %v229_v22, %v215_v23 }
  0xac   : > { %240 = vperm.xlu1 %399, %v233_v24  }
 0x123   : > { %v238_v29 = vpop.permute.xlu0 %237 }
 0x124   : > { %v247_v31 = vrot.slane %v238_v29, %v246_v27 }
 0x127   : > { %v241_v30 = vpop.permute.xlu1 %240 }
 0x128   : > { %v252_v32 = vrot.slane %v241_v30, %v251_v28 }
 0x12a   : > { %v254_v33 = vsel %vm253_vm2, %v252_v32, %v247_v31 }
 0x12b   : > { %v257_v34 = vsel %vm256_vm3, %v254_v33, 0.0 }
 0x12c   : > { %258 = vadd.xlane.f32.xlu1 %v257_v34 }
 0x130   : > { %273 = vadd.xlane.f32.xlu1 %v272_v35 }
 0x1b5   : > { %v259_v36 = vpop.xlane.xlu1 %258 }
 0x1b6   : > { %v260_v37 = vrot.slane %v259_v36, 4 }
 0x1b8   : > { %v261_v38 = vadd.f32 %v260_v37, %v259_v36 }
 0x1b9   : > { %v274_v39 = vpop.xlane.xlu1 %273 }
 0x1ba   : > { %v262_v40 = vrot.slane %v261_v38, 2  ;;  %v275_v41 = vrot.slane %v274_v39, 4 }
 0x1bc   : > { %v276_v42 = vadd.f32 %v275_v41, %v274_v39  ;;  %v263_v43 = vadd.f32 %v262_v40, %v261_v38 }
 0x1be   : > { %v277_v44 = vrot.slane %v276_v42, 2  ;;  %v264_v45 = vrot.slane %v263_v43, 1 }
 0x1c0   : > { %v278_v46 = vadd.f32 %v277_v44, %v276_v42  ;;  %v265_v47 = vadd.f32 %v264_v45, %v263_v43 }
 0x1c2   : > { %377 = vpush %v265_v47  ;;  %v279_v48 = vrot.slane %v278_v46, 1 }
 0x1c4   : > { %v280_v49 = vadd.f32 %v279_v48, %v278_v46 }
 0x1c6   : > { %379 = vpush %v280_v49 }
 0x1f3   : > { %s378_s25 = spop %377 }
 0x1f4   : > { %v267_v51 = vstv %s378_s25 }
 0x1f5   : > { %v268_v52 = vadd.f32 %v267_v51, %v217_v50 }
 0x1f7   : > { %270 = vst.msk [vmem:[#allocation2] sm:$0x1] %vm269_vm4, %v268_v52  ;;  %s380_s26 = spop %379  ;;  %288 = sbr.rel (%p370_p5) target bundleno = 532 (0x214), region = 40 }
 0x1f8   : > { %v282_v54 = vstv %s380_s26 }
 0x1f9   : > { %v283_v55 = vadd.f32 %v282_v54, %v271_v53 }
 0x1fb   : > { %284 = vst.msk [vmem:[#allocation3] sm:$0x1] %vm269_vm4, %v283_v55 }
 0x1fe   : > { %v289_v57 = vld [vmem:[#allocation2] sm:$0x1] }
 0x202   : > { %v290_v56 = vld [vmem:[#allocation3] sm:$0x1] }
 0x203   : > { %400 = vrcp.f32 %v290_v56 }
 0x210   : > { %v401_v58 = vpop.eup %400 }
 0x211   : > { %v292_v59 = vmul.f32 %v401_v58, %v289_v57 }
 0x213   : > { %293 = vst.msk [vmem:[#allocation4] sm:$0x1] %vm269_vm4, %v292_v59 }
 0x214 PF: > { %p385_p6 = scmp.eq.s32.totalorder %s467_s13, 1  ;;  %s440_s27 = smov [#allocation4]  }
 0x215   : > { %s301_s28 = sshll.u32 %s440_s27, 4  ;;  %s302_s28 = int_to_ptr.vmem [resolvable:$true] %s301_s28 }
 0x216   : > { %s402_s29 = scalar_lea.vmem %s302_s28, 16  ;;  %s408_s30 = scalar_lea.vmem %s302_s28, 32 }
 0x217   : > { %p403_p7 = scmp.ne.s32.totalorder %s302_s28, %s402_s29  ;;  %p409_p10 = scmp.lt.s32.totalorder %s302_s28, %s302_s28 }
 0x218   : > { %p410_p11 = scmp.lt.s32.totalorder %s408_s30, %s402_s29 }
 0x219   : > { %p404_p8 = pnand %p403_p7, %p385_p6 }
 0x21a   : > { %p411_p12 = por %p410_p11, %p409_p10 }
 0x21b   : > { %p405_p9 = pneg %p404_p8 }
 0x21d   : > { %p412_p13 = pnand %p411_p12, %p405_p9 }
 0x21f   : > { %415 = shalt.err (!%p412_p13)
}
 0x220   : > { %382 = dma.vmem_to_hbm [thread:$0]  (%p385_p6), %s302_s28, 16, %s502_s3, [#allocation5]  }
 0x221   : > { %431 = dma.done.wait (%p385_p6), [#allocation5], 16  }
 0x222   : > { %433 = vsyncadd (%p385_p6), [#allocation5], 4294967280 }
 0x223 PF: > { %s14_s12 = sadd.s32 1, %s436_s12  }
 0x224   : > { %p11_p0 = scmp.ge.s32.totalorder %s14_s12, 4  }
 0x226   :  { %13 = sbr.rel (!%p11_p0) target bundleno = 1 (0x1), region = 73 }
 0x22b   :  { %314 = vsyncpa [#allocation5], 1 }
 0x22c   :  { %316 = vsyncpa [#allocation5 + $0x1], 1 }

// kernel: _lambda_.9
= control target key start
LH: loop header
LB: loop body
LE: loop exit
PB: predicated region body
PF: predicated region fallthrough
CT: control target
= control target key end

     0   :  { %v91_v0 = vlaneseq  ;;  %vm67_vm0 = vcmask 130048   ;;  %v4187_v3 = vmov 1983009808   ;;  %vm70_vm1 = vcmask 123904   ;;  %s4195_s24 = smov 96   ;;  %s4196_s25 = smov 104   ;;  %s5434_s0 = inlined_call_operand.vmem [shape: f32[2,18,16], index: 0, kind: input, shape index: {}]   ;;  %s5435_s1 = inlined_call_operand.vmem [shape: f32[1,18,16], index: 1, kind: input, shape index: {}]   ;;  %s5436_s14 = inlined_call_operand.vmem [shape: f32[2,18,16], index: 14, kind: output, shape index: {}]   ;;  %s5437_s4 = inlined_call_operand.vmem [shape: bf16[1,16,48], index: 4, kind: input, shape index: {}]   ;;  %s5438_s2 = inlined_call_operand.vmem [shape: f32[1,1,16], index: 2, kind: input, shape index: {}]   ;;  %s5439_s3 = inlined_call_operand.vmem [shape: f32[1,1,16], index: 3, kind: input, shape index: {}]   ;;  %s5440_s5 = inlined_call_operand.vmem [shape: f32[1,1,48], index: 5, kind: input, shape index: {}]   ;;  %s5441_s6 = inlined_call_operand.vmem [shape: bf16[1,16,16], index: 6, kind: input, shape index: {}]   ;;  %s5442_s7 = inlined_call_operand.vmem [shape: f32[1,1,16], index: 7, kind: input, shape index: {}]   ;;  %s5443_s10 = inlined_call_operand.vmem [shape: bf16[1,16,64], index: 10, kind: input, shape index: {}]   ;;  %s5444_s8 = inlined_call_operand.vmem [shape: f32[1,1,16], index: 8, kind: input, shape index: {}]   ;;  %s5445_s9 = inlined_call_operand.vmem [shape: f32[1,1,16], index: 9, kind: input, shape index: {}]   ;;  %s5446_s12 = inlined_call_operand.vmem [shape: bf16[1,64,16], index: 12, kind: input, shape index: {}]   ;;  %s5447_s11 = inlined_call_operand.vmem [shape: f32[1,1,64], index: 11, kind: input, shape index: {}]   ;;  %s5448_s13 = inlined_call_operand.vmem [shape: f32[1,1,16], index: 13, kind: input, shape index: {}]  }
   0x1   :  { %v52_v1 = vld [vmem:[%s5434_s0] sm:$0xff]  ;;  %v89_v4 = vunpack.c.l.s4 %v4187_v3  ;;  %v54_v5 = vld [vmem:[%s5434_s0 + $0x10] sm:$0x3]  ;;  %v55_v7 = vld [vmem:[%s5434_s0 + $0x18] sm:$0xff]  ;;  %vm283_vm2 = vcmask 125952   ;;  %vm4193_vm3 = vmmov 0  }
   0x2   :  { %v58_v2 = vld [vmem:[%s5435_s1] sm:$0xff]  ;;  %v60_v8 = vld [vmem:[%s5435_s1 + $0x10] sm:$0x3]  ;;  %v53_v9 = vld [vmem:[%s5434_s0 + $0x8] sm:$0xff]  ;;  %v4292_v10 = vshrl.u32 %v91_v0, 7  ;;  %vm1225_vm4 = vcmask 64512  }
   0x3   :  { %v61_v6 = vadd.f32 %v58_v2, %v52_v1  ;;  %v63_v11 = vadd.f32 %v60_v8, %v54_v5  ;;  %v64_v12 = vadd.f32 %v58_v2, %v55_v7  ;;  %v59_v13 = vld [vmem:[%s5435_s1 + $0x8] sm:$0xff]  ;;  %v56_v14 = vld [vmem:[%s5434_s0 + $0x20] sm:$0xff]  ;;  %v90_v16 = vunpack.c.0.s8 %v89_v4  ;;  %s4197_s26 = smov 120   ;;  %s4198_s27 = smov 88  }
   0x4   :  { %v57_v15 = vld [vmem:[%s5434_s0 + $0x28] sm:$0x3]  ;;  %v62_v17 = vadd.f32 %v59_v13, %v53_v9  ;;  %v65_v18 = vadd.f32 %v59_v13, %v56_v14  ;;  %v4189_v13 = vmov 842150450   ;;  %vm1358_vm5 = vcmask 146432  }
   0x5   :  { %68 = vst.msk [vmem:[%s5436_s14] sm:$0xff] %vm67_vm0, %v61_v6  ;;  %v66_v19 = vadd.f32 %v60_v8, %v57_v15  ;;  %72 = vst.msk [vmem:[%s5436_s14 + $0x18] sm:$0xff] %vm67_vm0, %v64_v12  ;;  %v4328_v20 = vsub.s32 %v90_v16, %v4292_v10  ;;  %v306_v14 = vunpack.c.l.s4 %v4189_v13  ;;  %v4190_v15 = vmov 1414812756  }
   0x6   :  { %71 = vst.msk [vmem:[%s5436_s14 + $0x10] sm:$0x3] %vm70_vm1, %v63_v11  ;;  %v4188_v11 = vmov 269488144   ;;  %v313_v16 = vunpack.c.l.s4 %v4190_v15  ;;  %vm1365_vm6 = vcmask 140288   ;;  %vm1441_vm7 = vcmask 1040384  }
   0x7   :  { %69 = vst.msk [vmem:[%s5436_s14 + $0x8] sm:$0xff] %vm67_vm0, %v62_v17  ;;  %73 = vst.msk [vmem:[%s5436_s14 + $0x20] sm:$0xff] %vm67_vm0, %v65_v18  ;;  %v299_v12 = vunpack.c.l.s4 %v4188_v11  ;;  %v4191_v17 = vmov 1987475062   ;;  %vm2244_vm8 = vcmask 1043456   ;;  %vm3486_vm9 = vcmask 523264  }
   0x8   :  { %74 = vst.msk [vmem:[%s5436_s14 + $0x28] sm:$0x3] %vm70_vm1, %v66_v19  ;;  %v320_v18 = vunpack.c.l.s4 %v4191_v17 }
   0x9   :  { %v300_v19 = vunpack.c.0.s8 %v299_v12 }
   0xc   :  { %v75_v21 = vld [vmem:[%s5436_s14] sm:$0xff]  ;;  %v78_v25 = vld [vmem:[%s5436_s14 + $0x18] sm:$0xff] }
   0xd   :  { %v87_v22 = vcombine.high %v75_v21, %v75_v21  ;;  %v4334_v23 = vrot.slane %v75_v21, %v4328_v20  ;;  %v4339_v24 = vld.sshfl [vmem:[%s5436_s14 + $0x10] sm:$0x3 pattern:$0x76325410]  ;;  %v128_v26 = vcombine.high %v78_v25, %v78_v25  ;;  %v4345_v27 = vrot.slane %v78_v25, %v4328_v20 }
   0xe   :  { %v76_v28 = vld [vmem:[%s5436_s14 + $0x8] sm:$0xff]  ;;  %v79_v29 = vld [vmem:[%s5436_s14 + $0x20] sm:$0xff]  ;;  %v307_v21 = vunpack.c.0.s8 %v306_v14  ;;  %v321_v25 = vunpack.c.0.s8 %v320_v18 }
   0xf   :  { %v4354_v30 = vrot.slane %v87_v22, %v4328_v20  ;;  %v4358_v31 = vcombine.high %v4334_v23, %v4334_v23  ;;  %v104_v32 = vcombine.high %v76_v28, %v76_v28  ;;  %v4361_v33 = vrot.slane %v76_v28, %v4328_v20  ;;  %v4421_v57 = vld.sshfl [vmem:[%s5436_s14 + $0x28] sm:$0x3 pattern:$0x76325410] }
  0x10   :  { %v4364_v34 = vrot.slane %v128_v26, %v4328_v20  ;;  %v4368_v35 = vcombine.high %v4345_v27, %v4345_v27  ;;  %v223_v36 = vcombine.low %v4339_v24, %v4345_v27  ;;  %v145_v37 = vcombine.high %v79_v29, %v79_v29 }
  0x11   :  { %v4374_v38 = vcombine.high %v4354_v30, %v4354_v30  ;;  %v189_v39 = vcombine.low %v4334_v23, %v4358_v31  ;;  %v4379_v40 = vrot.slane %v104_v32, %v4328_v20  ;;  %v4383_v41 = vcombine.high %v4361_v33, %v4361_v33 }
  0x12   :  { %v224_v42 = vcombine.low %v4368_v35, %v4364_v34  ;;  %v231_v43 = vrot.slane %v223_v36, %v4328_v20  ;;  %v4390_v44 = vcombine.high %v4364_v34, %v4364_v34  ;;  %v4393_v45 = vrot.slane %v79_v29, %v4328_v20 }
  0x13   :  { %v190_v46 = vcombine.low %v4354_v30, %v4374_v38  ;;  %v197_v47 = vrot.slane %v189_v39, %v4328_v20  ;;  %v4400_v48 = vcombine.high %v4379_v40, %v4379_v40  ;;  %v206_v49 = vcombine.low %v4361_v33, %v4383_v41 }
  0x14   :  { %5458 = vst [vmem:[#allocation2_spill] sm:$0xff] %v4390_v44  ;;  %5459 = vst [vmem:[#allocation3_spill] sm:$0xff] %v4393_v45  ;;  %v238_v50 = vrot.slane %v224_v42, %v4328_v20  ;;  %v4406_v51 = vrot.slane %v145_v37, %v4328_v20  ;;  %v4410_v52 = vcombine.high %v4393_v45, %v4393_v45  ;;  %v314_v22 = vunpack.c.0.s8 %v313_v16 }
  0x15   :  { %v240_v53 = vcombine.low %v4390_v44, %v4393_v45  ;;  %v204_v54 = vrot.slane %v190_v46, %v4328_v20  ;;  %v207_v55 = vcombine.low %v4379_v40, %v4400_v48  ;;  %v214_v56 = vrot.slane %v206_v49, %v4328_v20 }
  0x16   :  { %5460 = vst [vmem:[#allocation4_spill] sm:$0xff] %v4406_v51  ;;  %5461 = vst [vmem:[#allocation5_spill] sm:$0xff] %v4410_v52  ;;  %v239_v58 = vcombine.low %v231_v43, %v238_v50  ;;  %v241_v59 = vcombine.low %v4410_v52, %v4406_v51  ;;  %v4428_v61 = vcombine.high %v4406_v51, %v4406_v51 }
  0x17   :  { %v248_v60 = vrot.slane %v240_v53, %v4328_v20  ;;  %v205_v62 = vcombine.low %v197_v47, %v204_v54  ;;  %v221_v63 = vrot.slane %v207_v55, %v4328_v20  ;;  %v4441_v26 = vsub.s32 %v300_v19, %v4292_v10 }
  0x18   :  { %5462 = vst [vmem:[#allocation6_spill] sm:$0xff] %v4428_v61  ;;  %v277_v0 = vsel %vm67_vm0, %v239_v58, 0.0  ;;  %v255_v1 = vrot.slane %v241_v59, %v4328_v20  ;;  %v257_v2 = vcombine.low %v4428_v61, %v4421_v57  ;;  %v4444_v28 = vsub.s32 %v307_v21, %v4292_v10 }
  0x19   :  { %v271_v3 = vsel %vm67_vm0, %v205_v62, 0.0  ;;  %278 = vadd.xlane.f32.xlu1 %v277_v0  ;;  %v222_v4 = vcombine.low %v214_v56, %v221_v63  ;;  %v4447_v29 = vsub.s32 %v314_v22, %v4292_v10  ;;  %v4450_v32 = vsub.s32 %v321_v25, %v4292_v10 }
  0x1a   :  { %272 = vadd.xlane.f32.xlu0 %v271_v3  ;;  %v256_v5 = vcombine.low %v248_v60, %v255_v1  ;;  %v264_v7 = vrot.slane %v257_v2, %v4328_v20 }
  0x1b   :  { %v274_v6 = vsel %vm67_vm0, %v222_v4, 0.0 }
  0x1c   :  { %v280_v8 = vsel %vm67_vm0, %v256_v5, 0.0  ;;  %v284_v9 = vsel %vm283_vm2, %v264_v7, 0.0 }
  0x1d   :  { %281 = vadd.xlane.f32.xlu1 %v280_v8 }
  0x1e   :  { %275 = vadd.xlane.f32.xlu0 %v274_v6 }
  0x22   :  { %285 = vadd.xlane.f32.xlu0 %v284_v9 }
  0xa2   :  { %v279_v36 = vpop.xlane.xlu1 %278 }
  0xa3   :  { %v273_v37 = vpop.xlane.xlu0 %272  ;;  %v290_v39 = vmul.f32 0.0625, %v279_v36 }
  0xa4   :  { %v288_v42 = vmul.f32 0.0625, %v273_v37 }
  0xa5   :  { %v360_v43 = vrot.slane %v290_v39, %v4441_v26  ;;  %v367_v46 = vrot.slane %v290_v39, %v4444_v28  ;;  %v374_v47 = vrot.slane %v290_v39, %v4447_v29  ;;  %v381_v49 = vrot.slane %v290_v39, %v4450_v32 }
  0xa6   :  { %v304_v50 = vrot.slane %v288_v42, %v4441_v26  ;;  %v311_v53 = vrot.slane %v288_v42, %v4444_v28  ;;  %v318_v54 = vrot.slane %v288_v42, %v4447_v29  ;;  %v325_v10 = vrot.slane %v288_v42, %v4450_v32  ;;  %v282_v55 = vpop.xlane.xlu1 %281 }
  0xa7   :  { %v276_v56 = vpop.xlane.xlu0 %275  ;;  %v291_v58 = vmul.f32 0.0625, %v282_v55  ;;  %v4461_v59 = vsub.f32 %v4339_v24, %v360_v43  ;;  %v4464_v60 = vsub.f32 %v4345_v27, %v367_v46  ;;  %v4467_v62 = vsub.f32 %v4368_v35, %v374_v47 }
  0xa8   :  { %v289_v63 = vmul.f32 0.0625, %v276_v56  ;;  %v4470_v0 = vsub.f32 %v4334_v23, %v304_v50  ;;  %v4473_v1 = vsub.f32 %v4358_v31, %v311_v53  ;;  %v4476_v2 = vsub.f32 %v4354_v30, %v318_v54 }
  0xa9   :  { %v388_v3 = vrot.slane %v291_v58, %v4441_v26  ;;  %v395_v24 = vrot.slane %v291_v58, %v4444_v28  ;;  %v402_v4 = vrot.slane %v291_v58, %v4447_v29  ;;  %v409_v5 = vrot.slane %v291_v58, %v4450_v32 }
  0xaa   :  { %v332_v6 = vrot.slane %v289_v63, %v4441_v26  ;;  %v339_v7 = vrot.slane %v289_v63, %v4444_v28  ;;  %v346_v8 = vrot.slane %v289_v63, %v4447_v29  ;;  %v353_v9 = vrot.slane %v289_v63, %v4450_v32 }
  0xab   :  { %v286_v11 = vpop.xlane.xlu0 %285  ;;  %v4487_v12 = vsub.f32 %v4374_v38, %v325_v10  ;;  %v460_v13 = vmul.f32 %v4470_v0, %v4470_v0  ;;  %v461_v14 = vmul.f32 %v4473_v1, %v4473_v1  ;;  %v462_v15 = vmul.f32 %v4476_v2, %v4476_v2 }
  0xac   :  { %v292_v16 = vmul.f32 0.0625, %v286_v11  ;;  %v4496_v17 = vsub.f32 %v4364_v34, %v381_v49  ;;  %v468_v18 = vmul.f32 %v4461_v59, %v4461_v59  ;;  %v469_v19 = vmul.f32 %v4464_v60, %v4464_v60 }
  0xad   :  { %v463_v21 = vmul.f32 %v4487_v12, %v4487_v12  ;;  %v496_v22 = vcombine.low %v460_v13, %v461_v14  ;;  %v470_v25 = vmul.f32 %v4467_v62, %v4467_v62  ;;  %v4507_v36 = vsub.f32 %v4361_v33, %v332_v6 }
  0xae   :  { %v416_v37 = vrot.slane %v292_v16, %v4441_v26  ;;  %v423_v39 = vrot.slane %v292_v16, %v4444_v28  ;;  %v471_v42 = vmul.f32 %v4496_v17, %v4496_v17  ;;  %v530_v43 = vcombine.low %v468_v18, %v469_v19 }
  0xaf   :  { %v497_v46 = vcombine.low %v462_v15, %v463_v21  ;;  %v504_v47 = vrot.slane %v496_v22, %v4328_v20  ;;  %v4515_v49 = vsub.f32 %v4383_v41, %v339_v7  ;;  %v4518_v50 = vsub.f32 %v4379_v40, %v346_v8 }
  0xb0   :  { %v4521_v53 = vsub.f32 %v4428_v61, %v416_v37  ;;  %v4524_v54 = vsub.f32 %v4421_v57, %v423_v39  ;;  %v531_v10 = vcombine.low %v470_v25, %v471_v42  ;;  %v538_v55 = vrot.slane %v530_v43, %v4328_v20 }
  0xb1   :  { %v511_v56 = vrot.slane %v497_v46, %v4328_v20  ;;  %v4529_v58 = vsub.f32 %v4400_v48, %v353_v9  ;;  %v464_v63 = vmul.f32 %v4507_v36, %v4507_v36  ;;  %v465_v6 = vmul.f32 %v4515_v49, %v4515_v49 }
  0xb2   :  { %v545_v7 = vrot.slane %v531_v10, %v4328_v20  ;;  %v466_v57 = vmul.f32 %v4518_v50, %v4518_v50  ;;  %v4539_v8 = vsub.f32 %v4390_v44, %v388_v3  ;;  %v4542_v11 = vsub.f32 %v4393_v45, %v395_v24 }
  0xb3   :  { %v512_v13 = vcombine.low %v504_v47, %v511_v56  ;;  %v467_v9 = vmul.f32 %v4529_v58, %v4529_v58  ;;  %v513_v14 = vcombine.low %v464_v63, %v465_v6  ;;  %v4547_v15 = vsub.f32 %v4410_v52, %v402_v4 }
  0xb4   :  { %v546_v16 = vcombine.low %v538_v55, %v545_v7  ;;  %v4550_v18 = vsub.f32 %v4406_v51, %v409_v5  ;;  %v472_v19 = vmul.f32 %v4539_v8, %v4539_v8  ;;  %v473_v3 = vmul.f32 %v4542_v11, %v4542_v11 }
  0xb5   :  { %v577_v24 = vsel %vm67_vm0, %v512_v13, 0.0  ;;  %v514_v21 = vcombine.low %v466_v57, %v467_v9  ;;  %v521_v22 = vrot.slane %v513_v14, %v4328_v20  ;;  %v474_v25 = vmul.f32 %v4547_v15, %v4547_v15  ;;  %v4101_v14 = vld [vmem:[%s5437_s4] sm:$0xff]  }
  0xb6   :  { %578 = vadd.xlane.f32.xlu1 %v577_v24  ;;  %v475_v4 = vmul.f32 %v4550_v18, %v4550_v18  ;;  %v547_v5 = vcombine.low %v472_v19, %v473_v3  ;;  %v476_v37 = vmul.f32 %v4521_v53, %v4521_v53  ;;  %v583_v39 = vsel %vm67_vm0, %v546_v16, 0.0 }
  0xb7   :  { %v528_v42 = vrot.slane %v514_v21, %v4328_v20  ;;  %v477_v43 = vmul.f32 %v4524_v54, %v4524_v54  ;;  %v5449_v9 = vmov 0.0  }
  0xb8   :  { %v548_v46 = vcombine.low %v474_v25, %v475_v4  ;;  %v555_v47 = vrot.slane %v547_v5, %v4328_v20  ;;  %3933 = vmatprep.subr.bf16.mxu0 %v5449_v9  ;;  %3935 = vmatprep.mubr.msk.bf16.mxu0 %vm4193_vm3, %v5449_v9  ;;  %v3833_v5 = vld [vmem:[%s5438_s2] ss:$0 sm:$0xff] }
  0xb9   :  { %v529_v10 = vcombine.low %v521_v22, %v528_v42  ;;  %v564_v55 = vcombine.low %v476_v37, %v477_v43  ;;  %3934 = vmatpush3.bf16.msra.mxu0 %v4101_v14 }
  0xba   :  { %584 = vadd.xlane.f32.xlu1 %v583_v39  ;;  %v562_v56 = vrot.slane %v548_v46, %v4328_v20  ;;  %v779_v46 = vcombine.high %v3833_v5, %v3833_v5 }
  0xbb   :  { %v580_v63 = vsel %vm67_vm0, %v529_v10, 0.0  ;;  %v571_v6 = vrot.slane %v564_v55, %v4328_v20  ;;  %v3834_v55 = vld [vmem:[%s5439_s3] ss:$0 sm:$0xff] }
  0xbc   :  { %581 = vadd.xlane.f32.xlu0 %v580_v63  ;;  %v563_v7 = vcombine.low %v555_v47, %v562_v56  ;;  %v4587_v63 = vrot.slane %v3833_v5, %v4328_v20 }
  0xbd   :  { %v589_v57 = vsel %vm283_vm2, %v571_v6, 0.0  ;;  %v4590_v6 = vrot.slane %v779_v46, %v4328_v20 }
  0xbe   :  { %v586_v13 = vsel %vm67_vm0, %v563_v7, 0.0  ;;  %590 = vadd.xlane.f32.xlu1 %v589_v57  ;;  %v823_v7 = vcombine.high %v3834_v55, %v3834_v55 }
  0xbf   :  { %v4598_v14 = vcombine.high %v4590_v6, %v4590_v6 }
  0xc0   :  { %587 = vadd.xlane.f32.xlu0 %v586_v13  ;;  %v4594_v13 = vcombine.high %v4587_v63, %v4587_v63 }
 0x13f   :  { %v579_v16 = vpop.xlane.xlu1 %578 }
 0x140   :  { %v592_v19 = vmul.f32 0.0625, %v579_v16  ;;  %v4601_v16 = vrot.slane %v3834_v55, %v4328_v20 }
 0x142   :  { %v597_v3 = vadd.f32 1e-05, %v592_v19  ;;  %v4604_v19 = vrot.slane %v823_v7, %v4328_v20 }
 0x143   :  { %v585_v24 = vpop.xlane.xlu1 %584 }
 0x144   :  { %4107 = vrsqrt.f32 %v597_v3  ;;  %v594_v21 = vmul.f32 0.0625, %v585_v24 }
 0x145   :  { %v582_v22 = vpop.xlane.xlu0 %581 }
 0x146   :  { %v599_v25 = vadd.f32 1e-05, %v594_v21  ;;  %v593_v4 = vmul.f32 0.0625, %v582_v22 }
 0x147   :  { %v591_v37 = vpop.xlane.xlu1 %590 }
 0x148   :  { %4109 = vrsqrt.f32 %v599_v25  ;;  %v598_v39 = vadd.f32 1e-05, %v593_v4  ;;  %v596_v42 = vmul.f32 0.0625, %v591_v37 }
 0x149   :  { %v588_v43 = vpop.xlane.xlu0 %587 }
 0x14a   :  { %4111 = vrsqrt.f32 %v598_v39  ;;  %v601_v47 = vadd.f32 1e-05, %v596_v42  ;;  %v595_v10 = vmul.f32 0.0625, %v588_v43  ;;  %v4616_v42 = vcombine.high %v4601_v16, %v4601_v16 }
 0x14b   :  { %v4620_v43 = vcombine.high %v4604_v19, %v4604_v19 }
 0x14c   :  { %4113 = vrsqrt.f32 %v601_v47  ;;  %v600_v56 = vadd.f32 1e-05, %v595_v10 }
 0x14e   :  { %4115 = vrsqrt.f32 %v600_v56 }
 0x151   :  { %v4108_v57 = vpop.eup %4107 }
 0x152   :  { %v618_v3 = vrot.slane %v4108_v57, %v4441_v26  ;;  %v625_v24 = vrot.slane %v4108_v57, %v4444_v28  ;;  %v632_v21 = vrot.slane %v4108_v57, %v4447_v29  ;;  %v639_v22 = vrot.slane %v4108_v57, %v4450_v32 }
 0x154   :  { %v756_v25 = vmul.f32 %v618_v3, %v4470_v0  ;;  %v757_v4 = vmul.f32 %v625_v24, %v4473_v1  ;;  %v758_v5 = vmul.f32 %v632_v21, %v4476_v2  ;;  %v759_v37 = vmul.f32 %v639_v22, %v4487_v12 }
 0x155   :  { %v4110_v39 = vpop.eup %4109 }
 0x156   :  { %v800_v46 = vmul.f32 %v4587_v63, %v756_v25  ;;  %v801_v47 = vmul.f32 %v4594_v13, %v757_v4  ;;  %v802_v0 = vmul.f32 %v4590_v6, %v758_v5  ;;  %v803_v1 = vmul.f32 %v4598_v14, %v759_v37 }
 0x157   :  { %v4112_v2 = vpop.eup %4111  ;;  %v674_v12 = vrot.slane %v4110_v39, %v4441_v26  ;;  %v681_v10 = vrot.slane %v4110_v39, %v4444_v28  ;;  %v688_v55 = vrot.slane %v4110_v39, %v4447_v29  ;;  %v695_v56 = vrot.slane %v4110_v39, %v4450_v32 }
 0x158   :  { %v646_v7 = vrot.slane %v4112_v2, %v4441_v26  ;;  %v653_v57 = vrot.slane %v4112_v2, %v4444_v28  ;;  %v660_v3 = vrot.slane %v4112_v2, %v4447_v29  ;;  %v667_v24 = vrot.slane %v4112_v2, %v4450_v32 }
 0x159   :  { %v4634_v21 = vpop.eup %4113  ;;  %v844_v22 = vadd.f32 %v4601_v16, %v800_v46  ;;  %v845_v25 = vadd.f32 %v4616_v42, %v801_v47  ;;  %v846_v4 = vadd.f32 %v4604_v19, %v802_v0  ;;  %v847_v5 = vadd.f32 %v4620_v43, %v803_v1 }
 0x15a   :  { %v730_v37 = vrot.slane %v4634_v21, %v4441_v26  ;;  %v737_v39 = vrot.slane %v4634_v21, %v4444_v28  ;;  %v760_v9 = vmul.f32 %v646_v7, %v4507_v36  ;;  %v761_v2 = vmul.f32 %v653_v57, %v4515_v49 }
 0x15b   :  { %v4116_v51 = vpop.eup %4115  ;;  %v762_v61 = vmul.f32 %v660_v3, %v4518_v50  ;;  %v763_v46 = vmul.f32 %v667_v24, %v4529_v58  ;;  %v880_v47 = vcombine.low %v844_v22, %v845_v25  ;;  %v881_v52 = vcombine.low %v846_v4, %v847_v5 }
 0x15c   :  { %v804_v0 = vmul.f32 %v4587_v63, %v760_v9  ;;  %v805_v1 = vmul.f32 %v4594_v13, %v761_v2  ;;  %v702_v45 = vrot.slane %v4116_v51, %v4441_v26  ;;  %v709_v44 = vrot.slane %v4116_v51, %v4444_v28 }
 0x15d   :  { %v806_v21 = vmul.f32 %v4590_v6, %v762_v61  ;;  %v807_v36 = vmul.f32 %v4598_v14, %v763_v46  ;;  %v888_v49 = vrot.slane %v880_v47, %v4328_v20  ;;  %v895_v50 = vrot.slane %v881_v52, %v4328_v20 }
 0x15e   :  { %v848_v58 = vadd.f32 %v4601_v16, %v804_v0  ;;  %v849_v7 = vadd.f32 %v4616_v42, %v805_v1  ;;  %v716_v9 = vrot.slane %v4116_v51, %v4447_v29  ;;  %v723_v57 = vrot.slane %v4116_v51, %v4450_v32 }
 0x15f   :  { %v850_v3 = vadd.f32 %v4604_v19, %v806_v21  ;;  %v851_v24 = vadd.f32 %v4620_v43, %v807_v36  ;;  %v896_v22 = vcombine.low %v888_v49, %v895_v50  ;;  %v764_v61 = vmul.f32 %v674_v12, %v4461_v59 }
 0x160   :  { %v897_v25 = vcombine.low %v848_v58, %v849_v7  ;;  %v765_v4 = vmul.f32 %v681_v10, %v4464_v60  ;;  %v766_v52 = vmul.f32 %v688_v55, %v4467_v62  ;;  %v767_v5 = vmul.f32 %v695_v56, %v4496_v17 }
 0x161   :  { %v898_v2 = vcombine.low %v850_v3, %v851_v24  ;;  %v768_v46 = vmul.f32 %v702_v45, %v4539_v8  ;;  %v769_v47 = vmul.f32 %v709_v44, %v4542_v11  ;;  %v770_v51 = vmul.f32 %v716_v9, %v4547_v15 }
 0x162   :  { %v905_v0 = vrot.slane %v897_v25, %v4328_v20  ;;  %v771_v1 = vmul.f32 %v723_v57, %v4550_v18  ;;  %v808_v59 = vmul.f32 %v4587_v63, %v764_v61  ;;  %v809_v12 = vmul.f32 %v4594_v13, %v765_v4 }
 0x163   :  { %v912_v60 = vrot.slane %v898_v2, %v4328_v20  ;;  %v810_v62 = vmul.f32 %v4590_v6, %v766_v52  ;;  %v811_v17 = vmul.f32 %v4598_v14, %v767_v5  ;;  %v812_v45 = vmul.f32 %v4587_v63, %v768_v46 }
 0x164   :  { %v813_v44 = vmul.f32 %v4594_v13, %v769_v47  ;;  %v814_v8 = vmul.f32 %v4590_v6, %v770_v51  ;;  %v815_v11 = vmul.f32 %v4598_v14, %v771_v1  ;;  %v852_v15 = vadd.f32 %v4601_v16, %v808_v59 }
 0x165   :  { %v913_v18 = vcombine.low %v905_v0, %v912_v60  ;;  %v853_v10 = vadd.f32 %v4616_v42, %v809_v12  ;;  %v854_v55 = vadd.f32 %v4604_v19, %v810_v62  ;;  %v855_v56 = vadd.f32 %v4620_v43, %v811_v17 }
 0x166   :  { %v856_v21 = vadd.f32 %v4601_v16, %v812_v45  ;;  %v857_v36 = vadd.f32 %v4616_v42, %v813_v44  ;;  %v858_v49 = vadd.f32 %v4604_v19, %v814_v8  ;;  %v859_v50 = vadd.f32 %v4620_v43, %v815_v11 }
 0x167   :  { %v961_v6 = vpack.c.bf16 %v913_v18, %v896_v22  ;;  %v914_v58 = vcombine.low %v852_v15, %v853_v10  ;;  %v915_v14 = vcombine.low %v854_v55, %v855_v56  ;;  %v772_v7 = vmul.f32 %v730_v37, %v4521_v53 }
 0x168   :  { %v931_v9 = vcombine.low %v856_v21, %v857_v36  ;;  %v932_v57 = vcombine.low %v858_v49, %v859_v50  ;;  %v773_v3 = vmul.f32 %v737_v39, %v4524_v54  ;;  %v5463_v19 = vmov 0.0  }
 0x169   :  { %3936 = vmatmul.mubr.msk.bf16.vlgmr.msra.gmra.mxu0 %vm67_vm0, %v961_v6  ;;  %v922_v24 = vrot.slane %v914_v58, %v4328_v20  ;;  %v929_v61 = vrot.slane %v915_v14, %v4328_v20  ;;  %v816_v25 = vmul.f32 %v4587_v63, %v772_v7 }
 0x16a   :  { %3939 = vmatprep.mubr.msk.bf16.mxu0 %vm4193_vm3, %v5463_v19  ;;  %v939_v43 = vrot.slane %v931_v9, %v4328_v20  ;;  %v946_v22 = vrot.slane %v932_v57, %v4328_v20  ;;  %v817_v53 = vmul.f32 %v4594_v13, %v773_v3  ;;  %v3835_v13 = vld [vmem:[%s5440_s5] ss:$0 sm:$0xff]  ;;  %s4194_s5 = smov 112  }
 0x16b   :  { %v860_v37 = vadd.f32 %v4601_v16, %v816_v25  ;;  %v930_v4 = vcombine.low %v922_v24, %v929_v61 }
 0x16c   :  { %v947_v54 = vcombine.low %v939_v43, %v946_v22  ;;  %v861_v39 = vadd.f32 %v4616_v42, %v817_v53 }
 0x16e   :  { %v962_v52 = vpack.c.bf16 %v947_v54, %v930_v4  ;;  %v948_v5 = vcombine.low %v860_v37, %v861_v39 }
 0x170   :  { %v955_v63 = vrot.slane %v948_v5, %v4328_v20 }
 0x171   :  { %3940 = vmatmul.mubr.msk.bf16.gmra.mxu0 %vm67_vm0, %v962_v52 }
 0x172   :  { %3943 = vmatprep.mubr.msk.bf16.mxu0 %vm4193_vm3, %v5463_v19  ;;  %v963_v2 = vpack.c.bf16 %v955_v63, %v955_v63 }
 0x179   :  { %3944 = vmatmul.mubr.msk.bf16.gmra.mxu0 %vm67_vm0, %v963_v2 }
 0x229   :  { %v1022_v16 = vpop.f32.mrf.mxu0 }
 0x22a   :  { %v1023_v46 = vadd.f32 %v3835_v13, %v1022_v16 }
 0x22b   :  { %v3937_v42 = vpop.f32.mrf.mxu0 }
 0x22c   :  { %v1049_v47 = vcombine.high %v1023_v46, %v1023_v46  ;;  %v1056_v51 = vrot.slane %v1023_v46, %v4328_v20 }
 0x22d   :  { %v1025_v0 = vpop.f32.mrf.mxu0 }
 0x22e   :  { %v1063_v1 = vrot.slane %v1049_v47, %v4328_v20  ;;  %v1026_v59 = vadd.f32 %v3835_v13, %v1025_v0  ;;  %v1064_v12 = vcombine.high %v1056_v51, %v1056_v51 }
 0x22f   :  { %v3938_v60 = vpop.f32.mrf.mxu0 }
 0x230   :  { %v1065_v62 = vcombine.high %v1063_v1, %v1063_v1  ;;  %v1066_v17 = vcombine.high %v1026_v59, %v1026_v59  ;;  %v1073_v45 = vrot.slane %v1026_v59, %v4328_v20  ;;  %v1127_v18 = vcombine.low %v1056_v51, %v1064_v12 }
 0x231   :  { %v1030_v44 = vpop.f32.mrf.mxu0 }
 0x232   :  { %v1128_v8 = vcombine.low %v1063_v1, %v1065_v62  ;;  %v1080_v11 = vrot.slane %v1066_v17, %v4328_v20  ;;  %v1081_v15 = vcombine.high %v1073_v45, %v1073_v45  ;;  %v1031_v10 = vadd.f32 %v3835_v13, %v1030_v44 }
 0x233   :  { %v3941_v55 = vpop.f32.mrf.mxu0  ;;  %v1135_v7 = vrot.slane %v1127_v18, %v4328_v20 }
 0x234   :  { %v1082_v56 = vcombine.high %v1080_v11, %v1080_v11  ;;  %v1144_v21 = vcombine.low %v1073_v45, %v1081_v15  ;;  %v1142_v36 = vrot.slane %v1128_v8, %v4328_v20  ;;  %v1083_v49 = vcombine.high %v1031_v10, %v1031_v10 }
 0x235   :  { %v1090_v50 = vrot.slane %v1031_v10, %v4328_v20  ;;  %v1033_v6 = vpop.f32.mrf.mxu0 }
 0x236   :  { %v1145_v58 = vcombine.low %v1080_v11, %v1082_v56  ;;  %v1034_v14 = vadd.f32 %v3835_v13, %v1033_v6  ;;  %v1097_v9 = vrot.slane %v1083_v49, %v4328_v20  ;;  %v1152_v61 = vrot.slane %v1144_v21, %v4328_v20 }
 0x237   :  { %v1098_v57 = vcombine.high %v1090_v50, %v1090_v50  ;;  %v1167_v3 = vrot.slane %v1090_v50, %v4328_v20  ;;  %v3942_v24 = vpop.f32.mrf.mxu0  ;;  %v1143_v53 = vcombine.low %v1135_v7, %v1142_v36 }
 0x238   :  { %v1159_v25 = vrot.slane %v1145_v58, %v4328_v20  ;;  %v1100_v43 = vcombine.high %v1034_v14, %v1034_v14  ;;  %v1107_v22 = vrot.slane %v1034_v14, %v4328_v20  ;;  %v1099_v54 = vcombine.high %v1097_v9, %v1097_v9 }
 0x239   :  { %v4721_v37 = vpack.c.bf16 %v1167_v3, %v1167_v3  ;;  %v1038_v39 = vpop.f32.mrf.mxu0  ;;  %v1168_v2 = vcombine.low %v1098_v57, %v1097_v9 }
 0x23a   :  { %v1160_v4 = vcombine.low %v1152_v61, %v1159_v25  ;;  %v1114_v52 = vrot.slane %v1100_v43, %v4328_v20  ;;  %v1115_v5 = vcombine.high %v1107_v22, %v1107_v22  ;;  %v1039_v63 = vadd.f32 %v3835_v13, %v1038_v39 }
 0x23b   :  { %v1169_v16 = vcombine.low %v1099_v54, %v1107_v22  ;;  %1223 = vrot.lane.b32.xlu0 %v4721_v37, %s4194_s5  ;;  %v3945_v46 = vpop.f32.mrf.mxu0  ;;  %v1176_v62 = vrot.slane %v1168_v2, %v4328_v20 }
 0x23c   :  { %v4725_v42 = vpack.c.bf16 %v1160_v4, %v1143_v53  ;;  %v1185_v47 = vcombine.low %v1115_v5, %v1114_v52  ;;  %v1116_v51 = vcombine.high %v1114_v52, %v1114_v52  ;;  %v1123_v0 = vrot.slane %v1039_v63, %v4328_v20 }
 0x23d   :  { %v1041_v1 = vpop.f32.mrf.mxu0  ;;  %v1183_v59 = vrot.slane %v1169_v16, %v4328_v20 }
 0x23e   :  { %v1124_v12 = vcombine.high %v1123_v0, %v1123_v0  ;;  %v1186_v60 = vcombine.low %v1116_v51, %v1123_v0  ;;  %1221 = vrot.lane.b32.xlu1 %v4725_v42, %s4194_s5  ;;  %3951 = vmatprep.mubr.msk.bf16.mxu1 %vm1225_vm4, %v4725_v42  ;;  %v1193_v17 = vrot.slane %v1185_v47, %v4328_v20 }
 0x23f   :  { %v3946_v13 = vpop.f32.mrf.mxu0  ;;  %v1184_v8 = vcombine.low %v1176_v62, %v1183_v59 }
 0x240   :  { %v1200_v45 = vrot.slane %v1186_v60, %v4328_v20  ;;  %v1208_v44 = vrot.slane %v1124_v12, %v4328_v20 }
 0x242   :  { %v1201_v11 = vcombine.low %v1193_v17, %v1200_v45  ;;  %v4736_v15 = vpack.c.bf16 %v1208_v44, %v1208_v44 }
 0x244   :  { %v4738_v18 = vpack.c.bf16 %v1201_v11, %v1184_v8  ;;  %1290 = vrot.lane.b32.xlu1 %v4736_v15, %s4194_s5 }
 0x246   :  { %3959 = vmatprep.mubr.msk.bf16.mxu0 %vm1225_vm4, %v4738_v18 }
 0x248   :  { %1288 = vrot.lane.b32.xlu1 %v4738_v18, %s4194_s5 }
 0x2ad   :  { %v1224_v10 = vpop.permute.xlu0 %1223 }
 0x2ae   :  { %4073 = vmatprep.subr.msk.bf16.mxu1 %vm1225_vm4, %v1224_v10  ;;  %v1236_v55 = vsel %vm1225_vm4, %v1224_v10, 0 }
 0x2af   :  { %3948 = vmatpush3.bf16.xpose.msra.mxu1 %v1236_v55 }
 0x2b0   :  { %v1222_v56 = vpop.permute.xlu1 %1221 }
 0x2b1   :  { %4074 = vmatprep.subr.msk.bf16.mxu1 %vm1225_vm4, %v1222_v56  ;;  %v1233_v21 = vsel %vm1225_vm4, %v1222_v56, 0 }
 0x2b6   :  { %v1291_v36 = vpop.permute.xlu1 %1290 }
 0x2b7   :  { %3950 = vmatpush3.bf16.xpose.msra.mxu1 %v1233_v21  ;;  %v1302_v49 = vsel %vm1225_vm4, %v1291_v36, 0  ;;  %4075 = vmatprep.subr.msk.bf16.mxu0 %vm1225_vm4, %v1291_v36 }
 0x2b8   :  { %3956 = vmatpush3.bf16.xpose.msra.mxu0 %v1302_v49 }
 0x2ba   :  { %v1289_v50 = vpop.permute.xlu1 %1288 }
 0x2bb   :  { %4076 = vmatprep.subr.msk.bf16.mxu0 %vm1225_vm4, %v1289_v50  ;;  %v1299_v6 = vsel %vm1225_vm4, %v1289_v50, 0 }
 0x2be   :  { %3952 = vmatmul.mubr.msk.bf16.vlgmr.msra.gmra.mxu1 %vm1225_vm4, %v4721_v37 }
 0x2c0   :  { %3958 = vmatpush3.bf16.xpose.msra.mxu0 %v1299_v6 }
 0x2c7   :  { %3960 = vmatmul.mubr.msk.bf16.vlgmr.msra.gmra.mxu0 %vm1225_vm4, %v4736_v15 }
 0x37e   :  { %v3953_v58 = vpop.f32.mrf.mxu1 }
 0x37f   :  { %v1354_v57 = vmul.f32 0.35355338, %v3953_v58 }
 0x380   :  { %v1272_v14 = vpop.f32.mrf.mxu1 }
 0x381   :  { %v1352_v7 = vmul.f32 0.35355338, %v1272_v14  ;;  %v1366_v25 = vsel %vm1365_vm6, %v1354_v57, -inf }
 0x382   :  { %v3954_v9 = vpop.f32.mrf.mxu1 }
 0x383   :  { %v1359_v3 = vsel %vm1358_vm5, %v1352_v7, -inf }
 0x384   :  { %1360 = vmax.xlane.f32.xlu0 %v1359_v3  ;;  %v1275_v24 = vpop.f32.mrf.mxu1 }
 0x385   :  { %v1353_v61 = vmul.f32 0.35355338, %v1275_v24 }
 0x387   :  { %v1362_v43 = vsel %vm1358_vm5, %v1353_v61, -inf  ;;  %v3961_v22 = vpop.f32.mrf.mxu0 }
 0x388   :  { %1367 = vmax.xlane.f32.xlu0 %v1366_v25  ;;  %1363 = vmax.xlane.f32.xlu1 %v1362_v43  ;;  %v1357_v53 = vmul.f32 0.35355338, %v3961_v22 }
 0x389   :  { %v1338_v54 = vpop.f32.mrf.mxu0 }
 0x38a   :  { %v1355_v39 = vmul.f32 0.35355338, %v1338_v54  ;;  %v1375_v4 = vsel %vm1365_vm6, %v1357_v53, -inf }
 0x38b   :  { %v3962_v52 = vpop.f32.mrf.mxu0 }
 0x38c   :  { %1376 = vmax.xlane.f32.xlu1 %v1375_v4  ;;  %v1369_v5 = vsel %vm1358_vm5, %v1355_v39, -inf }
 0x38d   :  { %1370 = vmax.xlane.f32.xlu0 %v1369_v5  ;;  %v1341_v63 = vpop.f32.mrf.mxu0 }
 0x38e   :  { %v4761_v2 = vmul.f32 0.35355338, %v1341_v63 }
 0x390   :  { %v1372_v16 = vsel %vm1358_vm5, %v4761_v2, -inf }
 0x391   :  { %1373 = vmax.xlane.f32.xlu0 %v1372_v16 }
 0x39d   :  { %1430 = vrot.lane.b32.xlu1 %v4725_v42, %s4195_s24 }
 0x3a1   :  { %1733 = vrot.lane.b32.xlu1 %v4721_v37, %s4196_s25 }
 0x3a5   :  { %1495 = vrot.lane.b32.xlu1 %v4736_v15, %s4195_s24 }
 0x3a7   :  { %1432 = vrot.lane.b32.xlu0 %v4721_v37, %s4195_s24 }
 0x3a9   :  { %1731 = vrot.lane.b32.xlu1 %v4725_v42, %s4196_s25 }
 0x40d   :  { %v1361_v46 = vpop.xlane.xlu0 %1360 }
 0x40e   :  { %v1378_v47 = vsub.f32 %v1352_v7, %v1361_v46 }
 0x410   :  { %v1384_v12 = vmul.f32 1.442695, %v1378_v47 }
 0x411   :  { %v1368_v51 = vpop.xlane.xlu0 %1367  ;;  %v1364_v0 = vpop.xlane.xlu1 %1363 }
 0x412   :  { %v1380_v1 = vsub.f32 %v1354_v57, %v1368_v51  ;;  %v1379_v59 = vsub.f32 %v1353_v61, %v1364_v0 }
 0x414   :  { %v1388_v60 = vmul.f32 1.442695, %v1380_v1  ;;  %v1386_v13 = vmul.f32 1.442695, %v1379_v59 }
 0x415   :  { %v1377_v62 = vpop.xlane.xlu1 %1376 }
 0x416   :  { %4117 = vpow2.f32 %v1388_v60  ;;  %v1383_v17 = vsub.f32 %v1357_v53, %v1377_v62  ;;  %v1371_v45 = vpop.xlane.xlu0 %1370 }
 0x417   :  { %4119 = vpow2.f32 %v1386_v13  ;;  %v1381_v44 = vsub.f32 %v1355_v39, %v1371_v45 }
 0x418   :  { %4121 = vpow2.f32 %v1384_v12  ;;  %v1394_v8 = vmul.f32 1.442695, %v1383_v17 }
 0x419   :  { %v1390_v11 = vmul.f32 1.442695, %v1381_v44  ;;  %v1431_v10 = vpop.permute.xlu1 %1430 }
 0x41a   :  { %4123 = vpow2.f32 %v1394_v8  ;;  %v1374_v55 = vpop.xlane.xlu0 %1373 }
 0x41b   :  { %4125 = vpow2.f32 %v1390_v11  ;;  %v1382_v53 = vsub.f32 %v4761_v2, %v1374_v55 }
 0x41d   :  { %v1734_v56 = vpop.permute.xlu1 %1733  ;;  %v1392_v54 = vmul.f32 1.442695, %v1382_v53 }
 0x41e   :  { %v1745_v21 = vsel %vm1225_vm4, %v1734_v56, 0  ;;  %4079 = vmatprep.subr.msk.bf16.mxu0 %vm1225_vm4, %v1734_v56  ;;  %v1433_v36 = vpop.permute.xlu0 %1432 }
 0x41f   :  { %3980 = vmatpush3.bf16.xpose.msra.mxu0 %v1745_v21  ;;  %v1443_v49 = vsel %vm1441_vm7, %v1433_v36, 0  ;;  %4077 = vmatprep.subr.msk.bf16.mxu1 %vm1441_vm7, %v1433_v36  ;;  %4127 = vpow2.f32 %v1392_v54 }
 0x420   :  { %3964 = vmatpush3.bf16.msra.mxu1 %v1443_v49 }
 0x421   :  { %v1496_v50 = vpop.permute.xlu1 %1495  ;;  %3965 = vmatprep.subr.bf16.mxu1 %v1431_v10 }
 0x422   :  { %v1505_v62 = vsel %vm1441_vm7, %v1496_v50, 0 }
 0x423   :  { %v4118_v6 = vpop.eup %4117 }
 0x424   :  { %v4120_v58 = vpop.eup %4119  ;;  %v1402_v14 = vsel %vm1365_vm6, %v4118_v6, 0.0  ;;  %3966 = vmatpush3.bf16.msra.mxu1 %v1431_v10 }
 0x425   :  { %v4122_v7 = vpop.eup %4121  ;;  %v1399_v9 = vsel %vm1358_vm5, %v4120_v58, 0.0  ;;  %v1732_v57 = vpop.permute.xlu1 %1731  ;;  %1403 = vadd.xlane.f32.xlu0 %v1402_v14  ;;  %4078 = vmatprep.subr.msk.bf16.mxu1 %vm1441_vm7, %v1496_v50 }
 0x426   :  { %1400 = vadd.xlane.f32.xlu1 %v1399_v9  ;;  %v1742_v3 = vsel %vm1225_vm4, %v1732_v57, 0  ;;  %4080 = vmatprep.subr.msk.bf16.mxu0 %vm1225_vm4, %v1732_v57  ;;  %v1396_v25 = vsel %vm1358_vm5, %v4122_v7, 0.0 }
 0x427   :  { %v4124_v24 = vpop.eup %4123  ;;  %3982 = vmatpush3.bf16.xpose.msra.mxu0 %v1742_v3 }
 0x428   :  { %v1411_v61 = vsel %vm1365_vm6, %v4124_v24, 0.0  ;;  %v4126_v43 = vpop.eup %4125 }
 0x429   :  { %1397 = vadd.xlane.f32.xlu0 %v1396_v25  ;;  %v1405_v22 = vsel %vm1358_vm5, %v4126_v43, 0.0 }
 0x42a   :  { %1412 = vadd.xlane.f32.xlu1 %v1411_v61 }
 0x42c   :  { %v4128_v39 = vpop.eup %4127 }
 0x42d   :  { %v1408_v4 = vsel %vm1358_vm5, %v4128_v39, 0.0 }
 0x42e   :  { %1406 = vadd.xlane.f32.xlu1 %v1405_v22 }
 0x43f   :  { %1727 = vrot.lane.b32.xlu1 %v4725_v42, %s4197_s26  ;;  %1493 = vrot.lane.b32.xlu0 %v4738_v18, %s4195_s24 }
 0x443   :  { %1799 = vrot.lane.b32.xlu1 %v4738_v18, %s4196_s25 }
 0x447   :  { %1797 = vrot.lane.b32.xlu1 %v4736_v15, %s4197_s26 }
 0x45e   :  { %1409 = vadd.xlane.f32.xlu0 %v1408_v4 }
 0x474   :  { %1801 = vrot.lane.b32.xlu0 %v4736_v15, %s4196_s25 }
 0x478   :  { %1729 = vrot.lane.b32.xlu0 %v4721_v37, %s4197_s26 }
 0x47c   :  { %1795 = vrot.lane.b32.xlu0 %v4738_v18, %s4197_s26 }
 0x4ae   :  { %v1404_v52 = vpop.xlane.xlu0 %1403 }
 0x4af   :  { %v1401_v5 = vpop.xlane.xlu1 %1400  ;;  %4129 = vrcp.f32 %v1404_v52 }
 0x4b0   :  { %4131 = vrcp.f32 %v1401_v5 }
 0x4b2   :  { %v1398_v63 = vpop.xlane.xlu0 %1397 }
 0x4b3   :  { %v1413_v2 = vpop.xlane.xlu1 %1412  ;;  %4133 = vrcp.f32 %v1398_v63 }
 0x4b4   :  { %4135 = vrcp.f32 %v1413_v2 }
 0x4b6   :  { %v1494_v17 = vpop.permute.xlu0 %1493 }
 0x4b7   :  { %v1407_v16 = vpop.xlane.xlu1 %1406 }
 0x4b8   :  { %4137 = vrcp.f32 %v1407_v16 }
 0x4bb   :  { %v1728_v46 = vpop.permute.xlu1 %1727 }
 0x4bc   :  { %3983 = vmatprep.mubr.msk.bf16.mxu0 %vm1225_vm4, %v1728_v46  ;;  %v4130_v47 = vpop.eup %4129 }
 0x4bd   :  { %v4132_v51 = vpop.eup %4131  ;;  %v1422_v1 = vmul.f32 %v4130_v47, %v4118_v6 }
 0x4be   :  { %v1421_v12 = vmul.f32 %v4132_v51, %v4120_v58 }
 0x4bf   :  { %v1427_v13 = vpack.c.bf16 %v1422_v1, %v1422_v1  ;;  %v1800_v14 = vpop.permute.xlu1 %1799 }
 0x4c0   :  { %v4134_v0 = vpop.eup %4133 }
 0x4c1   :  { %v1420_v59 = vmul.f32 %v4134_v0, %v4122_v7  ;;  %v4136_v11 = vpop.eup %4135  ;;  %v1810_v7 = vsel %vm1225_vm4, %v1800_v14, 0 }
 0x4c2   :  { %v1425_v56 = vmul.f32 %v4136_v11, %v4124_v24 }
 0x4c3   :  { %v1426_v60 = vpack.c.bf16 %v1421_v12, %v1420_v59  ;;  %v1798_v9 = vpop.permute.xlu1 %1797 }
 0x4c4   :  { %v1429_v50 = vpack.c.bf16 %v1425_v56, %v1425_v56 }
 0x4c5   :  { %3967 = vmatprep.mubr.msk.bf16.mxu1 %vm1358_vm5, %v1426_v60  ;;  %v4138_v10 = vpop.eup %4137 }
 0x4c6   :  { %3968 = vmatmul.mubr.msk.bf16.vlgmr.msra.gmra.mxu1 %vm1358_vm5, %v1427_v13  ;;  %v1423_v21 = vmul.f32 %v4138_v10, %v4126_v43 }
 0x4c7   :  { %3972 = vmatpush3.bf16.msra.mxu1 %v1505_v62 }
 0x4c8   :  { %3973 = vmatprep.subr.bf16.mxu1 %v1494_v17 }
 0x4cb   :  { %3974 = vmatpush3.bf16.msra.mxu1 %v1494_v17 }
 0x4e7   :  { %v1410_v45 = vpop.xlane.xlu0 %1409 }
 0x4e8   :  { %4139 = vrcp.f32 %v1410_v45 }
 0x4eb   :  { %v1802_v44 = vpop.permute.xlu0 %1801 }
 0x4ec   :  { %4081 = vmatprep.subr.msk.bf16.mxu1 %vm1225_vm4, %v1802_v44  ;;  %v1813_v6 = vsel %vm1225_vm4, %v1802_v44, 0 }
 0x4ef   :  { %v1730_v8 = vpop.permute.xlu0 %1729 }
 0x4f0   :  { %3984 = vmatmul.mubr.msk.bf16.vlgmr.msra.gmra.mxu0 %vm1225_vm4, %v1730_v8 }
 0x4f3   :  { %v1796_v58 = vpop.permute.xlu0 %1795 }
 0x4f5   :  { %v4140_v55 = vpop.eup %4139 }
 0x4f6   :  { %v1424_v36 = vmul.f32 %v4140_v55, %v4128_v39 }
 0x4f8   :  { %v1428_v49 = vpack.c.bf16 %v1424_v36, %v1423_v21 }
 0x4fa   :  { %3975 = vmatprep.mubr.msk.bf16.mxu1 %vm1358_vm5, %v1428_v49 }
 0x4fb   :  { %3976 = vmatmul.mubr.msk.bf16.vlgmr.msra.gmra.mxu1 %vm1358_vm5, %v1429_v50 }
 0x4fc   :  { %3988 = vmatpush3.bf16.xpose.msra.mxu1 %v1813_v6  ;;  %3991 = vmatprep.mubr.msk.bf16.mxu1 %vm1225_vm4, %v1796_v58 }
 0x4fd   :  { %4082 = vmatprep.subr.msk.bf16.mxu1 %vm1225_vm4, %v1800_v14 }
 0x504   :  { %3990 = vmatpush3.bf16.xpose.msra.mxu1 %v1810_v7 }
 0x50b   :  { %3992 = vmatmul.mubr.msk.bf16.vlgmr.msra.gmra.mxu1 %vm1225_vm4, %v1798_v9 }
 0x586   :  { %v3969_v57 = vpop.f32.mrf.mxu1 }
 0x587   :  { %v1601_v50 = vrot.slane %v3969_v57, %v4328_v20 }
 0x588   :  { %v1479_v3 = vpop.f32.mrf.mxu1 }
 0x589   :  { %v1561_v24 = vcombine.high %v1479_v3, %v1479_v3  ;;  %v1568_v61 = vrot.slane %v1479_v3, %v4328_v20 }
 0x58a   :  { %v3970_v25 = vpop.f32.mrf.mxu1 }
 0x58b   :  { %v1575_v43 = vrot.slane %v1561_v24, %v4328_v20  ;;  %v1576_v53 = vcombine.high %v1568_v61, %v1568_v61 }
 0x58c   :  { %v1482_v22 = vpop.f32.mrf.mxu1 }
 0x58d   :  { %v1577_v54 = vcombine.high %v1575_v43, %v1575_v43  ;;  %v1578_v39 = vcombine.high %v1482_v22, %v1482_v22  ;;  %v1585_v4 = vrot.slane %v1482_v22, %v4328_v20  ;;  %v1643_v2 = vcombine.low %v1568_v61, %v1576_v53 }
 0x58f   :  { %v1644_v52 = vcombine.low %v1575_v43, %v1577_v54  ;;  %v1592_v5 = vrot.slane %v1578_v39, %v4328_v20  ;;  %v1593_v63 = vcombine.high %v1585_v4, %v1585_v4  ;;  %v1651_v0 = vrot.slane %v1643_v2, %v4328_v20 }
 0x591   :  { %v1594_v16 = vcombine.high %v1592_v5, %v1592_v5  ;;  %v1660_v46 = vcombine.low %v1585_v4, %v1593_v63  ;;  %v1658_v47 = vrot.slane %v1644_v52, %v4328_v20 }
 0x593   :  { %v1661_v51 = vcombine.low %v1592_v5, %v1594_v16  ;;  %v1668_v1 = vrot.slane %v1660_v46, %v4328_v20  ;;  %v4820_v12 = vcombine.low %v1651_v0, %v1658_v47 }
 0x595   :  { %v1675_v59 = vrot.slane %v1661_v51, %v4328_v20 }
 0x597   :  { %v4822_v60 = vcombine.low %v1668_v1, %v1675_v59 }
 0x599   :  { %v1724_v13 = vpack.c.bf16 %v4822_v60, %v4820_v12  ;;  %v1126_v12 = vld [vmem:[%s5441_s6 + $0x4] sm:$0xf] }
 0x59a   :  { %v2246_v60 = vsel %vm2244_vm8, %v1126_v12, 0 }
 0x5b0   :  { %v3985_v62 = vpop.f32.mrf.mxu0 }
 0x5b1   :  { %v1865_v8 = vmul.f32 0.35355338, %v3985_v62 }
 0x5b2   :  { %v1781_v17 = vpop.f32.mrf.mxu0 }
 0x5b3   :  { %v1863_v45 = vmul.f32 0.35355338, %v1781_v17  ;;  %v1875_v56 = vsel %vm1365_vm6, %v1865_v8, -inf }
 0x5b4   :  { %v3986_v44 = vpop.f32.mrf.mxu0 }
 0x5b5   :  { %v1869_v11 = vsel %vm1358_vm5, %v1863_v45, -inf }
 0x5b6   :  { %1870 = vmax.xlane.f32.xlu0 %v1869_v11  ;;  %v1784_v10 = vpop.f32.mrf.mxu0 }
 0x5b7   :  { %v1864_v55 = vmul.f32 0.35355338, %v1784_v10 }
 0x5b9   :  { %v1872_v21 = vsel %vm1358_vm5, %v1864_v55, -inf }
 0x5ba   :  { %1876 = vmax.xlane.f32.xlu0 %v1875_v56  ;;  %1873 = vmax.xlane.f32.xlu1 %v1872_v21 }
 0x5bb   :  { %v3977_v36 = vpop.f32.mrf.mxu1 }
 0x5bc   :  { %v1642_v52 = vrot.slane %v3977_v36, %v4328_v20 }
 0x5bd   :  { %v1541_v49 = vpop.f32.mrf.mxu1 }
 0x5be   :  { %v1602_v6 = vcombine.high %v1541_v49, %v1541_v49  ;;  %v1609_v58 = vrot.slane %v1541_v49, %v4328_v20 }
 0x5bf   :  { %v3978_v14 = vpop.f32.mrf.mxu1 }
 0x5c0   :  { %v1616_v7 = vrot.slane %v1602_v6, %v4328_v20  ;;  %v1617_v9 = vcombine.high %v1609_v58, %v1609_v58  ;;  %v1677_v3 = vcombine.low %v1601_v50, %v1609_v58 }
 0x5c1   :  { %v1544_v24 = vpop.f32.mrf.mxu1 }
 0x5c2   :  { %v1678_v61 = vcombine.low %v1617_v9, %v1616_v7  ;;  %v1618_v25 = vcombine.high %v1616_v7, %v1616_v7  ;;  %v1619_v43 = vcombine.high %v1544_v24, %v1544_v24  ;;  %v1626_v22 = vrot.slane %v1544_v24, %v4328_v20 }
 0x5c3   :  { %v1685_v53 = vrot.slane %v1677_v3, %v4328_v20 }
 0x5c4   :  { %v1692_v54 = vrot.slane %v1678_v61, %v4328_v20  ;;  %v1633_v57 = vrot.slane %v1619_v43, %v4328_v20  ;;  %v1634_v39 = vcombine.high %v1626_v22, %v1626_v22  ;;  %v1694_v4 = vcombine.low %v1618_v25, %v1626_v22 }
 0x5c6   :  { %v4837_v5 = vcombine.low %v1685_v53, %v1692_v54  ;;  %v1635_v63 = vcombine.high %v1633_v57, %v1633_v57  ;;  %v1695_v2 = vcombine.low %v1634_v39, %v1633_v57  ;;  %v1702_v46 = vrot.slane %v1694_v4, %v4328_v20 }
 0x5c8   :  { %v4839_v16 = vcombine.low %v1635_v63, %v1642_v52  ;;  %v1709_v47 = vrot.slane %v1695_v2, %v4328_v20 }
 0x5ca   :  { %v4843_v51 = vcombine.low %v1702_v46, %v1709_v47 }
 0x5cb   :  { %v3993_v0 = vpop.f32.mrf.mxu1 }
 0x5cc   :  { %v1868_v1 = vmul.f32 0.35355338, %v3993_v0  ;;  %v1725_v62 = vpack.c.bf16 %v4843_v51, %v4837_v5 }
 0x5cd   :  { %v1849_v59 = vpop.f32.mrf.mxu1 }
 0x5ce   :  { %v1866_v17 = vmul.f32 0.35355338, %v1849_v59  ;;  %v1884_v44 = vsel %vm1365_vm6, %v1868_v1, -inf }
 0x5cf   :  { %1885 = vmax.xlane.f32.xlu1 %v1884_v44  ;;  %v3994_v11 = vpop.f32.mrf.mxu1 }
 0x5d0   :  { %v1878_v10 = vsel %vm1358_vm5, %v1866_v17, -inf }
 0x5d1   :  { %1879 = vmax.xlane.f32.xlu0 %v1878_v10  ;;  %v1852_v56 = vpop.f32.mrf.mxu1 }
 0x5d2   :  { %v1867_v21 = vmul.f32 0.35355338, %v1852_v56 }
 0x5d4   :  { %v1881_v36 = vsel %vm1358_vm5, %v1867_v21, -inf }
 0x5d5   :  { %1882 = vmax.xlane.f32.xlu0 %v1881_v36 }
 0x63f   :  { %v1871_v49 = vpop.xlane.xlu0 %1870 }
 0x640   :  { %v1887_v50 = vsub.f32 %v1863_v45, %v1871_v49 }
 0x642   :  { %v1893_v6 = vmul.f32 1.442695, %v1887_v50 }
 0x643   :  { %v1874_v58 = vpop.xlane.xlu1 %1873  ;;  %v1877_v14 = vpop.xlane.xlu0 %1876 }
 0x644   :  { %4141 = vpow2.f32 %v1893_v6  ;;  %v1888_v7 = vsub.f32 %v1864_v55, %v1874_v58  ;;  %v1889_v9 = vsub.f32 %v1865_v8, %v1877_v14 }
 0x646   :  { %v1895_v3 = vmul.f32 1.442695, %v1888_v7  ;;  %v1897_v24 = vmul.f32 1.442695, %v1889_v9 }
 0x648   :  { %4143 = vpow2.f32 %v1895_v3 }
 0x649   :  { %4145 = vpow2.f32 %v1897_v24 }
 0x651   :  { %v4142_v61 = vpop.eup %4141 }
 0x652   :  { %v1905_v25 = vsel %vm1358_vm5, %v4142_v61, 0.0 }
 0x653   :  { %1906 = vadd.xlane.f32.xlu0 %v1905_v25 }
 0x655   :  { %v4144_v43 = vpop.eup %4143 }
 0x656   :  { %v4146_v22 = vpop.eup %4145  ;;  %v1908_v53 = vsel %vm1358_vm5, %v4144_v43, 0.0 }
 0x657   :  { %1909 = vadd.xlane.f32.xlu1 %v1908_v53  ;;  %v1911_v45 = vsel %vm1365_vm6, %v4146_v22, 0.0 }
 0x658   :  { %v1886_v54 = vpop.xlane.xlu1 %1885  ;;  %1912 = vadd.xlane.f32.xlu0 %v1911_v45 }
 0x659   :  { %v1892_v57 = vsub.f32 %v1868_v1, %v1886_v54 }
 0x65a   :  { %v1880_v55 = vpop.xlane.xlu0 %1879 }
 0x65b   :  { %v1903_v8 = vmul.f32 1.442695, %v1892_v57  ;;  %v1890_v39 = vsub.f32 %v1866_v17, %v1880_v55  ;;  %v1125_v57 = vld [vmem:[%s5441_s6] sm:$0xf] }
 0x65d   :  { %4147 = vpow2.f32 %v1903_v8  ;;  %v1899_v4 = vmul.f32 1.442695, %v1890_v39  ;;  %v2314_v39 = vsel %vm2244_vm8, %v1125_v57, 0 }
 0x65e   :  { %v1883_v52 = vpop.xlane.xlu0 %1882 }
 0x65f   :  { %4149 = vpow2.f32 %v1899_v4  ;;  %v1891_v63 = vsub.f32 %v1867_v21, %v1883_v52  ;;  %v1718_v4 = vrot.slane %v4839_v16, %v4328_v20 }
 0x661   :  { %v1901_v2 = vmul.f32 1.442695, %v1891_v63  ;;  %v1726_v52 = vpack.c.bf16 %v1718_v4, %v1718_v4 }
 0x663   :  { %4151 = vpow2.f32 %v1901_v2 }
 0x66a   :  { %v4148_v46 = vpop.eup %4147 }
 0x66b   :  { %v1920_v47 = vsel %vm1365_vm6, %v4148_v46, 0.0 }
 0x66c   :  { %v4150_v0 = vpop.eup %4149  ;;  %1921 = vadd.xlane.f32.xlu1 %v1920_v47 }
 0x66d   :  { %v1914_v59 = vsel %vm1358_vm5, %v4150_v0, 0.0 }
 0x670   :  { %v4152_v44 = vpop.eup %4151  ;;  %1915 = vadd.xlane.f32.xlu1 %v1914_v59 }
 0x671   :  { %v1917_v1 = vsel %vm1358_vm5, %v4152_v44, 0.0 }
 0x672   :  { %1918 = vadd.xlane.f32.xlu0 %v1917_v1 }
 0x681   :  { %1939 = vrot.lane.b32.xlu1 %v4725_v42, %s4198_s27 }
 0x685   :  { %2003 = vrot.lane.b32.xlu1 %v4736_v15, %s4198_s27 }
 0x688   :  { %1941 = vrot.lane.b32.xlu0 %v4721_v37, %s4198_s27 }
 0x689   :  { %2001 = vrot.lane.b32.xlu1 %v4738_v18, %s4198_s27 }
 0x6dc   :  { %v1907_v17 = vpop.xlane.xlu0 %1906 }
 0x6dd   :  { %4153 = vrcp.f32 %v1907_v17 }
 0x6e0   :  { %v1910_v11 = vpop.xlane.xlu1 %1909 }
 0x6e1   :  { %4155 = vrcp.f32 %v1910_v11  ;;  %v1913_v21 = vpop.xlane.xlu0 %1912 }
 0x6e2   :  { %4157 = vrcp.f32 %v1913_v21 }
 0x6ea   :  { %v4154_v10 = vpop.eup %4153 }
 0x6eb   :  { %v1929_v36 = vmul.f32 %v4154_v10, %v4142_v61 }
 0x6ee   :  { %v4156_v56 = vpop.eup %4155 }
 0x6ef   :  { %v1930_v49 = vmul.f32 %v4156_v56, %v4144_v43  ;;  %v4158_v6 = vpop.eup %4157 }
 0x6f0   :  { %v1931_v3 = vmul.f32 %v4158_v6, %v4146_v22 }
 0x6f1   :  { %v1935_v50 = vpack.c.bf16 %v1930_v49, %v1929_v36 }
 0x6f2   :  { %v1936_v25 = vpack.c.bf16 %v1931_v3, %v1931_v3 }
 0x6f3   :  { %3999 = vmatprep.mubr.msk.bf16.mxu0 %vm1358_vm5, %v1935_v50 }
 0x6f5   :  { %v1922_v42 = vpop.xlane.xlu1 %1921 }
 0x6f6   :  { %4159 = vrcp.f32 %v1922_v42 }
 0x6f9   :  { %v1916_v15 = vpop.xlane.xlu1 %1915 }
 0x6fa   :  { %4161 = vrcp.f32 %v1916_v15 }
 0x6fb   :  { %v1919_v37 = vpop.xlane.xlu0 %1918 }
 0x6fc   :  { %4163 = vrcp.f32 %v1919_v37 }
 0x6fd   :  { %v1940_v18 = vpop.permute.xlu1 %1939 }
 0x6ff   :  { %v1942_v58 = vpop.permute.xlu0 %1941 }
 0x700   :  { %v1951_v14 = vsel %vm1441_vm7, %v1942_v58, 0  ;;  %4083 = vmatprep.subr.msk.bf16.mxu0 %vm1441_vm7, %v1942_v58 }
 0x701   :  { %v2004_v7 = vpop.permute.xlu1 %2003  ;;  %3996 = vmatpush3.bf16.msra.mxu0 %v1951_v14 }
 0x702   :  { %v2013_v9 = vsel %vm1441_vm7, %v2004_v7, 0  ;;  %3997 = vmatprep.subr.bf16.mxu0 %v1940_v18  ;;  %4084 = vmatprep.subr.msk.bf16.mxu1 %vm1441_vm7, %v2004_v7 }
 0x703   :  { %4004 = vmatpush3.bf16.msra.mxu1 %v2013_v9  ;;  %v4160_v61 = vpop.eup %4159 }
 0x704   :  { %v1934_v45 = vmul.f32 %v4160_v61, %v4148_v46 }
 0x705   :  { %v2002_v24 = vpop.permute.xlu1 %2001  ;;  %3998 = vmatpush3.bf16.msra.mxu0 %v1940_v18 }
 0x706   :  { %4005 = vmatprep.subr.bf16.mxu1 %v2002_v24  ;;  %4011 = vmatprep.subr.bf16.mxu0 %v5463_v19  ;;  %v1938_v8 = vpack.c.bf16 %v1934_v45, %v1934_v45 }
 0x707   :  { %v4162_v43 = vpop.eup %4161  ;;  %4006 = vmatpush3.bf16.msra.mxu1 %v2002_v24 }
 0x708   :  { %4000 = vmatmul.mubr.msk.bf16.vlgmr.msra.gmra.mxu0 %vm1358_vm5, %v1936_v25  ;;  %4025 = vmatprep.subr.bf16.mxu1 %v5463_v19  ;;  %v1932_v22 = vmul.f32 %v4162_v43, %v4150_v0 }
 0x709   :  { %v4164_v53 = vpop.eup %4163  ;;  %4013 = vmatprep.mubr.msk.bf16.mxu0 %vm4193_vm3, %v5463_v19  ;;  %4012 = vmatpush3.bf16.msra.mxu0 %v2246_v60 }
 0x70a   :  { %v1933_v54 = vmul.f32 %v4164_v53, %v4152_v44  ;;  %4039 = vmatprep.subr.bf16.mxu0 %v5463_v19 }
 0x70c   :  { %v1937_v55 = vpack.c.bf16 %v1933_v54, %v1932_v22 }
 0x70e   :  { %4007 = vmatprep.mubr.msk.bf16.mxu1 %vm1358_vm5, %v1937_v55 }
 0x70f   :  { %4008 = vmatmul.mubr.msk.bf16.vlgmr.msra.gmra.mxu1 %vm1358_vm5, %v1938_v8 }
 0x710   :  { %4026 = vmatpush3.bf16.msra.mxu1 %v2314_v39  ;;  %4027 = vmatprep.mubr.msk.bf16.mxu1 %vm4193_vm3, %v5463_v19 }
 0x711   :  { %4053 = vmatprep.subr.bf16.mxu1 %v5463_v19 }
 0x717   :  { %4028 = vmatmul.mubr.msk.bf16.vlgmr.msra.gmra.mxu1 %vm1225_vm4, %v1724_v13 }
 0x718   :  { %4031 = vmatprep.mubr.msk.bf16.mxu1 %vm4193_vm3, %v5463_v19 }
 0x71f   :  { %4032 = vmatmul.mubr.msk.bf16.gmra.mxu1 %vm1225_vm4, %v1725_v62 }
 0x720   :  { %4035 = vmatprep.mubr.msk.bf16.mxu1 %vm4193_vm3, %v5463_v19 }
 0x727   :  { %4036 = vmatmul.mubr.msk.bf16.gmra.mxu1 %vm1225_vm4, %v1726_v52 }
 0x728   :  { %4061 = vmatprep.mubr.msk.bf16.mxu1 %vm4193_vm3, %v5463_v19 }
 0x7c8   :  { %v4001_v13 = vpop.f32.mrf.mxu0 }
 0x7c9   :  { %v2109_v43 = vrot.slane %v4001_v13, %v4328_v20 }
 0x7ca   :  { %v1987_v5 = vpop.f32.mrf.mxu0 }
 0x7cb   :  { %v2069_v51 = vcombine.high %v1987_v5, %v1987_v5  ;;  %v2076_v16 = vrot.slane %v1987_v5, %v4328_v20 }
 0x7cc   :  { %v4002_v62 = vpop.f32.mrf.mxu0 }
 0x7cd   :  { %v2083_v63 = vrot.slane %v2069_v51, %v4328_v20  ;;  %v2084_v2 = vcombine.high %v2076_v16, %v2076_v16 }
 0x7ce   :  { %v1990_v46 = vpop.f32.mrf.mxu0 }
 0x7cf   :  { %v2085_v47 = vcombine.high %v2083_v63, %v2083_v63  ;;  %v2086_v0 = vcombine.high %v1990_v46, %v1990_v46  ;;  %v2093_v59 = vrot.slane %v1990_v46, %v4328_v20  ;;  %v4009_v44 = vpop.f32.mrf.mxu1  ;;  %v2151_v56 = vcombine.low %v2076_v16, %v2084_v2 }
 0x7d0   :  { %v2150_v46 = vrot.slane %v4009_v44, %v4328_v20 }
 0x7d1   :  { %v2152_v1 = vcombine.low %v2083_v63, %v2085_v47  ;;  %v2100_v17 = vrot.slane %v2086_v0, %v4328_v20  ;;  %v2101_v11 = vcombine.high %v2093_v59, %v2093_v59  ;;  %v2049_v10 = vpop.f32.mrf.mxu1  ;;  %v2159_v14 = vrot.slane %v2151_v56, %v4328_v20 }
 0x7d2   :  { %v2110_v21 = vcombine.high %v2049_v10, %v2049_v10  ;;  %v2117_v36 = vrot.slane %v2049_v10, %v4328_v20 }
 0x7d3   :  { %v2102_v49 = vcombine.high %v2100_v17, %v2100_v17  ;;  %v2168_v50 = vcombine.low %v2093_v59, %v2101_v11  ;;  %v4010_v42 = vpop.f32.mrf.mxu1  ;;  %v2166_v15 = vrot.slane %v2152_v1, %v4328_v20 }
 0x7d4   :  { %v2124_v37 = vrot.slane %v2110_v21, %v4328_v20  ;;  %v2125_v6 = vcombine.high %v2117_v36, %v2117_v36  ;;  %v2185_v4 = vcombine.low %v2109_v43, %v2117_v36 }
 0x7d5   :  { %v2169_v18 = vcombine.low %v2100_v17, %v2102_v49  ;;  %v2052_v58 = vpop.f32.mrf.mxu1  ;;  %v2176_v3 = vrot.slane %v2168_v50, %v4328_v20  ;;  %v2167_v53 = vcombine.low %v2159_v14, %v2166_v15  ;;  %v3862_v50 = vld [vmem:[%s5442_s7] ss:$0 sm:$0xff] }
 0x7d6   :  { %v2126_v7 = vcombine.high %v2124_v37, %v2124_v37  ;;  %v2127_v9 = vcombine.high %v2052_v58, %v2052_v58  ;;  %v2134_v61 = vrot.slane %v2052_v58, %v4328_v20  ;;  %v2186_v54 = vcombine.low %v2125_v6, %v2124_v37 }
 0x7d7   :  { %v2183_v24 = vrot.slane %v2169_v18, %v4328_v20  ;;  %v2350_v25 = vpop.f32.mrf.mxu1  ;;  %v2193_v16 = vrot.slane %v2185_v4, %v4328_v20  ;;  %v2495_v42 = vcombine.high %v3862_v50, %v3862_v50  ;;  %v4935_v18 = vrot.slane %v3862_v50, %v4328_v20 }
 0x7d8   :  { %v2141_v45 = vrot.slane %v2127_v9, %v4328_v20  ;;  %v2142_v57 = vcombine.high %v2134_v61, %v2134_v61  ;;  %v2202_v55 = vcombine.low %v2126_v7, %v2134_v61  ;;  %v2200_v60 = vrot.slane %v2186_v54, %v4328_v20 }
 0x7d9   :  { %v2184_v22 = vcombine.low %v2176_v3, %v2183_v24  ;;  %v4029_v8 = vpop.f32.mrf.mxu1  ;;  %v4939_v7 = vrot.slane %v2495_v42, %v4328_v20  ;;  %v4944_v61 = vcombine.high %v4935_v18, %v4935_v18 }
 0x7da   :  { %v2203_v52 = vcombine.low %v2142_v57, %v2141_v45  ;;  %v2210_v5 = vrot.slane %v2202_v55, %v4328_v20  ;;  %v2143_v62 = vcombine.high %v2141_v45, %v2141_v45  ;;  %v2201_v47 = vcombine.low %v2193_v16, %v2200_v60 }
 0x7db   :  { %v2232_v39 = vpack.c.bf16 %v2184_v22, %v2167_v53  ;;  %v2353_v12 = vpop.f32.mrf.mxu1  ;;  %v4951_v57 = vcombine.high %v4939_v7, %v4939_v7 }
 0x7dc   :  { %v2217_v51 = vrot.slane %v2203_v52, %v4328_v20  ;;  %v2219_v59 = vcombine.low %v2143_v62, %v2150_v46 }
 0x7dd   :  { %4014 = vmatmul.mubr.msk.bf16.vlgmr.msra.gmra.mxu0 %vm1225_vm4, %v2232_v39  ;;  %v4030_v13 = vpop.f32.mrf.mxu1 }
 0x7de   :  { %4017 = vmatprep.mubr.msk.bf16.mxu0 %vm4193_vm3, %v5463_v19  ;;  %v2218_v63 = vcombine.low %v2210_v5, %v2217_v51  ;;  %v2226_v56 = vrot.slane %v2219_v59, %v4328_v20  ;;  %v4185_v59 = vld.sshfl [vmem:[%s5436_s14 + $0x10] sm:$0x3 pattern:$0x76325410] }
 0x7df   :  { %v2358_v2 = vpop.f32.mrf.mxu1 }
 0x7e0   :  { %v2233_v17 = vpack.c.bf16 %v2218_v63, %v2201_v47  ;;  %v2234_v49 = vpack.c.bf16 %v2226_v56, %v2226_v56 }
 0x7e1   :  { %v4033_v0 = vpop.f32.mrf.mxu1 }
 0x7e3   :  { %v2361_v1 = vpop.f32.mrf.mxu1 }
 0x7e5   :  { %4018 = vmatmul.mubr.msk.bf16.gmra.mxu0 %vm1225_vm4, %v2233_v17  ;;  %v4034_v11 = vpop.f32.mrf.mxu1 }
 0x7e6   :  { %4021 = vmatprep.mubr.msk.bf16.mxu0 %vm4193_vm3, %v5463_v19 }
 0x7e7   :  { %v4925_v10 = vpop.f32.mrf.mxu1 }
 0x7e9   :  { %v4037_v21 = vpop.f32.mrf.mxu1 }
 0x7eb   :  { %v2369_v36 = vpop.f32.mrf.mxu1 }
 0x7ed   :  { %4022 = vmatmul.mubr.msk.bf16.gmra.mxu0 %vm1225_vm4, %v2234_v49  ;;  %v4038_v44 = vpop.f32.mrf.mxu1 }
 0x7ee   :  { %4041 = vmatprep.mubr.msk.bf16.mxu0 %vm4193_vm3, %v5463_v19 }
 0x89d   :  { %v2282_v15 = vpop.f32.mrf.mxu0 }
 0x89e   :  { %v2351_v37 = vadd.f32 %v2350_v25, %v2282_v15 }
 0x89f   :  { %v4015_v6 = vpop.f32.mrf.mxu0 }
 0x8a0   :  { %v2377_v58 = vcombine.high %v2351_v37, %v2351_v37  ;;  %v2384_v14 = vrot.slane %v2351_v37, %v4328_v20 }
 0x8a1   :  { %v2285_v9 = vpop.f32.mrf.mxu0 }
 0x8a2   :  { %v2391_v3 = vrot.slane %v2377_v58, %v4328_v20  ;;  %v2392_v24 = vcombine.high %v2384_v14, %v2384_v14  ;;  %v2354_v43 = vadd.f32 %v2353_v12, %v2285_v9  ;;  %v2471_v25 = vadd.f32 %v2384_v14, %v4334_v23 }
 0x8a3   :  { %v4016_v53 = vpop.f32.mrf.mxu0 }
 0x8a4   :  { %v2393_v45 = vcombine.high %v2391_v3, %v2391_v3  ;;  %v2472_v22 = vadd.f32 %v2392_v24, %v4358_v31  ;;  %v2473_v54 = vadd.f32 %v2391_v3, %v4354_v30  ;;  %v2394_v55 = vcombine.high %v2354_v43, %v2354_v43  ;;  %v5464_v24 = vld [vmem:[#allocation2_spill] sm:$0xff] }
 0x8a5   :  { %v2401_v8 = vrot.slane %v2354_v43, %v4328_v20  ;;  %v2290_v39 = vpop.f32.mrf.mxu0  ;;  %v4959_v12 = vadd.f32 %v4935_v18, %v2471_v25 }
 0x8a6   :  { %v2474_v4 = vadd.f32 %v2393_v45, %v4374_v38  ;;  %v4956_v52 = vadd.f32 %v4944_v61, %v2472_v22  ;;  %v2359_v23 = vadd.f32 %v2358_v2, %v2290_v39  ;;  %v2408_v31 = vrot.slane %v2394_v55, %v4328_v20 }
 0x8a7   :  { %v2409_v30 = vcombine.high %v2401_v8, %v2401_v8  ;;  %v2475_v60 = vadd.f32 %v2401_v8, %v4361_v33  ;;  %v4019_v5 = vpop.f32.mrf.mxu0  ;;  %v4964_v51 = vadd.f32 %v4939_v7, %v2473_v54  ;;  %v5465_v8 = vld [vmem:[#allocation3_spill] sm:$0xff] }
 0x8a8   :  { %v4967_v13 = vadd.f32 %v4951_v57, %v2474_v4  ;;  %v2411_v38 = vcombine.high %v2359_v23, %v2359_v23  ;;  %v2418_v16 = vrot.slane %v2359_v23, %v4328_v20  ;;  %v2410_v62 = vcombine.high %v2408_v31, %v2408_v31  ;;  %v5466_v4 = vld [vmem:[#allocation5_spill] sm:$0xff]  ;;  %v5467_v5 = vld [vmem:[#allocation6_spill] sm:$0xff] }
 0x8a9   :  { %v2476_v63 = vadd.f32 %v2409_v30, %v4383_v41  ;;  %v2477_v2 = vadd.f32 %v2408_v31, %v4379_v40  ;;  %v2293_v46 = vpop.f32.mrf.mxu0  ;;  %v2554_v47 = vcombine.low %v4959_v12, %v4956_v52  ;;  %v4980_v21 = vadd.f32 %v4935_v18, %v2475_v60 }
 0x8aa   :  { %v2425_v33 = vrot.slane %v2411_v38, %v4328_v20  ;;  %v2426_v0 = vcombine.high %v2418_v16, %v2418_v16  ;;  %v2479_v17 = vadd.f32 %v4185_v59, %v2418_v16  ;;  %v2362_v11 = vadd.f32 %v2361_v1, %v2293_v46  ;;  %v4186_v59 = vld.sshfl [vmem:[%s5436_s14 + $0x28] sm:$0x3 pattern:$0x76325410] }
 0x8ab   :  { %v2478_v56 = vadd.f32 %v2410_v62, %v4400_v48  ;;  %v4983_v40 = vadd.f32 %v4944_v61, %v2476_v63  ;;  %v4020_v41 = vpop.f32.mrf.mxu0  ;;  %v2555_v36 = vcombine.low %v4964_v51, %v4967_v13  ;;  %v4988_v49 = vadd.f32 %v4939_v7, %v2477_v2  ;;  %v5468_v62 = vld [vmem:[#allocation4_spill] sm:$0xff] }
 0x8ac   :  { %v2427_v44 = vcombine.high %v2425_v33, %v2425_v33  ;;  %v2480_v50 = vadd.f32 %v2426_v0, %v4345_v27  ;;  %v2481_v1 = vadd.f32 %v2425_v33, %v4368_v35  ;;  %v4996_v42 = vadd.f32 %v4935_v18, %v2479_v17 }
 0x8ad   :  { %v4993_v48 = vadd.f32 %v4951_v57, %v2478_v56  ;;  %v2428_v15 = vcombine.high %v2362_v11, %v2362_v11  ;;  %v2435_v37 = vrot.slane %v2362_v11, %v4328_v20  ;;  %v2298_v6 = vpop.f32.mrf.mxu0  ;;  %v2562_v27 = vrot.slane %v2554_v47, %v4328_v20 }
 0x8ae   :  { %v2482_v58 = vadd.f32 %v2427_v44, %v4364_v34  ;;  %v5001_v14 = vadd.f32 %v4944_v61, %v2480_v50  ;;  %v2367_v9 = vadd.f32 %v4925_v10, %v2298_v6  ;;  %v2569_v53 = vrot.slane %v2555_v36, %v4328_v20 }
 0x8af   :  { %v2442_v35 = vrot.slane %v2428_v15, %v4328_v20  ;;  %v2443_v3 = vcombine.high %v2435_v37, %v2435_v37  ;;  %v2483_v43 = vadd.f32 %v2435_v37, %v5464_v24  ;;  %v4023_v25 = vpop.f32.mrf.mxu0  ;;  %v5009_v45 = vadd.f32 %v4939_v7, %v2481_v1 }
 0x8b0   :  { %v2451_v34 = vrot.slane %v2367_v9, %v4328_v20  ;;  %v2571_v22 = vcombine.low %v4980_v21, %v4983_v40  ;;  %v2572_v10 = vcombine.low %v4988_v49, %v4993_v48  ;;  %v5017_v54 = vadd.f32 %v4951_v57, %v2482_v58 }
 0x8b1   :  { %v2444_v55 = vcombine.high %v2442_v35, %v2442_v35  ;;  %v2484_v39 = vadd.f32 %v2443_v3, %v5465_v8  ;;  %v2485_v23 = vadd.f32 %v2442_v35, %v5466_v4  ;;  %v2301_v31 = vpop.f32.mrf.mxu0  ;;  %v5022_v30 = vadd.f32 %v4935_v18, %v2483_v43 }
 0x8b2   :  { %v2452_v60 = vcombine.high %v2451_v34, %v2451_v34  ;;  %v2487_v38 = vadd.f32 %v2451_v34, %v5467_v5  ;;  %v2570_v16 = vcombine.low %v2562_v27, %v2569_v53  ;;  %v2579_v47 = vrot.slane %v2571_v22, %v4328_v20 }
 0x8b3   :  { %v2486_v63 = vadd.f32 %v2444_v55, %v5468_v62  ;;  %v5027_v2 = vadd.f32 %v4944_v61, %v2484_v39  ;;  %v4024_v46 = vpop.f32.mrf.mxu0  ;;  %v2586_v33 = vrot.slane %v2572_v10, %v4328_v20  ;;  %v5032_v0 = vadd.f32 %v4939_v7, %v2485_v23 }
 0x8b4   :  { %v2488_v17 = vadd.f32 %v4186_v59, %v2452_v60  ;;  %v2635_v11 = vsel %vm67_vm0, %v2570_v16, 0.0  ;;  %v2588_v56 = vcombine.low %v4996_v42, %v5001_v14  ;;  %v2589_v44 = vcombine.low %v5009_v45, %v5017_v54 }
 0x8b5   :  { %v5041_v41 = vadd.f32 %v4951_v57, %v2486_v63  ;;  %2636 = vadd.xlane.f32.xlu0 %v2635_v11  ;;  %v2587_v36 = vcombine.low %v2579_v47, %v2586_v33  ;;  %v2605_v7 = vcombine.low %v5022_v30, %v5027_v2  ;;  %v5056_v6 = vadd.f32 %v4935_v18, %v2487_v38 }
 0x8b6   :  { %v5048_v50 = vadd.f32 %v4944_v61, %v2488_v17  ;;  %v2596_v15 = vrot.slane %v2588_v56, %v4328_v20  ;;  %v2603_v37 = vrot.slane %v2589_v44, %v4328_v20 }
 0x8b7   :  { %v2638_v1 = vsel %vm67_vm0, %v2587_v36, 0.0  ;;  %v2606_v57 = vcombine.low %v5032_v0, %v5041_v41  ;;  %5470 = vst [vmem:[#allocation3_spill] sm:$0xff] %v5056_v6  ;;  %v2613_v9 = vrot.slane %v2605_v7, %v4328_v20 }
 0x8b8   :  { %5469 = vst [vmem:[#allocation2_spill] sm:$0xff] %v5048_v50  ;;  %2639 = vadd.xlane.f32.xlu1 %v2638_v1  ;;  %v2604_v58 = vcombine.low %v2596_v15, %v2603_v37  ;;  %v2622_v3 = vcombine.low %v5056_v6, %v5048_v50 }
 0x8b9   :  { %v2620_v27 = vrot.slane %v2606_v57, %v4328_v20 }
 0x8ba   :  { %v2641_v61 = vsel %vm67_vm0, %v2604_v58, 0.0  ;;  %v2629_v43 = vrot.slane %v2622_v3, %v4328_v20 }
 0x8bb   :  { %v2621_v35 = vcombine.low %v2613_v9, %v2620_v27  ;;  %2642 = vadd.xlane.f32.xlu0 %v2641_v61 }
 0x8bc   :  { %v2647_v18 = vsel %vm283_vm2, %v2629_v43, 0.0 }
 0x8bd   :  { %v2644_v24 = vsel %vm67_vm0, %v2621_v35, 0.0 }
 0x8bf   :  { %2645 = vadd.xlane.f32.xlu0 %v2644_v24 }
 0x8c3   :  { %2648 = vadd.xlane.f32.xlu0 %v2647_v18 }
 0x93e   :  { %v2637_v25 = vpop.xlane.xlu0 %2636 }
 0x93f   :  { %v2650_v53 = vmul.f32 0.0625, %v2637_v25 }
 0x941   :  { %v2666_v34 = vrot.slane %v2650_v53, %v4441_v26  ;;  %v2673_v22 = vrot.slane %v2650_v53, %v4444_v28  ;;  %v2680_v10 = vrot.slane %v2650_v53, %v4447_v29  ;;  %v2687_v55 = vrot.slane %v2650_v53, %v4450_v32  ;;  %v2640_v8 = vpop.xlane.xlu1 %2639 }
 0x942   :  { %v2651_v39 = vmul.f32 0.0625, %v2640_v8 }
 0x943   :  { %v5071_v4 = vsub.f32 %v4959_v12, %v2666_v34  ;;  %v5074_v23 = vsub.f32 %v4956_v52, %v2673_v22  ;;  %v5077_v31 = vsub.f32 %v4964_v51, %v2680_v10  ;;  %v5080_v60 = vsub.f32 %v4967_v13, %v2687_v55 }
 0x944   :  { %v2694_v5 = vrot.slane %v2651_v39, %v4441_v26  ;;  %v2701_v38 = vrot.slane %v2651_v39, %v4444_v28  ;;  %v2708_v16 = vrot.slane %v2651_v39, %v4447_v29  ;;  %v2715_v62 = vrot.slane %v2651_v39, %v4450_v32  ;;  %v2643_v63 = vpop.xlane.xlu0 %2642 }
 0x945   :  { %v2822_v46 = vmul.f32 %v5071_v4, %v5071_v4  ;;  %v2823_v47 = vmul.f32 %v5074_v23, %v5074_v23  ;;  %v2824_v33 = vmul.f32 %v5077_v31, %v5077_v31  ;;  %v2825_v59 = vmul.f32 %v5080_v60, %v5080_v60 }
 0x946   :  { %v2652_v17 = vmul.f32 0.0625, %v2643_v63  ;;  %v5095_v11 = vsub.f32 %v4980_v21, %v2694_v5  ;;  %v5098_v56 = vsub.f32 %v4983_v40, %v2701_v38  ;;  %v5101_v36 = vsub.f32 %v4988_v49, %v2708_v16 }
 0x947   :  { %v2858_v44 = vcombine.low %v2822_v46, %v2823_v47  ;;  %v2859_v7 = vcombine.low %v2824_v33, %v2825_v59  ;;  %v5104_v1 = vsub.f32 %v4993_v48, %v2715_v62 }
 0x948   :  { %v2722_v15 = vrot.slane %v2652_v17, %v4441_v26  ;;  %v2729_v37 = vrot.slane %v2652_v17, %v4444_v28  ;;  %v2736_v57 = vrot.slane %v2652_v17, %v4447_v29  ;;  %v2743_v58 = vrot.slane %v2652_v17, %v4450_v32  ;;  %v2646_v9 = vpop.xlane.xlu0 %2645 }
 0x949   :  { %v2866_v27 = vrot.slane %v2858_v44, %v4328_v20  ;;  %v2873_v61 = vrot.slane %v2859_v7, %v4328_v20  ;;  %v2826_v35 = vmul.f32 %v5095_v11, %v5095_v11  ;;  %v2827_v3 = vmul.f32 %v5098_v56, %v5098_v56 }
 0x94a   :  { %v2653_v24 = vmul.f32 0.0625, %v2646_v9  ;;  %v2828_v43 = vmul.f32 %v5101_v36, %v5101_v36  ;;  %v2829_v18 = vmul.f32 %v5104_v1, %v5104_v1  ;;  %v5121_v25 = vsub.f32 %v4996_v42, %v2722_v15 }
 0x94b   :  { %v2874_v53 = vcombine.low %v2866_v27, %v2873_v61  ;;  %v2875_v34 = vcombine.low %v2826_v35, %v2827_v3  ;;  %v5124_v22 = vsub.f32 %v5001_v14, %v2729_v37  ;;  %v5127_v10 = vsub.f32 %v5009_v45, %v2736_v57 }
 0x94c   :  { %v2750_v55 = vrot.slane %v2653_v24, %v4441_v26  ;;  %v2757_v8 = vrot.slane %v2653_v24, %v4444_v28  ;;  %v2764_v39 = vrot.slane %v2653_v24, %v4447_v29  ;;  %v2771_v5 = vrot.slane %v2653_v24, %v4450_v32  ;;  %v2649_v16 = vpop.xlane.xlu0 %2648 }
 0x94d   :  { %v2939_v38 = vsel %vm67_vm0, %v2874_v53, 0.0  ;;  %v2876_v62 = vcombine.low %v2828_v43, %v2829_v18  ;;  %v2883_v63 = vrot.slane %v2875_v34, %v4328_v20  ;;  %v5136_v46 = vsub.f32 %v5017_v54, %v2743_v58 }
 0x94e   :  { %2940 = vadd.xlane.f32.xlu1 %v2939_v38  ;;  %v2654_v47 = vmul.f32 0.0625, %v2649_v16  ;;  %v2830_v33 = vmul.f32 %v5121_v25, %v5121_v25  ;;  %v2831_v59 = vmul.f32 %v5124_v22, %v5124_v22  ;;  %v2832_v17 = vmul.f32 %v5127_v10, %v5127_v10 }
 0x94f   :  { %v2890_v44 = vrot.slane %v2876_v62, %v4328_v20  ;;  %v2833_v7 = vmul.f32 %v5136_v46, %v5136_v46  ;;  %v5148_v15 = vsub.f32 %v5022_v30, %v2750_v55  ;;  %v5151_v37 = vsub.f32 %v5027_v2, %v2757_v8 }
 0x950   :  { %v2778_v57 = vrot.slane %v2654_v47, %v4441_v26  ;;  %v2785_v58 = vrot.slane %v2654_v47, %v4444_v28  ;;  %v2892_v9 = vcombine.low %v2830_v33, %v2831_v59  ;;  %v5156_v27 = vsub.f32 %v5032_v0, %v2764_v39 }
 0x951   :  { %v2891_v61 = vcombine.low %v2883_v63, %v2890_v44  ;;  %v2893_v35 = vcombine.low %v2832_v17, %v2833_v7  ;;  %v5159_v3 = vsub.f32 %v5041_v41, %v2771_v5  ;;  %v2834_v24 = vmul.f32 %v5148_v15, %v5148_v15 }
 0x952   :  { %v5164_v43 = vsub.f32 %v5056_v6, %v2778_v57  ;;  %v5167_v18 = vsub.f32 %v5048_v50, %v2785_v58  ;;  %v2900_v53 = vrot.slane %v2892_v9, %v4328_v20  ;;  %v2835_v34 = vmul.f32 %v5151_v37, %v5151_v37 }
 0x953   :  { %v2942_v55 = vsel %vm67_vm0, %v2891_v61, 0.0  ;;  %v2907_v8 = vrot.slane %v2893_v35, %v4328_v20  ;;  %v2836_v39 = vmul.f32 %v5156_v27, %v5156_v27  ;;  %v2837_v5 = vmul.f32 %v5159_v3, %v5159_v3  ;;  %v4102_v61 = vld [vmem:[%s5443_s10] sm:$0xff]  }
 0x954   :  { %2943 = vadd.xlane.f32.xlu0 %v2942_v55  ;;  %v2909_v38 = vcombine.low %v2834_v24, %v2835_v34  ;;  %v2838_v16 = vmul.f32 %v5164_v43, %v5164_v43  ;;  %v2839_v62 = vmul.f32 %v5167_v18, %v5167_v18  ;;  %4040 = vmatpush3.bf16.msra.mxu0 %v4102_v61 }
 0x955   :  { %v2908_v63 = vcombine.low %v2900_v53, %v2907_v8  ;;  %v2910_v47 = vcombine.low %v2836_v39, %v2837_v5  ;;  %v3863_v39 = vld [vmem:[%s5444_s8] ss:$0 sm:$0xff] }
 0x956   :  { %v2917_v33 = vrot.slane %v2909_v38, %v4328_v20  ;;  %v2926_v59 = vcombine.low %v2838_v16, %v2839_v62  ;;  %v3864_v16 = vld [vmem:[%s5445_s9] ss:$0 sm:$0xff]  ;;  %v3141_v62 = vcombine.high %v3863_v39, %v3863_v39 }
 0x957   :  { %v2945_v17 = vsel %vm67_vm0, %v2908_v63, 0.0  ;;  %v2924_v44 = vrot.slane %v2910_v47, %v4328_v20 }
 0x958   :  { %2946 = vadd.xlane.f32.xlu1 %v2945_v17  ;;  %v2933_v7 = vrot.slane %v2926_v59, %v4328_v20  ;;  %v5198_v59 = vrot.slane %v3863_v39, %v4328_v20  ;;  %v3185_v17 = vcombine.high %v3864_v16, %v3864_v16 }
 0x959   :  { %v2925_v57 = vcombine.low %v2917_v33, %v2924_v44 }
 0x95a   :  { %v2951_v58 = vsel %vm283_vm2, %v2933_v7, 0.0 }
 0x95b   :  { %v2948_v9 = vsel %vm67_vm0, %v2925_v57, 0.0  ;;  %v5201_v57 = vrot.slane %v3141_v62, %v4328_v20 }
 0x95c   :  { %2949 = vadd.xlane.f32.xlu0 %v2948_v9  ;;  %2952 = vadd.xlane.f32.xlu1 %v2951_v58 }
 0x9d7   :  { %v2941_v35 = vpop.xlane.xlu1 %2940 }
 0x9d8   :  { %v2954_v24 = vmul.f32 0.0625, %v2941_v35  ;;  %v5205_v35 = vcombine.high %v5198_v59, %v5198_v59 }
 0x9da   :  { %v2959_v53 = vadd.f32 1e-05, %v2954_v24  ;;  %v5208_v24 = vrot.slane %v3864_v16, %v4328_v20 }
 0x9dc   :  { %4165 = vrsqrt.f32 %v2959_v53  ;;  %v5211_v53 = vrot.slane %v3185_v17, %v4328_v20 }
 0x9dd   :  { %v2944_v34 = vpop.xlane.xlu0 %2943 }
 0x9de   :  { %v2955_v55 = vmul.f32 0.0625, %v2944_v34 }
 0x9e0   :  { %v2960_v8 = vadd.f32 1e-05, %v2955_v55 }
 0x9e1   :  { %v2947_v5 = vpop.xlane.xlu1 %2946 }
 0x9e2   :  { %4167 = vrsqrt.f32 %v2960_v8  ;;  %v2956_v38 = vmul.f32 0.0625, %v2947_v5  ;;  %v5219_v5 = vcombine.high %v5201_v57, %v5201_v57 }
 0x9e4   :  { %v2961_v63 = vadd.f32 1e-05, %v2956_v38 }
 0x9e5   :  { %v2950_v47 = vpop.xlane.xlu0 %2949  ;;  %v2953_v33 = vpop.xlane.xlu1 %2952 }
 0x9e6   :  { %4169 = vrsqrt.f32 %v2961_v63  ;;  %v2957_v44 = vmul.f32 0.0625, %v2950_v47  ;;  %v2958_v7 = vmul.f32 0.0625, %v2953_v33  ;;  %v5227_v47 = vcombine.high %v5208_v24, %v5208_v24 }
 0x9e7   :  { %v5231_v33 = vcombine.high %v5211_v53, %v5211_v53 }
 0x9e8   :  { %v2962_v58 = vadd.f32 1e-05, %v2957_v44  ;;  %v2963_v9 = vadd.f32 1e-05, %v2958_v7 }
 0x9e9   :  { %v4166_v61 = vpop.eup %4165 }
 0x9ea   :  { %4171 = vrsqrt.f32 %v2962_v58  ;;  %v2980_v34 = vrot.slane %v4166_v61, %v4441_v26  ;;  %v2987_v55 = vrot.slane %v4166_v61, %v4444_v28  ;;  %v2994_v8 = vrot.slane %v4166_v61, %v4447_v29 }
 0x9eb   :  { %4173 = vrsqrt.f32 %v2963_v9  ;;  %v3001_v39 = vrot.slane %v4166_v61, %v4450_v32 }
 0x9ec   :  { %v3118_v38 = vmul.f32 %v2980_v34, %v5071_v4  ;;  %v3119_v16 = vmul.f32 %v2987_v55, %v5074_v23  ;;  %v3120_v62 = vmul.f32 %v2994_v8, %v5077_v31 }
 0x9ed   :  { %v3121_v63 = vmul.f32 %v3001_v39, %v5080_v60 }
 0x9ee   :  { %v3162_v17 = vmul.f32 %v5198_v59, %v3118_v38  ;;  %v3163_v44 = vmul.f32 %v5205_v35, %v3119_v16  ;;  %v3164_v4 = vmul.f32 %v5201_v57, %v3120_v62 }
 0x9ef   :  { %v4168_v7 = vpop.eup %4167  ;;  %v3165_v23 = vmul.f32 %v5219_v5, %v3121_v63 }
 0x9f0   :  { %v3008_v31 = vrot.slane %v4168_v7, %v4441_v26  ;;  %v3015_v60 = vrot.slane %v4168_v7, %v4444_v28  ;;  %v3022_v58 = vrot.slane %v4168_v7, %v4447_v29  ;;  %v3029_v9 = vrot.slane %v4168_v7, %v4450_v32 }
 0x9f1   :  { %v3206_v61 = vadd.f32 %v5208_v24, %v3162_v17  ;;  %v3207_v34 = vadd.f32 %v5227_v47, %v3163_v44  ;;  %v3208_v55 = vadd.f32 %v5211_v53, %v3164_v4  ;;  %v3209_v8 = vadd.f32 %v5231_v33, %v3165_v23 }
 0x9f2   :  { %v3122_v39 = vmul.f32 %v3008_v31, %v5095_v11  ;;  %v3123_v38 = vmul.f32 %v3015_v60, %v5098_v56  ;;  %v3124_v16 = vmul.f32 %v3022_v58, %v5101_v36  ;;  %v3125_v62 = vmul.f32 %v3029_v9, %v5104_v1 }
 0x9f3   :  { %v4170_v63 = vpop.eup %4169  ;;  %v3242_v50 = vcombine.low %v3206_v61, %v3207_v34  ;;  %v3243_v6 = vcombine.low %v3208_v55, %v3209_v8 }
 0x9f4   :  { %v3166_v7 = vmul.f32 %v5198_v59, %v3122_v39  ;;  %v3167_v17 = vmul.f32 %v5205_v35, %v3123_v38  ;;  %v3168_v44 = vmul.f32 %v5201_v57, %v3124_v16  ;;  %v3169_v4 = vmul.f32 %v5219_v5, %v3125_v62 }
 0x9f5   :  { %v3250_v23 = vrot.slane %v3242_v50, %v4328_v20  ;;  %v3257_v11 = vrot.slane %v3243_v6, %v4328_v20  ;;  %v3036_v56 = vrot.slane %v4170_v63, %v4441_v26  ;;  %v3043_v36 = vrot.slane %v4170_v63, %v4444_v28 }
 0x9f6   :  { %v3210_v1 = vadd.f32 %v5208_v24, %v3166_v7  ;;  %v3211_v31 = vadd.f32 %v5227_v47, %v3167_v17  ;;  %v3212_v60 = vadd.f32 %v5211_v53, %v3168_v44  ;;  %v3213_v58 = vadd.f32 %v5231_v33, %v3169_v4 }
 0x9f7   :  { %v4172_v9 = vpop.eup %4171  ;;  %v3258_v61 = vcombine.low %v3250_v23, %v3257_v11  ;;  %v3050_v34 = vrot.slane %v4170_v63, %v4447_v29  ;;  %v3057_v50 = vrot.slane %v4170_v63, %v4450_v32  ;;  %v3126_v6 = vmul.f32 %v3036_v56, %v5121_v25 }
 0x9f8   :  { %v4174_v55 = vpop.eup %4173  ;;  %v3259_v8 = vcombine.low %v3210_v1, %v3211_v31  ;;  %v3260_v39 = vcombine.low %v3212_v60, %v3213_v58  ;;  %v3064_v38 = vrot.slane %v4172_v9, %v4441_v26  ;;  %v3071_v16 = vrot.slane %v4172_v9, %v4444_v28 }
 0x9f9   :  { %v3092_v62 = vrot.slane %v4174_v55, %v4441_v26  ;;  %v3099_v7 = vrot.slane %v4174_v55, %v4444_v28  ;;  %v3078_v17 = vrot.slane %v4172_v9, %v4447_v29  ;;  %v3085_v44 = vrot.slane %v4172_v9, %v4450_v32 }
 0x9fa   :  { %v3267_v4 = vrot.slane %v3259_v8, %v4328_v20  ;;  %v3274_v63 = vrot.slane %v3260_v39, %v4328_v20  ;;  %v3127_v25 = vmul.f32 %v3043_v36, %v5124_v22  ;;  %v3128_v23 = vmul.f32 %v3050_v34, %v5127_v10 }
 0x9fb   :  { %v3129_v11 = vmul.f32 %v3057_v50, %v5136_v46  ;;  %v3130_v56 = vmul.f32 %v3064_v38, %v5148_v15  ;;  %v3131_v26 = vmul.f32 %v3071_v16, %v5151_v37  ;;  %v3132_v28 = vmul.f32 %v3078_v17, %v5156_v27 }
 0x9fc   :  { %v3275_v1 = vcombine.low %v3267_v4, %v3274_v63  ;;  %v3133_v29 = vmul.f32 %v3085_v44, %v5159_v3  ;;  %v3170_v32 = vmul.f32 %v5198_v59, %v3126_v6  ;;  %v3171_v31 = vmul.f32 %v5205_v35, %v3127_v25 }
 0x9fd   :  { %v3172_v60 = vmul.f32 %v5201_v57, %v3128_v23  ;;  %v3173_v22 = vmul.f32 %v5219_v5, %v3129_v11  ;;  %v3174_v10 = vmul.f32 %v5198_v59, %v3130_v56  ;;  %v3175_v46 = vmul.f32 %v5205_v35, %v3131_v26  ;;  %v4105_v23 = vld [vmem:[%s5446_s12 + $0x8] sm:$0xff]   ;;  %v4106_v11 = vld [vmem:[%s5446_s12] sm:$0xff]  }
 0x9fe   :  { %v3323_v15 = vpack.c.bf16 %v3275_v1, %v3258_v61  ;;  %v3176_v37 = vmul.f32 %v5201_v57, %v3132_v28  ;;  %v3177_v27 = vmul.f32 %v5219_v5, %v3133_v29  ;;  %v3214_v36 = vadd.f32 %v5208_v24, %v3170_v32  ;;  %v3865_v56 = vld [vmem:[%s5447_s11] ss:$0 sm:$0xff] }
 0x9ff   :  { %v3215_v3 = vadd.f32 %v5227_v47, %v3171_v31  ;;  %v3216_v58 = vadd.f32 %v5211_v53, %v3172_v60  ;;  %v3217_v9 = vadd.f32 %v5231_v33, %v3173_v22  ;;  %v3218_v34 = vadd.f32 %v5208_v24, %v3174_v10 }
 0xa00   :  { %4042 = vmatmul.mubr.msk.bf16.vlgmr.msra.gmra.mxu0 %vm67_vm0, %v3323_v15  ;;  %v3219_v50 = vadd.f32 %v5227_v47, %v3175_v46  ;;  %v3220_v61 = vadd.f32 %v5211_v53, %v3176_v37  ;;  %v3221_v57 = vadd.f32 %v5231_v33, %v3177_v27  ;;  %v3134_v5 = vmul.f32 %v3092_v62, %v5164_v43 }
 0xa01   :  { %4045 = vmatprep.mubr.msk.bf16.mxu0 %vm4193_vm3, %v5463_v19  ;;  %v3276_v6 = vcombine.low %v3214_v36, %v3215_v3  ;;  %v3277_v55 = vcombine.low %v3216_v58, %v3217_v9  ;;  %v3135_v8 = vmul.f32 %v3099_v7, %v5167_v18 }
 0xa02   :  { %v3293_v39 = vcombine.low %v3218_v34, %v3219_v50  ;;  %v3294_v38 = vcombine.low %v3220_v61, %v3221_v57  ;;  %v3178_v16 = vmul.f32 %v5198_v59, %v3134_v5 }
 0xa03   :  { %v3284_v17 = vrot.slane %v3276_v6, %v4328_v20  ;;  %v3291_v44 = vrot.slane %v3277_v55, %v4328_v20  ;;  %v3179_v53 = vmul.f32 %v5205_v35, %v3135_v8 }
 0xa04   :  { %v3301_v33 = vrot.slane %v3293_v39, %v4328_v20  ;;  %v3308_v43 = vrot.slane %v3294_v38, %v4328_v20  ;;  %v3222_v62 = vadd.f32 %v5208_v24, %v3178_v16  ;;  %v4103_v24 = vld [vmem:[%s5446_s12 + $0x18] sm:$0xff]  }
 0xa05   :  { %v3223_v4 = vadd.f32 %v5227_v47, %v3179_v53  ;;  %v3292_v63 = vcombine.low %v3284_v17, %v3291_v44  ;;  %4054 = vmatpush3.bf16.msra.mxu1 %v4103_v24  ;;  %v4104_v47 = vld [vmem:[%s5446_s12 + $0x10] sm:$0xff]  }
 0xa06   :  { %v3309_v18 = vcombine.low %v3301_v33, %v3308_v43  ;;  %4055 = vmatprep.subr.bf16.mxu1 %v5463_v19 }
 0xa07   :  { %v3310_v25 = vcombine.low %v3222_v62, %v3223_v4 }
 0xa08   :  { %v3324_v7 = vpack.c.bf16 %v3309_v18, %v3292_v63 }
 0xa09   :  { %v3317_v59 = vrot.slane %v3310_v25, %v4328_v20  ;;  %4056 = vmatpush3.bf16.msra.mxu1 %v4104_v47 }
 0xa0a   :  { %4046 = vmatmul.mubr.msk.bf16.gmra.mxu0 %vm67_vm0, %v3324_v7  ;;  %4057 = vmatprep.subr.bf16.mxu1 %v5463_v19 }
 0xa0b   :  { %4049 = vmatprep.mubr.msk.bf16.mxu0 %vm4193_vm3, %v5463_v19  ;;  %v3325_v35 = vpack.c.bf16 %v3317_v59, %v3317_v59 }
 0xa0d   :  { %4058 = vmatpush3.bf16.msra.mxu1 %v4105_v23 }
 0xa0e   :  { %4059 = vmatprep.subr.bf16.mxu1 %v5463_v19 }
 0xa11   :  { %4060 = vmatpush3.bf16.msra.mxu1 %v4106_v11 }
 0xa12   :  { %4050 = vmatmul.mubr.msk.bf16.gmra.mxu0 %vm67_vm0, %v3325_v35 }
 0xac0   :  { %v3384_v26 = vpop.f32.mrf.mxu0 }
 0xac1   :  { %v3385_v28 = vadd.f32 %v3865_v56, %v3384_v26 }
 0xac2   :  { %v4043_v1 = vpop.f32.mrf.mxu0 }
 0xac3   :  { %v3406_v29 = vmul.f32 %v3385_v28, %v3385_v28 }
 0xac4   :  { %v3387_v32 = vpop.f32.mrf.mxu0 }
 0xac5   :  { %v3411_v31 = vmul.f32 %v3406_v29, %v3385_v28  ;;  %v3388_v60 = vadd.f32 %v3865_v56, %v3387_v32 }
 0xac6   :  { %v4044_v22 = vpop.f32.mrf.mxu0 }
 0xac7   :  { %v3416_v10 = vmul.f32 0.044715, %v3411_v31  ;;  %v3407_v46 = vmul.f32 %v3388_v60, %v3388_v60 }
 0xac9   :  { %v3421_v15 = vadd.f32 %v3416_v10, %v3385_v28  ;;  %v3412_v37 = vmul.f32 %v3407_v46, %v3388_v60 }
 0xaca   :  { %v3392_v27 = vpop.f32.mrf.mxu0 }
 0xacb   :  { %v3426_v36 = vmul.f32 0.7978846, %v3421_v15  ;;  %v3417_v3 = vmul.f32 0.044715, %v3412_v37  ;;  %v3393_v58 = vadd.f32 %v3865_v56, %v3392_v27 }
 0xacc   :  { %v4047_v9 = vpop.f32.mrf.mxu0 }
 0xacd   :  { %4175 = vtanh.f32 %v3426_v36  ;;  %v3422_v34 = vadd.f32 %v3417_v3, %v3388_v60  ;;  %v3408_v50 = vmul.f32 %v3393_v58, %v3393_v58 }
 0xace   :  { %v3395_v61 = vpop.f32.mrf.mxu0 }
 0xacf   :  { %v3427_v57 = vmul.f32 0.7978846, %v3422_v34  ;;  %v3413_v5 = vmul.f32 %v3408_v50, %v3393_v58  ;;  %v3396_v6 = vadd.f32 %v3865_v56, %v3395_v61 }
 0xad0   :  { %v4048_v55 = vpop.f32.mrf.mxu0 }
 0xad1   :  { %4177 = vtanh.f32 %v3427_v57  ;;  %v3418_v8 = vmul.f32 0.044715, %v3413_v5  ;;  %v3409_v39 = vmul.f32 %v3396_v6, %v3396_v6  ;;  %v3877_v57 = vld [vmem:[%s5448_s13] ss:$0 sm:$0xff] }
 0xad2   :  { %v3400_v38 = vpop.f32.mrf.mxu0  ;;  %v3675_v5 = vcombine.high %v3877_v57, %v3877_v57 }
 0xad3   :  { %v3423_v16 = vadd.f32 %v3418_v8, %v3393_v58  ;;  %v3414_v17 = vmul.f32 %v3409_v39, %v3396_v6  ;;  %v3401_v44 = vadd.f32 %v3865_v56, %v3400_v38 }
 0xad4   :  { %v4051_v53 = vpop.f32.mrf.mxu0  ;;  %v5346_v39 = vrot.slane %v3675_v5, %v4328_v20 }
 0xad5   :  { %v3428_v33 = vmul.f32 0.7978846, %v3423_v16  ;;  %v3419_v43 = vmul.f32 0.044715, %v3414_v17  ;;  %v3410_v62 = vmul.f32 %v3401_v44, %v3401_v44 }
 0xad6   :  { %v3403_v4 = vpop.f32.mrf.mxu0 }
 0xad7   :  { %4179 = vtanh.f32 %v3428_v33  ;;  %v3424_v63 = vadd.f32 %v3419_v43, %v3396_v6  ;;  %v3415_v18 = vmul.f32 %v3410_v62, %v3401_v44  ;;  %v5358_v4 = vcombine.high %v5346_v39, %v5346_v39 }
 0xad8   :  { %v4052_v7 = vpop.f32.mrf.mxu0 }
 0xad9   :  { %v3429_v25 = vmul.f32 0.7978846, %v3424_v63  ;;  %v3420_v59 = vmul.f32 0.044715, %v3415_v18 }
 0xada   :  { %v4176_v35 = vpop.eup %4175 }
 0xadb   :  { %v3436_v24 = vadd.f32 1.0, %v4176_v35  ;;  %4181 = vtanh.f32 %v3429_v25  ;;  %v3425_v47 = vadd.f32 %v3420_v59, %v3401_v44 }
 0xadd   :  { %v3430_v23 = vmul.f32 0.7978846, %v3425_v47  ;;  %v3441_v26 = vmul.f32 0.5, %v3436_v24 }
 0xade   :  { %v4178_v11 = vpop.eup %4177 }
 0xadf   :  { %v3437_v1 = vadd.f32 1.0, %v4178_v11  ;;  %4183 = vtanh.f32 %v3430_v23  ;;  %v3446_v29 = vmul.f32 %v3441_v26, %v3385_v28 }
 0xae1   :  { %v3442_v56 = vmul.f32 0.5, %v3437_v1 }
 0xae3   :  { %v3447_v32 = vmul.f32 %v3442_v56, %v3388_v60 }
 0xae4   :  { %v4180_v31 = vpop.eup %4179 }
 0xae5   :  { %v3451_v22 = vpack.c.bf16 %v3447_v32, %v3446_v29  ;;  %v3438_v10 = vadd.f32 1.0, %v4180_v31 }
 0xae7   :  { %4062 = vmatmul.mubr.msk.bf16.vlgmr.msra.gmra.mxu1 %vm3486_vm9, %v3451_v22  ;;  %v3443_v15 = vmul.f32 0.5, %v3438_v10 }
 0xae8   :  { %v4182_v46 = vpop.eup %4181  ;;  %4065 = vmatprep.mubr.msk.bf16.mxu1 %vm4193_vm3, %v5463_v19 }
 0xae9   :  { %v3439_v37 = vadd.f32 1.0, %v4182_v46  ;;  %v3448_v3 = vmul.f32 %v3443_v15, %v3393_v58  ;;  %v5342_v58 = vrot.slane %v3877_v57, %v4328_v20 }
 0xaeb   :  { %v3444_v27 = vmul.f32 0.5, %v3439_v37 }
 0xaec   :  { %v4184_v36 = vpop.eup %4183 }
 0xaed   :  { %v3449_v9 = vmul.f32 %v3444_v27, %v3396_v6  ;;  %v3440_v34 = vadd.f32 1.0, %v4184_v36 }
 0xaef   :  { %v3452_v50 = vpack.c.bf16 %v3449_v9, %v3448_v3  ;;  %v3445_v28 = vmul.f32 0.5, %v3440_v34 }
 0xaf1   :  { %4066 = vmatmul.mubr.msk.bf16.gmra.mxu1 %vm3486_vm9, %v3452_v50  ;;  %v3450_v60 = vmul.f32 %v3445_v28, %v3401_v44  ;;  %v5352_v44 = vcombine.high %v5342_v58, %v5342_v58 }
 0xaf2   :  { %4069 = vmatprep.mubr.msk.bf16.mxu1 %vm4193_vm3, %v5463_v19 }
 0xaf3   :  { %v3453_v61 = vpack.c.bf16 %v3450_v60, %v3450_v60 }
 0xaf9   :  { %4070 = vmatmul.mubr.msk.bf16.gmra.mxu1 %vm3486_vm9, %v3453_v61 }
 0xba7   :  { %v3530_v6 = vpop.f32.mrf.mxu1 }
 0xba8   :  { %v3557_v55 = vcombine.high %v3530_v6, %v3530_v6  ;;  %v3564_v8 = vrot.slane %v3530_v6, %v4328_v20 }
 0xba9   :  { %v4063_v19 = vpop.f32.mrf.mxu1 }
 0xbaa   :  { %v3571_v38 = vrot.slane %v3557_v55, %v4328_v20  ;;  %v3572_v16 = vcombine.high %v3564_v8, %v3564_v8  ;;  %v3651_v17 = vadd.f32 %v3564_v8, %v4959_v12 }
 0xbab   :  { %v3533_v53 = vpop.f32.mrf.mxu1 }
 0xbac   :  { %v3573_v33 = vcombine.high %v3571_v38, %v3571_v38  ;;  %v3652_v43 = vadd.f32 %v3572_v16, %v4956_v52  ;;  %v3653_v62 = vadd.f32 %v3571_v38, %v4964_v51  ;;  %v3574_v63 = vcombine.high %v3533_v53, %v3533_v53 }
 0xbad   :  { %v3581_v18 = vrot.slane %v3533_v53, %v4328_v20  ;;  %v4064_v7 = vpop.f32.mrf.mxu1  ;;  %v3696_v25 = vadd.f32 %v5342_v58, %v3651_v17 }
 0xbae   :  { %v3654_v12 = vadd.f32 %v3573_v33, %v4967_v13  ;;  %v3697_v59 = vadd.f32 %v5352_v44, %v3652_v43  ;;  %v3588_v35 = vrot.slane %v3574_v63, %v4328_v20  ;;  %v3698_v51 = vadd.f32 %v5346_v39, %v3653_v62 }
 0xbaf   :  { %v3589_v24 = vcombine.high %v3581_v18, %v3581_v18  ;;  %v3655_v52 = vadd.f32 %v3581_v18, %v4980_v21 }
 0xbb0   :  { %v3699_v47 = vadd.f32 %v5358_v4, %v3654_v12  ;;  %v3732_v23 = vcombine.low %v3696_v25, %v3697_v59  ;;  %v3590_v11 = vcombine.high %v3588_v35, %v3588_v35  ;;  %v3657_v1 = vadd.f32 %v3588_v35, %v4988_v49 }
 0xbb1   :  { %v3656_v26 = vadd.f32 %v3589_v24, %v4983_v40  ;;  %v3538_v13 = vpop.f32.mrf.mxu1  ;;  %v3700_v21 = vadd.f32 %v5342_v58, %v3655_v52  ;;  %v5471_v24 = vld [vmem:[#allocation3_spill] sm:$0xff] }
 0xbb2   :  { %v3733_v56 = vcombine.low %v3698_v51, %v3699_v47  ;;  %v3591_v29 = vcombine.high %v3538_v13, %v3538_v13  ;;  %v3598_v32 = vrot.slane %v3538_v13, %v4328_v20  ;;  %v3740_v31 = vrot.slane %v3732_v23, %v4328_v20  ;;  %v5472_v23 = vld [vmem:[#allocation2_spill] sm:$0xff] }
 0xbb3   :  { %v3658_v22 = vadd.f32 %v3590_v11, %v4993_v48  ;;  %v3701_v10 = vadd.f32 %v5352_v44, %v3656_v26  ;;  %v4067_v46 = vpop.f32.mrf.mxu1  ;;  %v3702_v27 = vadd.f32 %v5346_v39, %v3657_v1 }
 0xbb4   :  { %v3747_v15 = vrot.slane %v3733_v56, %v4328_v20  ;;  %v3605_v40 = vrot.slane %v3591_v29, %v4328_v20  ;;  %v3606_v37 = vcombine.high %v3598_v32, %v3598_v32  ;;  %v3659_v49 = vadd.f32 %v3598_v32, %v4996_v42 }
 0xbb5   :  { %v3703_v36 = vadd.f32 %v5358_v4, %v3658_v22  ;;  %v3749_v3 = vcombine.low %v3700_v21, %v3701_v10  ;;  %v3541_v9 = vpop.f32.mrf.mxu1 }
 0xbb6   :  { %v3748_v34 = vcombine.low %v3740_v31, %v3747_v15  ;;  %v3607_v48 = vcombine.high %v3605_v40, %v3605_v40  ;;  %v3660_v50 = vadd.f32 %v3606_v37, %v5001_v14  ;;  %v3661_v28 = vadd.f32 %v3605_v40, %v5009_v45 }
 0xbb7   :  { %v3750_v60 = vcombine.low %v3702_v27, %v3703_v36  ;;  %v3704_v61 = vadd.f32 %v5342_v58, %v3659_v49  ;;  %v3608_v57 = vcombine.high %v3541_v9, %v3541_v9  ;;  %v4068_v5 = vpop.f32.mrf.mxu1  ;;  %v3615_v14 = vrot.slane %v3541_v9, %v4328_v20 }
 0xbb8   :  { %3820 = vst.msk [vmem:[%s5436_s14] sm:$0xff] %vm67_vm0, %v3748_v34  ;;  %v3662_v42 = vadd.f32 %v3607_v48, %v5017_v54  ;;  %v3705_v6 = vadd.f32 %v5352_v44, %v3660_v50  ;;  %v3706_v55 = vadd.f32 %v5346_v39, %v3661_v28  ;;  %v3757_v45 = vrot.slane %v3749_v3, %v4328_v20 }
 0xbb9   :  { %v3764_v8 = vrot.slane %v3750_v60, %v4328_v20  ;;  %v3772_v19 = vrot.slane %v3704_v61, %v4328_v20  ;;  %v3622_v38 = vrot.slane %v3608_v57, %v4328_v20  ;;  %v3546_v16 = vpop.f32.mrf.mxu1  ;;  %v3623_v17 = vcombine.high %v3615_v14, %v3615_v14 }
 0xbba   :  { %v3663_v53 = vadd.f32 %v3615_v14, %v5022_v30  ;;  %v3707_v54 = vadd.f32 %v5358_v4, %v3662_v42  ;;  %v3631_v63 = vrot.slane %v3546_v16, %v4328_v20  ;;  %v3773_v7 = vcombine.low %v3705_v6, %v3706_v55 }
 0xbbb   :  { %v3765_v33 = vcombine.low %v3757_v45, %v3764_v8  ;;  %3823 = vst.msk [vmem:[%s5436_s14 + $0x10] sm:$0x3] %vm70_vm1, %v3772_v19  ;;  %v3624_v43 = vcombine.high %v3622_v38, %v3622_v38  ;;  %v3665_v62 = vadd.f32 %v3622_v38, %v5032_v0  ;;  %v4071_v18 = vpop.f32.mrf.mxu1  ;;  %v3664_v12 = vadd.f32 %v3623_v17, %v5027_v2 }
 0xbbc   :  { %v3708_v25 = vadd.f32 %v5342_v58, %v3663_v53  ;;  %v3632_v35 = vcombine.high %v3631_v63, %v3631_v63  ;;  %v3667_v0 = vadd.f32 %v3631_v63, %v5471_v24  ;;  %v3781_v13 = vrot.slane %v3773_v7, %v4328_v20 }
 0xbbd   :  { %3821 = vst.msk [vmem:[%s5436_s14 + $0x8] sm:$0xff] %vm67_vm0, %v3765_v33  ;;  %v3666_v30 = vadd.f32 %v3624_v43, %v5041_v41  ;;  %v3710_v59 = vadd.f32 %v5346_v39, %v3665_v62  ;;  %v3549_v52 = vpop.f32.mrf.mxu1  ;;  %v3709_v51 = vadd.f32 %v5352_v44, %v3664_v12 }
 0xbbe   :  { %v3774_v47 = vcombine.low %v3707_v54, %v3708_v25  ;;  %v3668_v2 = vadd.f32 %v3632_v35, %v5472_v23  ;;  %v3712_v26 = vadd.f32 %v5342_v58, %v3667_v0 }
 0xbbf   :  { %v3711_v11 = vadd.f32 %v5358_v4, %v3666_v30  ;;  %v4072_v1 = vpop.f32.mrf.mxu1  ;;  %v3790_v56 = vcombine.low %v3709_v51, %v3710_v59 }
 0xbc0   :  { %v3788_v41 = vrot.slane %v3774_v47, %v4328_v20  ;;  %v3713_v39 = vadd.f32 %v5352_v44, %v3668_v2 }
 0xbc1   :  { %v3791_v29 = vcombine.low %v3711_v11, %v3712_v26  ;;  %v3798_v31 = vrot.slane %v3790_v56, %v4328_v20 }
 0xbc2   :  { %v3789_v32 = vcombine.low %v3781_v13, %v3788_v41  ;;  %v3813_v21 = vrot.slane %v3713_v39, %v4328_v20 }
 0xbc3   :  { %v3805_v22 = vrot.slane %v3791_v29, %v4328_v20 }
 0xbc4   :  { %3824 = vst.msk [vmem:[%s5436_s14 + $0x18] sm:$0xff] %vm67_vm0, %v3789_v32 }
 0xbc5   :  { %v3806_v58 = vcombine.low %v3798_v31, %v3805_v22  ;;  %3826 = vst.msk [vmem:[%s5436_s14 + $0x28] sm:$0x3] %vm70_vm1, %v3813_v21 }
 0xbc7   :  { %3825 = vst.msk [vmem:[%s5436_s14 + $0x20] sm:$0xff] %vm67_vm0, %v3806_v58 }

</bundles_post_ra>
